<compile_context>
chip_gen: v5e
topology: v5e:2x2
jax: 0.10.0
libtpu: 0.0.40
codegen_flags: <defaults>
</compile_context>

<pallas_src>
import numpy as np
import jax
import jax.numpy as jnp
from jax import lax
from jax.experimental import pallas as pl
from jax.experimental.pallas import tpu as pltpu

# ----- configuration (small shapes consistent with the module) -----
DIM = 32
H = W = 8
NUM_HEADS = 4
WINDOW = 4
SHIFT = 2                       # shift_size > 0 exercises the attn_mask path
MLP_RATIO = 4.0
B = 2
L = H * W                       # tokens per image
N = WINDOW * WINDOW             # tokens per window
NW = (H // WINDOW) * (W // WINDOW)
HEAD_DIM = DIM // NUM_HEADS
SCALE = HEAD_DIM ** (-0.5)
HIDDEN = int(DIM * MLP_RATIO)
EPS = 1e-5
TL = B * L                      # total tokens handled by the fused kernel
NEG = -1e9                      # "different shifted window" additive offset


def _gelu_tanh(x):
    # tanh-approximate GELU (EUP tanh slot).  PyTorch nn.GELU() default is
    # exact erf; max abs difference ~3e-3, inside test tolerance.
    # TODO(synk): switch to lax.erf if exact-erf lowering is required.
    c = 0.7978845608028654      # sqrt(2/pi)
    return 0.5 * x * (1.0 + jnp.tanh(c * (x + 0.044715 * x * x * x)))


# ---------------------------------------------------------------------------
# fused kernel: LN1 + shifted-window MHA + residual + LN2 + MLP + residual
# ---------------------------------------------------------------------------
def swin_block_kernel(x_ref, vec_ref, wqkv_ref, wproj_ref, w1_ref, w2_ref,
                      bias_ref, o_ref, attn_scr):
    f32, bf16 = jnp.float32, jnp.bfloat16

    x = x_ref[...]                                   # (TL, C) f32
    vec = vec_ref[...]                               # (8, 128) packed params
    g1 = vec[0:1, :DIM]
    bt1 = vec[1:2, :DIM]
    g2 = vec[2:3, :DIM]
    bt2 = vec[3:4, :DIM]
    bproj = vec[4:5, :DIM]
    mb2 = vec[5:6, :DIM]
    mb1 = vec[6:7, :HIDDEN]
    bqkv = vec[7:8, :3 * DIM]

    # ---- LayerNorm 1 (f32 statistics) ----
    mu = jnp.mean(x, axis=-1, keepdims=True)
    var = jnp.mean((x - mu) ** 2, axis=-1, keepdims=True)
    xn = (x - mu) * lax.rsqrt(var + EPS) * g1 + bt1

    # ---- fused QKV projection: one (TL,C)x(C,3C) MXU matmul, scale folded ----
    qkv = jnp.dot(xn.astype(bf16), wqkv_ref[...],
                  preferred_element_type=f32) + bqkv           # (TL, 3C) f32

    # ---- shifted-window attention, per image / per head (block diagonal) ----
    # Window shift, partition, region mask and rel-pos bias live entirely in
    # the precomputed additive bias (nH, L, L); it is identical for each image.
    for b in range(B):
        rows = slice(b * L, (b + 1) * L)
        for h in range(NUM_HEADS):
            qs = slice(h * HEAD_DIM, (h + 1) * HEAD_DIM)
            ks = slice(DIM + h * HEAD_DIM, DIM + (h + 1) * HEAD_DIM)
            vs = slice(2 * DIM + h * HEAD_DIM, 2 * DIM + (h + 1) * HEAD_DIM)
            q_bh = qkv[rows, qs].astype(bf16)                  # (L, D)
            k_bh = qkv[rows, ks].astype(bf16)
            v_bh = qkv[rows, vs].astype(bf16)

            s = jnp.einsum("nd,md->nm", q_bh, k_bh,
                           preferred_element_type=f32)         # (L, L) f32
            s = s + bias_ref[h].astype(f32)
            s = s - jnp.max(s, axis=-1, keepdims=True)
            e = jnp.exp(s)
            p = e * pl.reciprocal(jnp.sum(e, axis=-1, keepdims=True),
                                  approx=True)
            o_bh = jnp.dot(p.astype(bf16), v_bh,
                           preferred_element_type=f32)         # (L, D)
            attn_scr[rows, qs] = o_bh                          # head h -> ch h*D..

    # ---- single wide output projection over all TL tokens ----
    attn = jnp.dot(attn_scr[...].astype(bf16), wproj_ref[...],
                   preferred_element_type=f32) + bproj         # (TL, C)

    # ---- residual + LayerNorm 2 + MLP + residual ----
    h1 = x + attn
    mu2 = jnp.mean(h1, axis=-1, keepdims=True)
    var2 = jnp.mean((h1 - mu2) ** 2, axis=-1, keepdims=True)
    hn = (h1 - mu2) * lax.rsqrt(var2 + EPS) * g2 + bt2
    z = jnp.dot(hn.astype(bf16), w1_ref[...],
                preferred_element_type=f32) + mb1
    z = _gelu_tanh(z)
    z = jnp.dot(z.astype(bf16), w2_ref[...],
                preferred_element_type=f32) + mb2
    o_ref[...] = h1 + z


def _full_spec(arr):
    nd = arr.ndim

    def idx(i):
        return (0,) * nd

    return pl.BlockSpec(arr.shape, idx)


def swin_block_forward(x, kp):
    """x: (B, L, C) f32 -> (B, L, C) f32 via one fused Pallas kernel."""
    Bx, Lx, Cx = x.shape
    x2 = x.reshape(Bx * Lx, Cx)
    operands = [x2, kp["vec"], kp["wqkv"], kp["wproj"], kp["w1"], kp["w2"],
                kp["bias"]]
    out = pl.pallas_call(
        swin_block_kernel,
        out_shape=jax.ShapeDtypeStruct((Bx * Lx, Cx), x.dtype),
        grid=(1,),
        in_specs=[_full_spec(a) for a in operands],
        out_specs=pl.BlockSpec((Bx * Lx, Cx), lambda i: (0, 0)),
        scratch_shapes=[pltpu.VMEM((Bx * Lx, Cx), jnp.float32)],
        compiler_params=pltpu.CompilerParams(
            dimension_semantics=("arbitrary",)),
    )(*operands)
    return out.reshape(Bx, Lx, Cx)


# ---------------------------------------------------------------------------
# host-side precompute: fused QKV weight, packed small params, fused attn bias
# ---------------------------------------------------------------------------
def prepare_kernel_params(p, attn_bias_bf16):
    assert HIDDEN <= 128 and 3 * DIM <= 128, "packed-vector rows assume <=128 lanes"
    bf16 = jnp.bfloat16
    qkv_w = np.asarray(p["qkv_w"], np.float32).copy()          # (C, 3C), x @ W
    qkv_b = np.asarray(p["qkv_b"], np.float32).reshape(3 * DIM).copy()
    qkv_w[:, :DIM] *= SCALE                                    # fold q scale
    qkv_b[:DIM] *= SCALE

    vec = np.zeros((8, 128), np.float32)
    vec[0, :DIM] = np.asarray(p["g1"]).reshape(-1)
    vec[1, :DIM] = np.asarray(p["be1"]).reshape(-1)
    vec[2, :DIM] = np.asarray(p["g2"]).reshape(-1)
    vec[3, :DIM] = np.asarray(p["be2"]).reshape(-1)
    vec[4, :DIM] = np.asarray(p["proj_b"]).reshape(-1)
    vec[5, :DIM] = np.asarray(p["fc2_b"]).reshape(-1)
    vec[6, :HIDDEN] = np.asarray(p["fc1_b"]).reshape(-1)
    vec[7, :3 * DIM] = qkv_b

    return {
        "vec": jnp.asarray(vec),
        "wqkv": jnp.asarray(qkv_w).astype(bf16),
        "wproj": jnp.asarray(np.asarray(p["proj_w"], np.float32)).astype(bf16),
        "w1": jnp.asarray(np.asarray(p["fc1_w"], np.float32)).astype(bf16),
        "w2": jnp.asarray(np.asarray(p["fc2_w"], np.float32)).astype(bf16),
        "bias": attn_bias_bf16,
    }


def make_rel_bias_np(table_np):
    """(nH, N, N) relative position bias, identical to the PyTorch buffer math."""
    coords = np.stack(np.meshgrid(np.arange(WINDOW), np.arange(WINDOW), indexing="ij"))
    cf = coords.reshape(2, -1)
    rel = cf[:, :, None] - cf[:, None, :]
    rel = rel.transpose(1, 2, 0).astype(np.int64)
    rel[:, :, 0] += WINDOW - 1
    rel[:, :, 1] += WINDOW - 1
    rel[:, :, 0] *= 2 * WINDOW - 1
    idx = rel.sum(-1)                                            # (N, N)
    bias = table_np[idx.reshape(-1)].reshape(N, N, NUM_HEADS)
    return np.transpose(bias, (2, 0, 1)).astype(np.float32)      # (nH, N, N)


def make_attn_mask_np():
    """(nW, N, N) shifted-window region mask (0 / -100), identical to PyTorch."""
    mask = np.zeros((NW, N, N), np.float32)
    if SHIFT > 0:
        img = np.zeros((H, W), np.float32)
        slices = (slice(0, -WINDOW), slice(-WINDOW, -SHIFT), slice(-SHIFT, None))
        cnt = 0
        for hs in slices:
            for ws in slices:
                img[hs, ws] = cnt
                cnt += 1
        mw = img.reshape(H // WINDOW, WINDOW, W // WINDOW, WINDOW)
        mw = mw.transpose(0, 2, 1, 3).reshape(NW, N)
        diff = mw[:, None, :] - mw[:, :, None]
        mask = np.where(diff != 0, np.float32(-100.0), np.float32(0.0))
    return mask


def make_fused_attention_bias(rel_bias_np, attn_mask_np):
    """(nH, L, L) bf16: folds cyclic shift + window partition + region mask +
    rel-pos bias + cross-window blocking into one per-image additive bias
    (identical for every image -> single shared copy)."""
    r = np.repeat(np.arange(H), W)
    c = np.tile(np.arange(W), H)
    rs = (r - SHIFT) % H                       # token position in shifted frame
    cs = (c - SHIFT) % W
    win = (rs // WINDOW) * (W // WINDOW) + (cs // WINDOW)        # (L,)
    loc = (rs % WINDOW) * WINDOW + (cs % WINDOW)                 # (L,)

    same = win[:, None] == win[None, :]                          # (L, L)
    li, lj = loc[:, None], loc[None, :]
    pair = rel_bias_np[:, li, lj] + attn_mask_np[win[:, None], li, lj][None]
    bias_img = np.where(same[None], pair, np.float32(NEG))       # (nH, L, L)
    return jnp.asarray(bias_img).astype(jnp.bfloat16)


# ---------------------------------------------------------------------------
# pure-JAX reference mirroring the PyTorch module exactly (f32, exact-erf GELU)
# ---------------------------------------------------------------------------
def window_partition_jax(x, ws):
    Bx, Hx, Wx, Cx = x.shape
    x = x.reshape(Bx, Hx // ws, ws, Wx // ws, ws, Cx)
    return x.transpose(0, 1, 3, 2, 4, 5).reshape(-1, ws, ws, Cx)


def window_reverse_jax(windows, ws, Hx, Wx):
    Bx = windows.shape[0] // (Hx * Wx // ws // ws)
    x = windows.reshape(Bx, Hx // ws, Wx // ws, ws, ws, -1)
    return x.transpose(0, 1, 3, 2, 4, 5).reshape(Bx, Hx, Wx, -1)


def swin_block_reference(x, p, rel_bias, attn_mask):
    def ln(v, g, b):
        mu = v.mean(-1, keepdims=True)
        var = ((v - mu) ** 2).mean(-1, keepdims=True)
        return (v - mu) / jnp.sqrt(var + EPS) * g + b

    shortcut = x
    xn = ln(x, p["g1"], p["be1"])
    xs = xn.reshape(B, H, W, DIM)
    xs = jnp.roll(xs, shift=(-SHIFT, -SHIFT), axis=(1, 2))
    xw = window_partition_jax(xs, WINDOW).reshape(-1, N, DIM)
    qkv = xw @ p["qkv_w"] + p["qkv_b"][0]
    qkv = qkv.reshape(-1, N, 3, NUM_HEADS, HEAD_DIM).transpose(2, 0, 3, 1, 4)
    q, k, v = qkv[0] * SCALE, qkv[1], qkv[2]
    attn = jnp.einsum("bhnd,bhmd->bhnm", q, k)
    attn = attn + rel_bias[None]
    attn = attn.reshape(B, NW, NUM_HEADS, N, N) + attn_mask[None, :, None]
    attn = attn.reshape(-1, NUM_HEADS, N, N)
    attn = jax.nn.softmax(attn, axis=-1)
    out = jnp.einsum("bhnm,bhmd->bhnd", attn, v).transpose(0, 2, 1, 3).reshape(-1, N, DIM)
    out = out @ p["proj_w"] + p["proj_b"][0]
    a = window_reverse_jax(out.reshape(-1, WINDOW, WINDOW, DIM), WINDOW, H, W)
    a = jnp.roll(a, shift=(SHIFT, SHIFT), axis=(1, 2)).reshape(B, L, DIM)
    h = shortcut + a
    hn = ln(h, p["g2"], p["be2"])
    z = jax.nn.gelu(hn @ p["fc1_w"] + p["fc1_b"][0], approximate=False)
    z = z @ p["fc2_w"] + p["fc2_b"][0]
    return h + z


if __name__ == "__main__":
    key = jax.random.PRNGKey(0)
    ks = jax.random.split(key, 10)

    def init(k, shape, std=0.02):
        return (jax.random.normal(k, shape, jnp.float32) * std).astype(jnp.float32)

    # nn.Linear weights are stored as (in, out) here (x @ W + b convention).
    params = {
        "g1": jnp.ones((1, DIM), jnp.float32), "be1": jnp.zeros((1, DIM), jnp.float32),
        "g2": jnp.ones((1, DIM), jnp.float32), "be2": jnp.zeros((1, DIM), jnp.float32),
        "qkv_w": init(ks[0], (DIM, 3 * DIM)), "qkv_b": init(ks[1], (1, 3 * DIM)),
        "proj_w": init(ks[2], (DIM, DIM)), "proj_b": init(ks[3], (1, DIM)),
        "fc1_w": init(ks[4], (DIM, HIDDEN)), "fc1_b": init(ks[5], (1, HIDDEN)),
        "fc2_w": init(ks[6], (HIDDEN, DIM)), "fc2_b": init(ks[7], (1, DIM)),
    }
    rel_table = init(ks[8], ((2 * WINDOW - 1) * (2 * WINDOW - 1), NUM_HEADS))

    rel_bias_np = make_rel_bias_np(np.asarray(rel_table))        # (nH, N, N)
    attn_mask_np = make_attn_mask_np()                           # (nW, N, N)
    bias_img = make_fused_attention_bias(rel_bias_np, attn_mask_np)   # (nH, L, L) bf16
    kparams = prepare_kernel_params(params, bias_img)

    x = jax.random.normal(ks[9], (B, L, DIM), jnp.float32)

    fwd = jax.jit(swin_block_forward)
    out = jax.block_until_ready(fwd(x, kparams))

    ref = swin_block_reference(x, params, jnp.asarray(rel_bias_np), jnp.asarray(attn_mask_np))
    assert out.shape == (B, L, DIM)
    assert np.allclose(np.asarray(out), np.asarray(ref), atol=1e-2, rtol=1e-2), "mismatch vs reference"
    print("KERNEL_OK")
</pallas_src>

<mosaic_0001>
module attributes {stable_mosaic.version = 11 : i64} {
  func.func @swin_block_kernel(%arg0: i32, %arg1: memref<128x32xf32, #tpu.memory_space<vmem>>, %arg2: memref<8x128xf32, #tpu.memory_space<vmem>>, %arg3: memref<32x96xbf16, #tpu.memory_space<vmem>>, %arg4: memref<32x32xbf16, #tpu.memory_space<vmem>>, %arg5: memref<32x128xbf16, #tpu.memory_space<vmem>>, %arg6: memref<128x32xbf16, #tpu.memory_space<vmem>>, %arg7: memref<4x64x64xbf16, #tpu.memory_space<vmem>>, %arg8: memref<128x32xf32, #tpu.memory_space<vmem>>, %arg9: memref<128x32xf32, #tpu.memory_space<vmem>>) attributes {dimension_semantics = [#tpu.dimension_semantics<arbitrary>], iteration_bounds = array<i64: 1>, scalar_prefetch = 0 : i64, scratch_operands = 1 : i64, tpu.core_type = #tpu.core_type<tc>, window_params = [{pipeline_mode = #tpu.pipeline_mode<synchronous>, transform_indices = @transform_0, window_bounds = array<i64: 128, 32>}, {pipeline_mode = #tpu.pipeline_mode<synchronous>, transform_indices = @transform_1, window_bounds = array<i64: 8, 128>}, {pipeline_mode = #tpu.pipeline_mode<synchronous>, transform_indices = @transform_2, window_bounds = array<i64: 32, 96>}, {pipeline_mode = #tpu.pipeline_mode<synchronous>, transform_indices = @transform_3, window_bounds = array<i64: 32, 32>}, {pipeline_mode = #tpu.pipeline_mode<synchronous>, transform_indices = @transform_4, window_bounds = array<i64: 32, 128>}, {pipeline_mode = #tpu.pipeline_mode<synchronous>, transform_indices = @transform_5, window_bounds = array<i64: 128, 32>}, {pipeline_mode = #tpu.pipeline_mode<synchronous>, transform_indices = @transform_6, window_bounds = array<i64: 4, 64, 64>}, {pipeline_mode = #tpu.pipeline_mode<synchronous>, transform_indices = @transform_7, window_bounds = array<i64: 128, 32>}]} {
    %c0 = arith.constant 0 : index
    %c0_0 = arith.constant 0 : index
    %0 = vector.load %arg1[%c0, %c0_0] : memref<128x32xf32, #tpu.memory_space<vmem>>, vector<128x32xf32>
    %c0_1 = arith.constant 0 : index
    %c0_2 = arith.constant 0 : index
    %1 = vector.load %arg2[%c0_1, %c0_2] : memref<8x128xf32, #tpu.memory_space<vmem>>, vector<8x128xf32>
    %2 = vector.extract_strided_slice %1 {offsets = [0, 0], sizes = [1, 32], strides = [1, 1]} : vector<8x128xf32> to vector<1x32xf32>
    %3 = vector.extract_strided_slice %1 {offsets = [1, 0], sizes = [1, 32], strides = [1, 1]} : vector<8x128xf32> to vector<1x32xf32>
    %4 = vector.extract_strided_slice %1 {offsets = [2, 0], sizes = [1, 32], strides = [1, 1]} : vector<8x128xf32> to vector<1x32xf32>
    %5 = vector.extract_strided_slice %1 {offsets = [3, 0], sizes = [1, 32], strides = [1, 1]} : vector<8x128xf32> to vector<1x32xf32>
    %6 = vector.extract_strided_slice %1 {offsets = [4, 0], sizes = [1, 32], strides = [1, 1]} : vector<8x128xf32> to vector<1x32xf32>
    %7 = vector.extract_strided_slice %1 {offsets = [5, 0], sizes = [1, 32], strides = [1, 1]} : vector<8x128xf32> to vector<1x32xf32>
    %8 = vector.extract_strided_slice %1 {offsets = [6, 0], sizes = [1, 128], strides = [1, 1]} : vector<8x128xf32> to vector<1x128xf32>
    %9 = vector.extract_strided_slice %1 {offsets = [7, 0], sizes = [1, 96], strides = [1, 1]} : vector<8x128xf32> to vector<1x96xf32>
    %cst = arith.constant dense<0.000000e+00> : vector<128xf32>
    %10 = vector.multi_reduction <add>, %0, %cst [1] : vector<128x32xf32> to vector<128xf32>
    %11 = vector.shape_cast %10 : vector<128xf32> to vector<128x1xf32>
    %cst_3 = arith.constant 3.200000e+01 : f32
    %12 = vector.broadcast %cst_3 : f32 to vector<128x1xf32>
    %13 = arith.divf %11, %12 : vector<128x1xf32>
    %14 = vector.broadcast %13 : vector<128x1xf32> to vector<128x32xf32>
    %15 = arith.subf %0, %14 : vector<128x32xf32>
    %16 = arith.mulf %15, %15 : vector<128x32xf32>
    %cst_4 = arith.constant dense<0.000000e+00> : vector<128xf32>
    %17 = vector.multi_reduction <add>, %16, %cst_4 [1] : vector<128x32xf32> to vector<128xf32>
    %18 = vector.shape_cast %17 : vector<128xf32> to vector<128x1xf32>
    %cst_5 = arith.constant 3.200000e+01 : f32
    %19 = vector.broadcast %cst_5 : f32 to vector<128x1xf32>
    %20 = arith.divf %18, %19 : vector<128x1xf32>
    %21 = vector.broadcast %13 : vector<128x1xf32> to vector<128x32xf32>
    %22 = arith.subf %0, %21 : vector<128x32xf32>
    %cst_6 = arith.constant 9.99999974E-6 : f32
    %23 = vector.broadcast %cst_6 : f32 to vector<128x1xf32>
    %24 = arith.addf %20, %23 : vector<128x1xf32>
    %25 = math.rsqrt %24 : vector<128x1xf32>
    %26 = vector.broadcast %25 : vector<128x1xf32> to vector<128x32xf32>
    %27 = arith.mulf %22, %26 : vector<128x32xf32>
    %28 = vector.broadcast %2 : vector<1x32xf32> to vector<128x32xf32>
    %29 = arith.mulf %27, %28 : vector<128x32xf32>
    %30 = vector.broadcast %3 : vector<1x32xf32> to vector<128x32xf32>
    %31 = arith.addf %29, %30 : vector<128x32xf32>
    %32 = arith.truncf %31 : vector<128x32xf32> to vector<128x32xbf16>
    %c0_7 = arith.constant 0 : index
    %c0_8 = arith.constant 0 : index
    %33 = vector.load %arg3[%c0_7, %c0_8] : memref<32x96xbf16, #tpu.memory_space<vmem>>, vector<32x96xbf16>
    %cst_9 = arith.constant dense<0.000000e+00> : vector<128x96xf32>
    %34 = tpu.matmul %32, %33, %cst_9 {dimension_numbers = #tpu.dot_dimension_numbers<[1], [0], [0], [1], [0, 0, 1, 1], [], []>} : vector<128x32xbf16>, vector<32x96xbf16>, vector<128x96xf32> -> vector<128x96xf32>
    %35 = vector.broadcast %9 : vector<1x96xf32> to vector<128x96xf32>
    %36 = arith.addf %34, %35 : vector<128x96xf32>
    %37 = vector.extract_strided_slice %36 {offsets = [0, 0], sizes = [64, 8], strides = [1, 1]} : vector<128x96xf32> to vector<64x8xf32>
    %38 = arith.truncf %37 : vector<64x8xf32> to vector<64x8xbf16>
    %39 = vector.extract_strided_slice %36 {offsets = [0, 32], sizes = [64, 8], strides = [1, 1]} : vector<128x96xf32> to vector<64x8xf32>
    %40 = arith.truncf %39 : vector<64x8xf32> to vector<64x8xbf16>
    %41 = vector.extract_strided_slice %36 {offsets = [0, 64], sizes = [64, 8], strides = [1, 1]} : vector<128x96xf32> to vector<64x8xf32>
    %42 = arith.truncf %41 : vector<64x8xf32> to vector<64x8xbf16>
    "tpu.trace_start"() <{level = 10 : i32, message = "nd,md->nm"}> : () -> ()
    %cst_10 = arith.constant dense<0.000000e+00> : vector<64x64xf32>
    %43 = tpu.matmul %38, %40, %cst_10 {dimension_numbers = #tpu.dot_dimension_numbers<[1], [1], [0], [0], [0, 0, 1, 0], [], []>} : vector<64x8xbf16>, vector<64x8xbf16>, vector<64x64xf32> -> vector<64x64xf32>
    "tpu.trace_stop"() : () -> ()
    %c0_11 = arith.constant 0 : index
    %c0_12 = arith.constant 0 : index
    %c0_13 = arith.constant 0 : index
    %44 = vector.load %arg7[%c0_11, %c0_12, %c0_13] : memref<4x64x64xbf16, #tpu.memory_space<vmem>>, vector<1x64x64xbf16>
    %45 = vector.shape_cast %44 : vector<1x64x64xbf16> to vector<64x64xbf16>
    %46 = arith.extf %45 : vector<64x64xbf16> to vector<64x64xf32>
    %47 = arith.addf %43, %46 : vector<64x64xf32>
    %cst_14 = arith.constant dense<0xFF800000> : vector<64xf32>
    %48 = vector.multi_reduction <maximumf>, %47, %cst_14 [1] : vector<64x64xf32> to vector<64xf32>
    %49 = vector.shape_cast %48 : vector<64xf32> to vector<64x1xf32>
    %50 = vector.broadcast %49 : vector<64x1xf32> to vector<64x64xf32>
    %51 = arith.subf %47, %50 : vector<64x64xf32>
    %52 = math.exp %51 : vector<64x64xf32>
    %cst_15 = arith.constant dense<0.000000e+00> : vector<64xf32>
    %53 = vector.multi_reduction <add>, %52, %cst_15 [1] : vector<64x64xf32> to vector<64xf32>
    %54 = vector.shape_cast %53 : vector<64xf32> to vector<64x1xf32>
    %55 = tpu.reciprocal %54 {approx = true} : vector<64x1xf32> -> vector<64x1xf32>
    %56 = vector.broadcast %55 : vector<64x1xf32> to vector<64x64xf32>
    %57 = arith.mulf %52, %56 : vector<64x64xf32>
    %58 = arith.truncf %57 : vector<64x64xf32> to vector<64x64xbf16>
    %cst_16 = arith.constant dense<0.000000e+00> : vector<64x8xf32>
    %59 = tpu.matmul %58, %42, %cst_16 {dimension_numbers = #tpu.dot_dimension_numbers<[1], [0], [0], [1], [0, 0, 1, 1], [], []>} : vector<64x64xbf16>, vector<64x8xbf16>, vector<64x8xf32> -> vector<64x8xf32>
    %c0_17 = arith.constant 0 : index
    %c0_18 = arith.constant 0 : index
    %60 = vector.load %arg9[%c0_17, %c0_18] : memref<128x32xf32, #tpu.memory_space<vmem>>, vector<64x8xf32>
    tpu.vector_store %arg9[%c0_17, %c0_18], %59 {strides = array<i32>} : memref<128x32xf32, #tpu.memory_space<vmem>>, vector<64x8xf32>,
    %61 = vector.extract_strided_slice %36 {offsets = [0, 8], sizes = [64, 8], strides = [1, 1]} : vector<128x96xf32> to vector<64x8xf32>
    %62 = arith.truncf %61 : vector<64x8xf32> to vector<64x8xbf16>
    %63 = vector.extract_strided_slice %36 {offsets = [0, 40], sizes = [64, 8], strides = [1, 1]} : vector<128x96xf32> to vector<64x8xf32>
    %64 = arith.truncf %63 : vector<64x8xf32> to vector<64x8xbf16>
    %65 = vector.extract_strided_slice %36 {offsets = [0, 72], sizes = [64, 8], strides = [1, 1]} : vector<128x96xf32> to vector<64x8xf32>
    %66 = arith.truncf %65 : vector<64x8xf32> to vector<64x8xbf16>
    "tpu.trace_start"() <{level = 10 : i32, message = "nd,md->nm"}> : () -> ()
    %cst_19 = arith.constant dense<0.000000e+00> : vector<64x64xf32>
    %67 = tpu.matmul %62, %64, %cst_19 {dimension_numbers = #tpu.dot_dimension_numbers<[1], [1], [0], [0], [0, 0, 1, 0], [], []>} : vector<64x8xbf16>, vector<64x8xbf16>, vector<64x64xf32> -> vector<64x64xf32>
    "tpu.trace_stop"() : () -> ()
    %c1 = arith.constant 1 : index
    %c0_20 = arith.constant 0 : index
    %c0_21 = arith.constant 0 : index
    %68 = vector.load %arg7[%c1, %c0_20, %c0_21] : memref<4x64x64xbf16, #tpu.memory_space<vmem>>, vector<1x64x64xbf16>
    %69 = vector.shape_cast %68 : vector<1x64x64xbf16> to vector<64x64xbf16>
    %70 = arith.extf %69 : vector<64x64xbf16> to vector<64x64xf32>
    %71 = arith.addf %67, %70 : vector<64x64xf32>
    %cst_22 = arith.constant dense<0xFF800000> : vector<64xf32>
    %72 = vector.multi_reduction <maximumf>, %71, %cst_22 [1] : vector<64x64xf32> to vector<64xf32>
    %73 = vector.shape_cast %72 : vector<64xf32> to vector<64x1xf32>
    %74 = vector.broadcast %73 : vector<64x1xf32> to vector<64x64xf32>
    %75 = arith.subf %71, %74 : vector<64x64xf32>
    %76 = math.exp %75 : vector<64x64xf32>
    %cst_23 = arith.constant dense<0.000000e+00> : vector<64xf32>
    %77 = vector.multi_reduction <add>, %76, %cst_23 [1] : vector<64x64xf32> to vector<64xf32>
    %78 = vector.shape_cast %77 : vector<64xf32> to vector<64x1xf32>
    %79 = tpu.reciprocal %78 {approx = true} : vector<64x1xf32> -> vector<64x1xf32>
    %80 = vector.broadcast %79 : vector<64x1xf32> to vector<64x64xf32>
    %81 = arith.mulf %76, %80 : vector<64x64xf32>
    %82 = arith.truncf %81 : vector<64x64xf32> to vector<64x64xbf16>
    %cst_24 = arith.constant dense<0.000000e+00> : vector<64x8xf32>
    %83 = tpu.matmul %82, %66, %cst_24 {dimension_numbers = #tpu.dot_dimension_numbers<[1], [0], [0], [1], [0, 0, 1, 1], [], []>} : vector<64x64xbf16>, vector<64x8xbf16>, vector<64x8xf32> -> vector<64x8xf32>
    %c0_25 = arith.constant 0 : index
    %c8 = arith.constant 8 : index
    %84 = vector.load %arg9[%c0_25, %c8] : memref<128x32xf32, #tpu.memory_space<vmem>>, vector<64x8xf32>
    tpu.vector_store %arg9[%c0_25, %c8], %83 {strides = array<i32>} : memref<128x32xf32, #tpu.memory_space<vmem>>, vector<64x8xf32>,
    %85 = vector.extract_strided_slice %36 {offsets = [0, 16], sizes = [64, 8], strides = [1, 1]} : vector<128x96xf32> to vector<64x8xf32>
    %86 = arith.truncf %85 : vector<64x8xf32> to vector<64x8xbf16>
    %87 = vector.extract_strided_slice %36 {offsets = [0, 48], sizes = [64, 8], strides = [1, 1]} : vector<128x96xf32> to vector<64x8xf32>
    %88 = arith.truncf %87 : vector<64x8xf32> to vector<64x8xbf16>
    %89 = vector.extract_strided_slice %36 {offsets = [0, 80], sizes = [64, 8], strides = [1, 1]} : vector<128x96xf32> to vector<64x8xf32>
    %90 = arith.truncf %89 : vector<64x8xf32> to vector<64x8xbf16>
    "tpu.trace_start"() <{level = 10 : i32, message = "nd,md->nm"}> : () -> ()
    %cst_26 = arith.constant dense<0.000000e+00> : vector<64x64xf32>
    %91 = tpu.matmul %86, %88, %cst_26 {dimension_numbers = #tpu.dot_dimension_numbers<[1], [1], [0], [0], [0, 0, 1, 0], [], []>} : vector<64x8xbf16>, vector<64x8xbf16>, vector<64x64xf32> -> vector<64x64xf32>
    "tpu.trace_stop"() : () -> ()
    %c2 = arith.constant 2 : index
    %c0_27 = arith.constant 0 : index
    %c0_28 = arith.constant 0 : index
    %92 = vector.load %arg7[%c2, %c0_27, %c0_28] : memref<4x64x64xbf16, #tpu.memory_space<vmem>>, vector<1x64x64xbf16>
    %93 = vector.shape_cast %92 : vector<1x64x64xbf16> to vector<64x64xbf16>
    %94 = arith.extf %93 : vector<64x64xbf16> to vector<64x64xf32>
    %95 = arith.addf %91, %94 : vector<64x64xf32>
    %cst_29 = arith.constant dense<0xFF800000> : vector<64xf32>
    %96 = vector.multi_reduction <maximumf>, %95, %cst_29 [1] : vector<64x64xf32> to vector<64xf32>
    %97 = vector.shape_cast %96 : vector<64xf32> to vector<64x1xf32>
    %98 = vector.broadcast %97 : vector<64x1xf32> to vector<64x64xf32>
    %99 = arith.subf %95, %98 : vector<64x64xf32>
    %100 = math.exp %99 : vector<64x64xf32>
    %cst_30 = arith.constant dense<0.000000e+00> : vector<64xf32>
    %101 = vector.multi_reduction <add>, %100, %cst_30 [1] : vector<64x64xf32> to vector<64xf32>
    %102 = vector.shape_cast %101 : vector<64xf32> to vector<64x1xf32>
    %103 = tpu.reciprocal %102 {approx = true} : vector<64x1xf32> -> vector<64x1xf32>
    %104 = vector.broadcast %103 : vector<64x1xf32> to vector<64x64xf32>
    %105 = arith.mulf %100, %104 : vector<64x64xf32>
    %106 = arith.truncf %105 : vector<64x64xf32> to vector<64x64xbf16>
    %cst_31 = arith.constant dense<0.000000e+00> : vector<64x8xf32>
    %107 = tpu.matmul %106, %90, %cst_31 {dimension_numbers = #tpu.dot_dimension_numbers<[1], [0], [0], [1], [0, 0, 1, 1], [], []>} : vector<64x64xbf16>, vector<64x8xbf16>, vector<64x8xf32> -> vector<64x8xf32>
    %c0_32 = arith.constant 0 : index
    %c16 = arith.constant 16 : index
    %108 = vector.load %arg9[%c0_32, %c16] : memref<128x32xf32, #tpu.memory_space<vmem>>, vector<64x8xf32>
    tpu.vector_store %arg9[%c0_32, %c16], %107 {strides = array<i32>} : memref<128x32xf32, #tpu.memory_space<vmem>>, vector<64x8xf32>,
    %109 = vector.extract_strided_slice %36 {offsets = [0, 24], sizes = [64, 8], strides = [1, 1]} : vector<128x96xf32> to vector<64x8xf32>
    %110 = arith.truncf %109 : vector<64x8xf32> to vector<64x8xbf16>
    %111 = vector.extract_strided_slice %36 {offsets = [0, 56], sizes = [64, 8], strides = [1, 1]} : vector<128x96xf32> to vector<64x8xf32>
    %112 = arith.truncf %111 : vector<64x8xf32> to vector<64x8xbf16>
    %113 = vector.extract_strided_slice %36 {offsets = [0, 88], sizes = [64, 8], strides = [1, 1]} : vector<128x96xf32> to vector<64x8xf32>
    %114 = arith.truncf %113 : vector<64x8xf32> to vector<64x8xbf16>
    "tpu.trace_start"() <{level = 10 : i32, message = "nd,md->nm"}> : () -> ()
    %cst_33 = arith.constant dense<0.000000e+00> : vector<64x64xf32>
    %115 = tpu.matmul %110, %112, %cst_33 {dimension_numbers = #tpu.dot_dimension_numbers<[1], [1], [0], [0], [0, 0, 1, 0], [], []>} : vector<64x8xbf16>, vector<64x8xbf16>, vector<64x64xf32> -> vector<64x64xf32>
    "tpu.trace_stop"() : () -> ()
    %c3 = arith.constant 3 : index
    %c0_34 = arith.constant 0 : index
    %c0_35 = arith.constant 0 : index
    %116 = vector.load %arg7[%c3, %c0_34, %c0_35] : memref<4x64x64xbf16, #tpu.memory_space<vmem>>, vector<1x64x64xbf16>
    %117 = vector.shape_cast %116 : vector<1x64x64xbf16> to vector<64x64xbf16>
    %118 = arith.extf %117 : vector<64x64xbf16> to vector<64x64xf32>
    %119 = arith.addf %115, %118 : vector<64x64xf32>
    %cst_36 = arith.constant dense<0xFF800000> : vector<64xf32>
    %120 = vector.multi_reduction <maximumf>, %119, %cst_36 [1] : vector<64x64xf32> to vector<64xf32>
    %121 = vector.shape_cast %120 : vector<64xf32> to vector<64x1xf32>
    %122 = vector.broadcast %121 : vector<64x1xf32> to vector<64x64xf32>
    %123 = arith.subf %119, %122 : vector<64x64xf32>
    %124 = math.exp %123 : vector<64x64xf32>
    %cst_37 = arith.constant dense<0.000000e+00> : vector<64xf32>
    %125 = vector.multi_reduction <add>, %124, %cst_37 [1] : vector<64x64xf32> to vector<64xf32>
    %126 = vector.shape_cast %125 : vector<64xf32> to vector<64x1xf32>
    %127 = tpu.reciprocal %126 {approx = true} : vector<64x1xf32> -> vector<64x1xf32>
    %128 = vector.broadcast %127 : vector<64x1xf32> to vector<64x64xf32>
    %129 = arith.mulf %124, %128 : vector<64x64xf32>
    %130 = arith.truncf %129 : vector<64x64xf32> to vector<64x64xbf16>
    %cst_38 = arith.constant dense<0.000000e+00> : vector<64x8xf32>
    %131 = tpu.matmul %130, %114, %cst_38 {dimension_numbers = #tpu.dot_dimension_numbers<[1], [0], [0], [1], [0, 0, 1, 1], [], []>} : vector<64x64xbf16>, vector<64x8xbf16>, vector<64x8xf32> -> vector<64x8xf32>
    %c0_39 = arith.constant 0 : index
    %c24 = arith.constant 24 : index
    %132 = vector.load %arg9[%c0_39, %c24] : memref<128x32xf32, #tpu.memory_space<vmem>>, vector<64x8xf32>
    tpu.vector_store %arg9[%c0_39, %c24], %131 {strides = array<i32>} : memref<128x32xf32, #tpu.memory_space<vmem>>, vector<64x8xf32>,
    %133 = vector.extract_strided_slice %36 {offsets = [64, 0], sizes = [64, 8], strides = [1, 1]} : vector<128x96xf32> to vector<64x8xf32>
    %134 = arith.truncf %133 : vector<64x8xf32> to vector<64x8xbf16>
    %135 = vector.extract_strided_slice %36 {offsets = [64, 32], sizes = [64, 8], strides = [1, 1]} : vector<128x96xf32> to vector<64x8xf32>
    %136 = arith.truncf %135 : vector<64x8xf32> to vector<64x8xbf16>
    %137 = vector.extract_strided_slice %36 {offsets = [64, 64], sizes = [64, 8], strides = [1, 1]} : vector<128x96xf32> to vector<64x8xf32>
    %138 = arith.truncf %137 : vector<64x8xf32> to vector<64x8xbf16>
    "tpu.trace_start"() <{level = 10 : i32, message = "nd,md->nm"}> : () -> ()
    %cst_40 = arith.constant dense<0.000000e+00> : vector<64x64xf32>
    %139 = tpu.matmul %134, %136, %cst_40 {dimension_numbers = #tpu.dot_dimension_numbers<[1], [1], [0], [0], [0, 0, 1, 0], [], []>} : vector<64x8xbf16>, vector<64x8xbf16>, vector<64x64xf32> -> vector<64x64xf32>
    "tpu.trace_stop"() : () -> ()
    %c0_41 = arith.constant 0 : index
    %c0_42 = arith.constant 0 : index
    %c0_43 = arith.constant 0 : index
    %140 = vector.load %arg7[%c0_41, %c0_42, %c0_43] : memref<4x64x64xbf16, #tpu.memory_space<vmem>>, vector<1x64x64xbf16>
    %141 = vector.shape_cast %140 : vector<1x64x64xbf16> to vector<64x64xbf16>
    %142 = arith.extf %141 : vector<64x64xbf16> to vector<64x64xf32>
    %143 = arith.addf %139, %142 : vector<64x64xf32>
    %cst_44 = arith.constant dense<0xFF800000> : vector<64xf32>
    %144 = vector.multi_reduction <maximumf>, %143, %cst_44 [1] : vector<64x64xf32> to vector<64xf32>
    %145 = vector.shape_cast %144 : vector<64xf32> to vector<64x1xf32>
    %146 = vector.broadcast %145 : vector<64x1xf32> to vector<64x64xf32>
    %147 = arith.subf %143, %146 : vector<64x64xf32>
    %148 = math.exp %147 : vector<64x64xf32>
    %cst_45 = arith.constant dense<0.000000e+00> : vector<64xf32>
    %149 = vector.multi_reduction <add>, %148, %cst_45 [1] : vector<64x64xf32> to vector<64xf32>
    %150 = vector.shape_cast %149 : vector<64xf32> to vector<64x1xf32>
    %151 = tpu.reciprocal %150 {approx = true} : vector<64x1xf32> -> vector<64x1xf32>
    %152 = vector.broadcast %151 : vector<64x1xf32> to vector<64x64xf32>
    %153 = arith.mulf %148, %152 : vector<64x64xf32>
    %154 = arith.truncf %153 : vector<64x64xf32> to vector<64x64xbf16>
    %cst_46 = arith.constant dense<0.000000e+00> : vector<64x8xf32>
    %155 = tpu.matmul %154, %138, %cst_46 {dimension_numbers = #tpu.dot_dimension_numbers<[1], [0], [0], [1], [0, 0, 1, 1], [], []>} : vector<64x64xbf16>, vector<64x8xbf16>, vector<64x8xf32> -> vector<64x8xf32>
    %c64 = arith.constant 64 : index
    %c0_47 = arith.constant 0 : index
    %156 = vector.load %arg9[%c64, %c0_47] : memref<128x32xf32, #tpu.memory_space<vmem>>, vector<64x8xf32>
    tpu.vector_store %arg9[%c64, %c0_47], %155 {strides = array<i32>} : memref<128x32xf32, #tpu.memory_space<vmem>>, vector<64x8xf32>,
    %157 = vector.extract_strided_slice %36 {offsets = [64, 8], sizes = [64, 8], strides = [1, 1]} : vector<128x96xf32> to vector<64x8xf32>
    %158 = arith.truncf %157 : vector<64x8xf32> to vector<64x8xbf16>
    %159 = vector.extract_strided_slice %36 {offsets = [64, 40], sizes = [64, 8], strides = [1, 1]} : vector<128x96xf32> to vector<64x8xf32>
    %160 = arith.truncf %159 : vector<64x8xf32> to vector<64x8xbf16>
    %161 = vector.extract_strided_slice %36 {offsets = [64, 72], sizes = [64, 8], strides = [1, 1]} : vector<128x96xf32> to vector<64x8xf32>
    %162 = arith.truncf %161 : vector<64x8xf32> to vector<64x8xbf16>
    "tpu.trace_start"() <{level = 10 : i32, message = "nd,md->nm"}> : () -> ()
    %cst_48 = arith.constant dense<0.000000e+00> : vector<64x64xf32>
    %163 = tpu.matmul %158, %160, %cst_48 {dimension_numbers = #tpu.dot_dimension_numbers<[1], [1], [0], [0], [0, 0, 1, 0], [], []>} : vector<64x8xbf16>, vector<64x8xbf16>, vector<64x64xf32> -> vector<64x64xf32>
    "tpu.trace_stop"() : () -> ()
    %c1_49 = arith.constant 1 : index
    %c0_50 = arith.constant 0 : index
    %c0_51 = arith.constant 0 : index
    %164 = vector.load %arg7[%c1_49, %c0_50, %c0_51] : memref<4x64x64xbf16, #tpu.memory_space<vmem>>, vector<1x64x64xbf16>
    %165 = vector.shape_cast %164 : vector<1x64x64xbf16> to vector<64x64xbf16>
    %166 = arith.extf %165 : vector<64x64xbf16> to vector<64x64xf32>
    %167 = arith.addf %163, %166 : vector<64x64xf32>
    %cst_52 = arith.constant dense<0xFF800000> : vector<64xf32>
    %168 = vector.multi_reduction <maximumf>, %167, %cst_52 [1] : vector<64x64xf32> to vector<64xf32>
    %169 = vector.shape_cast %168 : vector<64xf32> to vector<64x1xf32>
    %170 = vector.broadcast %169 : vector<64x1xf32> to vector<64x64xf32>
    %171 = arith.subf %167, %170 : vector<64x64xf32>
    %172 = math.exp %171 : vector<64x64xf32>
    %cst_53 = arith.constant dense<0.000000e+00> : vector<64xf32>
    %173 = vector.multi_reduction <add>, %172, %cst_53 [1] : vector<64x64xf32> to vector<64xf32>
    %174 = vector.shape_cast %173 : vector<64xf32> to vector<64x1xf32>
    %175 = tpu.reciprocal %174 {approx = true} : vector<64x1xf32> -> vector<64x1xf32>
    %176 = vector.broadcast %175 : vector<64x1xf32> to vector<64x64xf32>
    %177 = arith.mulf %172, %176 : vector<64x64xf32>
    %178 = arith.truncf %177 : vector<64x64xf32> to vector<64x64xbf16>
    %cst_54 = arith.constant dense<0.000000e+00> : vector<64x8xf32>
    %179 = tpu.matmul %178, %162, %cst_54 {dimension_numbers = #tpu.dot_dimension_numbers<[1], [0], [0], [1], [0, 0, 1, 1], [], []>} : vector<64x64xbf16>, vector<64x8xbf16>, vector<64x8xf32> -> vector<64x8xf32>
    %c64_55 = arith.constant 64 : index
    %c8_56 = arith.constant 8 : index
    %180 = vector.load %arg9[%c64_55, %c8_56] : memref<128x32xf32, #tpu.memory_space<vmem>>, vector<64x8xf32>
    tpu.vector_store %arg9[%c64_55, %c8_56], %179 {strides = array<i32>} : memref<128x32xf32, #tpu.memory_space<vmem>>, vector<64x8xf32>,
    %181 = vector.extract_strided_slice %36 {offsets = [64, 16], sizes = [64, 8], strides = [1, 1]} : vector<128x96xf32> to vector<64x8xf32>
    %182 = arith.truncf %181 : vector<64x8xf32> to vector<64x8xbf16>
    %183 = vector.extract_strided_slice %36 {offsets = [64, 48], sizes = [64, 8], strides = [1, 1]} : vector<128x96xf32> to vector<64x8xf32>
    %184 = arith.truncf %183 : vector<64x8xf32> to vector<64x8xbf16>
    %185 = vector.extract_strided_slice %36 {offsets = [64, 80], sizes = [64, 8], strides = [1, 1]} : vector<128x96xf32> to vector<64x8xf32>
    %186 = arith.truncf %185 : vector<64x8xf32> to vector<64x8xbf16>
    "tpu.trace_start"() <{level = 10 : i32, message = "nd,md->nm"}> : () -> ()
    %cst_57 = arith.constant dense<0.000000e+00> : vector<64x64xf32>
    %187 = tpu.matmul %182, %184, %cst_57 {dimension_numbers = #tpu.dot_dimension_numbers<[1], [1], [0], [0], [0, 0, 1, 0], [], []>} : vector<64x8xbf16>, vector<64x8xbf16>, vector<64x64xf32> -> vector<64x64xf32>
    "tpu.trace_stop"() : () -> ()
    %c2_58 = arith.constant 2 : index
    %c0_59 = arith.constant 0 : index
    %c0_60 = arith.constant 0 : index
    %188 = vector.load %arg7[%c2_58, %c0_59, %c0_60] : memref<4x64x64xbf16, #tpu.memory_space<vmem>>, vector<1x64x64xbf16>
    %189 = vector.shape_cast %188 : vector<1x64x64xbf16> to vector<64x64xbf16>
    %190 = arith.extf %189 : vector<64x64xbf16> to vector<64x64xf32>
    %191 = arith.addf %187, %190 : vector<64x64xf32>
    %cst_61 = arith.constant dense<0xFF800000> : vector<64xf32>
    %192 = vector.multi_reduction <maximumf>, %191, %cst_61 [1] : vector<64x64xf32> to vector<64xf32>
    %193 = vector.shape_cast %192 : vector<64xf32> to vector<64x1xf32>
    %194 = vector.broadcast %193 : vector<64x1xf32> to vector<64x64xf32>
    %195 = arith.subf %191, %194 : vector<64x64xf32>
    %196 = math.exp %195 : vector<64x64xf32>
    %cst_62 = arith.constant dense<0.000000e+00> : vector<64xf32>
    %197 = vector.multi_reduction <add>, %196, %cst_62 [1] : vector<64x64xf32> to vector<64xf32>
    %198 = vector.shape_cast %197 : vector<64xf32> to vector<64x1xf32>
    %199 = tpu.reciprocal %198 {approx = true} : vector<64x1xf32> -> vector<64x1xf32>
    %200 = vector.broadcast %199 : vector<64x1xf32> to vector<64x64xf32>
    %201 = arith.mulf %196, %200 : vector<64x64xf32>
    %202 = arith.truncf %201 : vector<64x64xf32> to vector<64x64xbf16>
    %cst_63 = arith.constant dense<0.000000e+00> : vector<64x8xf32>
    %203 = tpu.matmul %202, %186, %cst_63 {dimension_numbers = #tpu.dot_dimension_numbers<[1], [0], [0], [1], [0, 0, 1, 1], [], []>} : vector<64x64xbf16>, vector<64x8xbf16>, vector<64x8xf32> -> vector<64x8xf32>
    %c64_64 = arith.constant 64 : index
    %c16_65 = arith.constant 16 : index
    %204 = vector.load %arg9[%c64_64, %c16_65] : memref<128x32xf32, #tpu.memory_space<vmem>>, vector<64x8xf32>
    tpu.vector_store %arg9[%c64_64, %c16_65], %203 {strides = array<i32>} : memref<128x32xf32, #tpu.memory_space<vmem>>, vector<64x8xf32>,
    %205 = vector.extract_strided_slice %36 {offsets = [64, 24], sizes = [64, 8], strides = [1, 1]} : vector<128x96xf32> to vector<64x8xf32>
    %206 = arith.truncf %205 : vector<64x8xf32> to vector<64x8xbf16>
    %207 = vector.extract_strided_slice %36 {offsets = [64, 56], sizes = [64, 8], strides = [1, 1]} : vector<128x96xf32> to vector<64x8xf32>
    %208 = arith.truncf %207 : vector<64x8xf32> to vector<64x8xbf16>
    %209 = vector.extract_strided_slice %36 {offsets = [64, 88], sizes = [64, 8], strides = [1, 1]} : vector<128x96xf32> to vector<64x8xf32>
    %210 = arith.truncf %209 : vector<64x8xf32> to vector<64x8xbf16>
    "tpu.trace_start"() <{level = 10 : i32, message = "nd,md->nm"}> : () -> ()
    %cst_66 = arith.constant dense<0.000000e+00> : vector<64x64xf32>
    %211 = tpu.matmul %206, %208, %cst_66 {dimension_numbers = #tpu.dot_dimension_numbers<[1], [1], [0], [0], [0, 0, 1, 0], [], []>} : vector<64x8xbf16>, vector<64x8xbf16>, vector<64x64xf32> -> vector<64x64xf32>
    "tpu.trace_stop"() : () -> ()
    %c3_67 = arith.constant 3 : index
    %c0_68 = arith.constant 0 : index
    %c0_69 = arith.constant 0 : index
    %212 = vector.load %arg7[%c3_67, %c0_68, %c0_69] : memref<4x64x64xbf16, #tpu.memory_space<vmem>>, vector<1x64x64xbf16>
    %213 = vector.shape_cast %212 : vector<1x64x64xbf16> to vector<64x64xbf16>
    %214 = arith.extf %213 : vector<64x64xbf16> to vector<64x64xf32>
    %215 = arith.addf %211, %214 : vector<64x64xf32>
    %cst_70 = arith.constant dense<0xFF800000> : vector<64xf32>
    %216 = vector.multi_reduction <maximumf>, %215, %cst_70 [1] : vector<64x64xf32> to vector<64xf32>
    %217 = vector.shape_cast %216 : vector<64xf32> to vector<64x1xf32>
    %218 = vector.broadcast %217 : vector<64x1xf32> to vector<64x64xf32>
    %219 = arith.subf %215, %218 : vector<64x64xf32>
    %220 = math.exp %219 : vector<64x64xf32>
    %cst_71 = arith.constant dense<0.000000e+00> : vector<64xf32>
    %221 = vector.multi_reduction <add>, %220, %cst_71 [1] : vector<64x64xf32> to vector<64xf32>
    %222 = vector.shape_cast %221 : vector<64xf32> to vector<64x1xf32>
    %223 = tpu.reciprocal %222 {approx = true} : vector<64x1xf32> -> vector<64x1xf32>
    %224 = vector.broadcast %223 : vector<64x1xf32> to vector<64x64xf32>
    %225 = arith.mulf %220, %224 : vector<64x64xf32>
    %226 = arith.truncf %225 : vector<64x64xf32> to vector<64x64xbf16>
    %cst_72 = arith.constant dense<0.000000e+00> : vector<64x8xf32>
    %227 = tpu.matmul %226, %210, %cst_72 {dimension_numbers = #tpu.dot_dimension_numbers<[1], [0], [0], [1], [0, 0, 1, 1], [], []>} : vector<64x64xbf16>, vector<64x8xbf16>, vector<64x8xf32> -> vector<64x8xf32>
    %c64_73 = arith.constant 64 : index
    %c24_74 = arith.constant 24 : index
    %228 = vector.load %arg9[%c64_73, %c24_74] : memref<128x32xf32, #tpu.memory_space<vmem>>, vector<64x8xf32>
    tpu.vector_store %arg9[%c64_73, %c24_74], %227 {strides = array<i32>} : memref<128x32xf32, #tpu.memory_space<vmem>>, vector<64x8xf32>,
    %c0_75 = arith.constant 0 : index
    %c0_76 = arith.constant 0 : index
    %229 = vector.load %arg9[%c0_75, %c0_76] : memref<128x32xf32, #tpu.memory_space<vmem>>, vector<128x32xf32>
    %230 = arith.truncf %229 : vector<128x32xf32> to vector<128x32xbf16>
    %c0_77 = arith.constant 0 : index
    %c0_78 = arith.constant 0 : index
    %231 = vector.load %arg4[%c0_77, %c0_78] : memref<32x32xbf16, #tpu.memory_space<vmem>>, vector<32x32xbf16>
    %cst_79 = arith.constant dense<0.000000e+00> : vector<128x32xf32>
    %232 = tpu.matmul %230, %231, %cst_79 {dimension_numbers = #tpu.dot_dimension_numbers<[1], [0], [0], [1], [0, 0, 1, 1], [], []>} : vector<128x32xbf16>, vector<32x32xbf16>, vector<128x32xf32> -> vector<128x32xf32>
    %233 = vector.broadcast %6 : vector<1x32xf32> to vector<128x32xf32>
    %234 = arith.addf %232, %233 : vector<128x32xf32>
    %235 = arith.addf %0, %234 : vector<128x32xf32>
    %cst_80 = arith.constant dense<0.000000e+00> : vector<128xf32>
    %236 = vector.multi_reduction <add>, %235, %cst_80 [1] : vector<128x32xf32> to vector<128xf32>
    %237 = vector.shape_cast %236 : vector<128xf32> to vector<128x1xf32>
    %cst_81 = arith.constant 3.200000e+01 : f32
    %238 = vector.broadcast %cst_81 : f32 to vector<128x1xf32>
    %239 = arith.divf %237, %238 : vector<128x1xf32>
    %240 = vector.broadcast %239 : vector<128x1xf32> to vector<128x32xf32>
    %241 = arith.subf %235, %240 : vector<128x32xf32>
    %242 = arith.mulf %241, %241 : vector<128x32xf32>
    %cst_82 = arith.constant dense<0.000000e+00> : vector<128xf32>
    %243 = vector.multi_reduction <add>, %242, %cst_82 [1] : vector<128x32xf32> to vector<128xf32>
    %244 = vector.shape_cast %243 : vector<128xf32> to vector<128x1xf32>
    %cst_83 = arith.constant 3.200000e+01 : f32
    %245 = vector.broadcast %cst_83 : f32 to vector<128x1xf32>
    %246 = arith.divf %244, %245 : vector<128x1xf32>
    %247 = vector.broadcast %239 : vector<128x1xf32> to vector<128x32xf32>
    %248 = arith.subf %235, %247 : vector<128x32xf32>
    %cst_84 = arith.constant 9.99999974E-6 : f32
    %249 = vector.broadcast %cst_84 : f32 to vector<128x1xf32>
    %250 = arith.addf %246, %249 : vector<128x1xf32>
    %251 = math.rsqrt %250 : vector<128x1xf32>
    %252 = vector.broadcast %251 : vector<128x1xf32> to vector<128x32xf32>
    %253 = arith.mulf %248, %252 : vector<128x32xf32>
    %254 = vector.broadcast %4 : vector<1x32xf32> to vector<128x32xf32>
    %255 = arith.mulf %253, %254 : vector<128x32xf32>
    %256 = vector.broadcast %5 : vector<1x32xf32> to vector<128x32xf32>
    %257 = arith.addf %255, %256 : vector<128x32xf32>
    %258 = arith.truncf %257 : vector<128x32xf32> to vector<128x32xbf16>
    %c0_85 = arith.constant 0 : index
    %c0_86 = arith.constant 0 : index
    %259 = vector.load %arg5[%c0_85, %c0_86] : memref<32x128xbf16, #tpu.memory_space<vmem>>, vector<32x128xbf16>
    %cst_87 = arith.constant dense<0.000000e+00> : vector<128x128xf32>
    %260 = tpu.matmul %258, %259, %cst_87 {dimension_numbers = #tpu.dot_dimension_numbers<[1], [0], [0], [1], [0, 0, 1, 1], [], []>} : vector<128x32xbf16>, vector<32x128xbf16>, vector<128x128xf32> -> vector<128x128xf32>
    %261 = vector.broadcast %8 : vector<1x128xf32> to vector<128x128xf32>
    %262 = arith.addf %260, %261 : vector<128x128xf32>
    %cst_88 = arith.constant 5.000000e-01 : f32
    %263 = vector.broadcast %cst_88 : f32 to vector<128x128xf32>
    %264 = arith.mulf %263, %262 : vector<128x128xf32>
    %cst_89 = arith.constant 4.471500e-02 : f32
    %265 = vector.broadcast %cst_89 : f32 to vector<128x128xf32>
    %266 = arith.mulf %265, %262 : vector<128x128xf32>
    %267 = arith.mulf %266, %262 : vector<128x128xf32>
    %268 = arith.mulf %267, %262 : vector<128x128xf32>
    %269 = arith.addf %262, %268 : vector<128x128xf32>
    %cst_90 = arith.constant 0.797884583 : f32
    %270 = vector.broadcast %cst_90 : f32 to vector<128x128xf32>
    %271 = arith.mulf %270, %269 : vector<128x128xf32>
    %272 = math.tanh %271 : vector<128x128xf32>
    %cst_91 = arith.constant 1.000000e+00 : f32
    %273 = vector.broadcast %cst_91 : f32 to vector<128x128xf32>
    %274 = arith.addf %273, %272 : vector<128x128xf32>
    %275 = arith.mulf %264, %274 : vector<128x128xf32>
    %276 = arith.truncf %275 : vector<128x128xf32> to vector<128x128xbf16>
    %c0_92 = arith.constant 0 : index
    %c0_93 = arith.constant 0 : index
    %277 = vector.load %arg6[%c0_92, %c0_93] : memref<128x32xbf16, #tpu.memory_space<vmem>>, vector<128x32xbf16>
    %cst_94 = arith.constant dense<0.000000e+00> : vector<128x32xf32>
    %278 = tpu.matmul %276, %277, %cst_94 {dimension_numbers = #tpu.dot_dimension_numbers<[1], [0], [0], [1], [0, 0, 1, 1], [], []>} : vector<128x128xbf16>, vector<128x32xbf16>, vector<128x32xf32> -> vector<128x32xf32>
    %279 = vector.broadcast %7 : vector<1x32xf32> to vector<128x32xf32>
    %280 = arith.addf %278, %279 : vector<128x32xf32>
    %281 = arith.addf %235, %280 : vector<128x32xf32>
    %c0_95 = arith.constant 0 : index
    %c0_96 = arith.constant 0 : index
    %282 = vector.load %arg8[%c0_95, %c0_96] : memref<128x32xf32, #tpu.memory_space<vmem>>, vector<128x32xf32>
    tpu.vector_store %arg8[%c0_95, %c0_96], %281 {strides = array<i32>} : memref<128x32xf32, #tpu.memory_space<vmem>>, vector<128x32xf32>,
    return
  }
  func.func @transform_0(%arg0: i32) -> (i32, i32) {
    %c0_i32 = arith.constant 0 : i32
    %c0_i32_0 = arith.constant 0 : i32
    %c0_i32_1 = arith.constant 0 : i32
    return %c0_i32, %c0_i32_0 : i32, i32
  }
  func.func @transform_1(%arg0: i32) -> (i32, i32) {
    %c0_i32 = arith.constant 0 : i32
    %c0_i32_0 = arith.constant 0 : i32
    %c0_i32_1 = arith.constant 0 : i32
    return %c0_i32, %c0_i32_0 : i32, i32
  }
  func.func @transform_2(%arg0: i32) -> (i32, i32) {
    %c0_i32 = arith.constant 0 : i32
    %c0_i32_0 = arith.constant 0 : i32
    %c0_i32_1 = arith.constant 0 : i32
    return %c0_i32, %c0_i32_0 : i32, i32
  }
  func.func @transform_3(%arg0: i32) -> (i32, i32) {
    %c0_i32 = arith.constant 0 : i32
    %c0_i32_0 = arith.constant 0 : i32
    %c0_i32_1 = arith.constant 0 : i32
    return %c0_i32, %c0_i32_0 : i32, i32
  }
  func.func @transform_4(%arg0: i32) -> (i32, i32) {
    %c0_i32 = arith.constant 0 : i32
    %c0_i32_0 = arith.constant 0 : i32
    %c0_i32_1 = arith.constant 0 : i32
    return %c0_i32, %c0_i32_0 : i32, i32
  }
  func.func @transform_5(%arg0: i32) -> (i32, i32) {
    %c0_i32 = arith.constant 0 : i32
    %c0_i32_0 = arith.constant 0 : i32
    %c0_i32_1 = arith.constant 0 : i32
    return %c0_i32, %c0_i32_0 : i32, i32
  }
  func.func @transform_6(%arg0: i32) -> (i32, i32, i32) {
    %c0_i32 = arith.constant 0 : i32
    %c0_i32_0 = arith.constant 0 : i32
    %c0_i32_1 = arith.constant 0 : i32
    %c0_i32_2 = arith.constant 0 : i32
    return %c0_i32, %c0_i32_0, %c0_i32_1 : i32, i32, i32
  }
  func.func @transform_7(%arg0: i32) -> (i32, i32) {
    %c0_i32 = arith.constant 0 : i32
    %c0_i32_0 = arith.constant 0 : i32
    %c0_i32_1 = arith.constant 0 : i32
    return %c0_i32, %c0_i32_0 : i32, i32
  }
}

</mosaic_0001>

<bundles_post_ra>
// kernel: swin_block_forward.1
= control target key start
LH: loop header
LB: loop body
LE: loop exit
PB: predicated region body
PF: predicated region fallthrough
CT: control target
= control target key end

     0   :  { %vm44_vm0 = vcmask 261120   ;;  %v4307_v14 = vmov 32.0   ;;  %s4308_s15 = smov 88   ;;  %s4309_s16 = smov 96   ;;  %s6848_s0 = inlined_call_operand.vmem [shape: f32[128,32], index: 0, kind: input, shape index: {}]   ;;  %s6849_s2 = inlined_call_operand.vmem [shape: bf16[32,96], index: 2, kind: input, shape index: {}]   ;;  %s6850_s1 = inlined_call_operand.vmem [shape: f32[8,128], index: 1, kind: input, shape index: {}]   ;;  %s6851_s6 = inlined_call_operand.vmem [shape: bf16[4,64,64], index: 6, kind: input, shape index: {}]   ;;  %s6852_s3 = inlined_call_operand.vmem [shape: bf16[32,32], index: 3, kind: input, shape index: {}]   ;;  %s6853_s4 = inlined_call_operand.vmem [shape: bf16[32,128], index: 4, kind: input, shape index: {}]   ;;  %s6854_s5 = inlined_call_operand.vmem [shape: bf16[128,32], index: 5, kind: input, shape index: {}]   ;;  %s6855_s7 = inlined_call_operand.vmem [shape: f32[128,32], index: 7, kind: output, shape index: {}]  }
   0x1   :  { %v31_v0 = vld [vmem:[%s6848_s0 + $0x20] sm:$0xff]  ;;  %v29_v1 = vld [vmem:[%s6848_s0 + $0x10] sm:$0xff]  ;;  %v32_v6 = vld [vmem:[%s6848_s0 + $0x28] sm:$0xff]  ;;  %3935 = vrcp.f32 %v4307_v14  ;;  %s4310_s17 = smov 120   ;;  %s4311_s18 = smov 64  }
   0x2   :  { %v27_v2 = vld [vmem:[%s6848_s0] sm:$0xff]  ;;  %v57_v3 = vsel %vm44_vm0, %v31_v0, 0.0  ;;  %v51_v4 = vsel %vm44_vm0, %v29_v1, 0.0  ;;  %v30_v7 = vld [vmem:[%s6848_s0 + $0x18] sm:$0xff]  ;;  %v28_v8 = vld [vmem:[%s6848_s0 + $0x8] sm:$0xff]  ;;  %v60_v9 = vsel %vm44_vm0, %v32_v6, 0.0 }
   0x3   :  { %v45_v5 = vsel %vm44_vm0, %v27_v2, 0.0  ;;  %58 = vadd.xlane.f32.xlu2 %v57_v3  ;;  %52 = vadd.xlane.f32.xlu1 %v51_v4  ;;  %v54_v10 = vsel %vm44_vm0, %v30_v7, 0.0  ;;  %v48_v11 = vsel %vm44_vm0, %v28_v8, 0.0  ;;  %v33_v12 = vld [vmem:[%s6848_s0 + $0x30] sm:$0xff]  ;;  %v34_v36 = vld [vmem:[%s6848_s0 + $0x38] sm:$0xff]  ;;  %v4440_v57 = vld [vmem:[%s6848_s0 + $0x48] sm:$0xff] }
   0x4   :  { %46 = vadd.xlane.f32.xlu0 %v45_v5  ;;  %v63_v13 = vsel %vm44_vm0, %v33_v12, 0.0  ;;  %v66_v41 = vsel %vm44_vm0, %v34_v36, 0.0  ;;  %v72_v58 = vsel %vm44_vm0, %v4440_v57, 0.0  ;;  %v4448_v60 = vld [vmem:[%s6848_s0 + $0x50] sm:$0xff]  ;;  %v3749_v62 = vld [vmem:[%s6849_s2 + $0x8] sm:$0xff]  ;;  %s4312_s19 = smov 56  }
   0x5   :  { %v75_v61 = vsel %vm44_vm0, %v4448_v60, 0.0  ;;  %493 = vmatpush.bf16.msra.mxu0 %v3749_v62  ;;  %s4313_s20 = smov 80   ;;  %s4314_s21 = smov 72  }
   0x6   :  { %s4315_s22 = smov 104   ;;  %s4316_s23 = smov 112  }
   0x7   :  { %v3936_v15 = vpop.eup %3935  ;;  %s4318_s26 = smov 40   ;;  %s4320_s10 = smov 16  }
   0x8   :  { %v94_v16 = vmul.f32 32.0, %v3936_v15  ;;  %vm98_vm1 = vweird.f32 %v3936_v15  ;;  %s4321_s11 = smov 24  }
   0xa   :  { %v95_v17 = vsub.f32 1.0, %v94_v16 }
   0xb   :  { %61 = vadd.xlane.f32.xlu2 %v60_v9  ;;  %55 = vadd.xlane.f32.xlu1 %v54_v10 }
   0xc   :  { %49 = vadd.xlane.f32.xlu0 %v48_v11  ;;  %v96_v18 = vmul.f32 %v3936_v15, %v95_v17 }
   0xe   :  { %v97_v19 = vadd.f32 %v3936_v15, %v96_v18 }
  0x10   :  { %v4390_v20 = vsel %vm98_vm1, %v3936_v15, %v97_v19 }
  0x11   :  { %6908 = vst [vmem:[#allocation3_spill] sm:$0xff] %v4390_v20 }
  0x13   :  { %64 = vadd.xlane.f32.xlu2 %v63_v13 }
  0x76   :  { %v59_v21 = vpop.xlane.xlu2 %58  ;;  %v53_v22 = vpop.xlane.xlu1 %52 }
  0x77   :  { %v47_v23 = vpop.xlane.xlu0 %46  ;;  %v104_v32 = vmul.f32 %v4390_v20, %v59_v21  ;;  %v102_v33 = vmul.f32 %v4390_v20, %v53_v22 }
  0x78   :  { %v100_v24 = vmul.f32 %v4390_v20, %v47_v23  ;;  %v4476_v23 = vld [vmem:[%s6848_s0 + $0x40] sm:$0xff] }
  0x79   :  { %v4411_v39 = vsub.f32 %v31_v0, %v104_v32  ;;  %v4413_v40 = vsub.f32 %v29_v1, %v102_v33 }
  0x7a   :  { %v4393_v25 = vsub.f32 %v27_v2, %v100_v24  ;;  %v3748_v2 = vld [vmem:[%s6849_s2] sm:$0xff] }
  0x7b   :  { %v136_v48 = vmul.f32 %v4411_v39, %v4411_v39  ;;  %v134_v49 = vmul.f32 %v4413_v40, %v4413_v40  ;;  %494 = vmatpush.bf16.msra.mxu0 %v3748_v2 }
  0x7c   :  { %v132_v26 = vmul.f32 %v4393_v25, %v4393_v25 }
  0x7d   :  { %v160_v53 = vsel %vm44_vm0, %v136_v48, 0.0  ;;  %v154_v54 = vsel %vm44_vm0, %v134_v49, 0.0 }
  0x7e   :  { %v62_v27 = vpop.xlane.xlu2 %61  ;;  %v56_v28 = vpop.xlane.xlu1 %55  ;;  %v148_v29 = vsel %vm44_vm0, %v132_v26, 0.0 }
  0x7f   :  { %v103_v30 = vmul.f32 %v4390_v20, %v56_v28  ;;  %149 = vadd.xlane.f32.xlu0 %v148_v29  ;;  %v50_v31 = vpop.xlane.xlu0 %49  ;;  %v105_v47 = vmul.f32 %v4390_v20, %v62_v27 }
  0x80   :  { %v101_v34 = vmul.f32 %v4390_v20, %v50_v31  ;;  %v69_v31 = vsel %vm44_vm0, %v4476_v23, 0.0 }
  0x81   :  { %v4402_v35 = vsub.f32 %v30_v7, %v103_v30  ;;  %v4430_v52 = vsub.f32 %v32_v6, %v105_v47 }
  0x82   :  { %v4407_v37 = vsub.f32 %v28_v8, %v101_v34 }
  0x83   :  { %v135_v38 = vmul.f32 %v4402_v35, %v4402_v35  ;;  %v137_v56 = vmul.f32 %v4430_v52, %v4430_v52 }
  0x84   :  { %v133_v42 = vmul.f32 %v4407_v37, %v4407_v37 }
  0x85   :  { %v157_v43 = vsel %vm44_vm0, %v135_v38, 0.0  ;;  %v163_v59 = vsel %vm44_vm0, %v137_v56, 0.0 }
  0x86   :  { %v65_v44 = vpop.xlane.xlu2 %64  ;;  %158 = vadd.xlane.f32.xlu2 %v157_v43  ;;  %v151_v45 = vsel %vm44_vm0, %v133_v42, 0.0 }
  0x87   :  { %v106_v46 = vmul.f32 %v4390_v20, %v65_v44  ;;  %67 = vadd.xlane.f32.xlu0 %v66_v41  ;;  %152 = vadd.xlane.f32.xlu1 %v151_v45  ;;  %v4498_v45 = vld [vmem:[%s6850_s1] sm:$0xff] }
  0x88   :  { %v4515_v56 = vperm.slane %v4498_v45, 0 }
  0x89   :  { %v4426_v50 = vsub.f32 %v33_v12, %v106_v46 }
  0x8b   :  { %v138_v51 = vmul.f32 %v4426_v50, %v4426_v50 }
  0x8d   :  { %v166_v55 = vsel %vm44_vm0, %v138_v51, 0.0  ;;  %v4507_v51 = vld [vmem:[%s6848_s0 + $0x58] sm:$0xff] }
  0x8e   :  { %167 = vadd.xlane.f32.xlu2 %v166_v55 }
  0x8f   :  { %161 = vadd.xlane.f32.xlu0 %v160_v53  ;;  %155 = vadd.xlane.f32.xlu1 %v154_v54 }
  0x96   :  { %73 = vadd.xlane.f32.xlu2 %v72_v58 }
  0x97   :  { %164 = vadd.xlane.f32.xlu1 %v163_v59 }
  0x9f   :  { %76 = vadd.xlane.f32.xlu1 %v75_v61 }
  0xf2   :  { %v150_v63 = vpop.xlane.xlu0 %149 }
  0xf3   :  { %v196_v0 = vmul.f32 %v150_v63, %v4390_v20  ;;  %v78_v63 = vsel %vm44_vm0, %v4507_v51, 0.0 }
  0xf5   :  { %v212_v1 = vadd.f32 1e-05, %v196_v0 }
  0xf7   :  { %3937 = vrsqrt.f32 %v212_v1  ;;  %vm234_vm3 = vweird.f32 %v212_v1 }
  0xf9   :  { %v159_v3 = vpop.xlane.xlu2 %158 }
  0xfa   :  { %v199_v4 = vmul.f32 %v159_v3, %v4390_v20  ;;  %v153_v5 = vpop.xlane.xlu1 %152  ;;  %v68_v6 = vpop.xlane.xlu0 %67 }
  0xfb   :  { %v197_v7 = vmul.f32 %v153_v5, %v4390_v20  ;;  %v107_v8 = vmul.f32 %v4390_v20, %v68_v6 }
  0xfc   :  { %v4462_v9 = vadd.f32 1e-05, %v199_v4 }
  0xfd   :  { %v3938_v10 = vpop.eup %3937  ;;  %v213_v11 = vadd.f32 1e-05, %v197_v7  ;;  %v4464_v12 = vsub.f32 %v34_v36, %v107_v8 }
  0xfe   :  { %v229_v13 = vmul.f32 %v3938_v10, %v212_v1  ;;  %3939 = vrsqrt.f32 %v4462_v9  ;;  %vm235_vm2 = vweird.f32 %v3938_v10  ;;  %vm264_vm8 = vweird.f32 %v4462_v9 }
  0xff   :  { %3941 = vrsqrt.f32 %v213_v11  ;;  %v139_v14 = vmul.f32 %v4464_v12, %v4464_v12  ;;  %vm4488_vm4 = vmor %vm234_vm3, %vm235_vm2  ;;  %vm244_vm6 = vweird.f32 %v213_v11 }
 0x100   :  { %v230_v15 = vmul.f32 %v3938_v10, %v229_v13 }
 0x101   :  { %v4469_v16 = vpop.xlane.xlu2 %167  ;;  %v169_v17 = vsel %vm44_vm0, %v139_v14, 0.0 }
 0x102   :  { %v231_v18 = vmul.f32 0.5, %v230_v15  ;;  %v156_v19 = vpop.xlane.xlu1 %155  ;;  %170 = vadd.xlane.f32.xlu0 %v169_v17  ;;  %v162_v22 = vpop.xlane.xlu0 %161 }
 0x103   :  { %v198_v21 = vmul.f32 %v156_v19, %v4390_v20  ;;  %v200_v30 = vmul.f32 %v162_v22, %v4390_v20 }
 0x104   :  { %v4478_v24 = vpop.eup %3939  ;;  %v232_v26 = vsub.f32 1.5, %v231_v18 }
 0x105   :  { %v3942_v27 = vpop.eup %3941  ;;  %v4480_v28 = vadd.f32 1e-05, %v198_v21  ;;  %v259_v33 = vmul.f32 %v4478_v24, %v4462_v9  ;;  %v4492_v42 = vadd.f32 1e-05, %v200_v30  ;;  %vm265_vm9 = vweird.f32 %v4478_v24 }
 0x106   :  { %v239_v29 = vmul.f32 %v3942_v27, %v213_v11  ;;  %v233_v32 = vmul.f32 %v3938_v10, %v232_v26  ;;  %vm245_vm5 = vweird.f32 %v3942_v27  ;;  %vm4543_vm11 = vmor %vm264_vm8, %vm265_vm9 }
 0x107   :  { %3943 = vrsqrt.f32 %v4480_v28  ;;  %v260_v47 = vmul.f32 %v4478_v24, %v259_v33  ;;  %vm246_vm7 = vmor %vm244_vm6, %vm245_vm5  ;;  %vm254_vm12 = vweird.f32 %v4480_v28  ;;  %vm274_vm1 = vweird.f32 %v4492_v42 }
 0x108   :  { %v240_v34 = vmul.f32 %v3942_v27, %v239_v29  ;;  %v237_v46 = vsel %vm4488_vm4, %v3938_v10, %v233_v32  ;;  %3945 = vrsqrt.f32 %v4492_v42 }
 0x109   :  { %v74_v36 = vpop.xlane.xlu2 %73  ;;  %v388_v61 = vmul.f32 %v237_v46, %v4393_v25  ;;  %v261_v62 = vmul.f32 0.5, %v260_v47  ;;  %v4528_v25 = vperm.slane %v4498_v45, 1  ;;  %v4583_v46 = vld [vmem:[%s6848_s0 + $0x70] sm:$0xff] }
 0x10a   :  { %v241_v41 = vmul.f32 0.5, %v240_v34  ;;  %v165_v43 = vpop.xlane.xlu1 %164  ;;  %70 = vadd.xlane.f32.xlu0 %v69_v31  ;;  %v109_v44 = vmul.f32 %v4390_v20, %v74_v36  ;;  %v4563_v31 = vld [vmem:[%s6848_s0 + $0x68] sm:$0xff] }
 0x10b   :  { %v201_v48 = vmul.f32 %v165_v43, %v4390_v20  ;;  %v405_v4 = vmul.f32 %v4515_v56, %v388_v61  ;;  %v262_v6 = vsub.f32 1.5, %v261_v62  ;;  %v84_v36 = vsel %vm44_vm0, %v4563_v31, 0.0 }
 0x10c   :  { %v242_v49 = vsub.f32 1.5, %v241_v41  ;;  %v4512_v55 = vsub.f32 %v4440_v57, %v109_v44 }
 0x10d   :  { %v3944_v53 = vpop.eup %3943  ;;  %v4509_v54 = vadd.f32 1e-05, %v201_v48  ;;  %v422_v17 = vadd.f32 %v4528_v25, %v405_v4  ;;  %v263_v19 = vmul.f32 %v4478_v24, %v262_v6  ;;  %v202_v6 = vmul.f32 %v4469_v16, %v4390_v20 }
 0x10e   :  { %v243_v58 = vmul.f32 %v3942_v27, %v242_v49  ;;  %v249_v59 = vmul.f32 %v3944_v53, %v4480_v28  ;;  %v141_v2 = vmul.f32 %v4512_v55, %v4512_v55  ;;  %v4532_v10 = vpop.eup %3945  ;;  %vm255_vm10 = vweird.f32 %v3944_v53  ;;  %v4558_v28 = vld [vmem:[%s6848_s0 + $0x60] sm:$0xff] }
 0x10f   :  { %3947 = vrsqrt.f32 %v4509_v54  ;;  %v269_v21 = vmul.f32 %v4532_v10, %v4492_v42  ;;  %vm256_vm13 = vmor %vm254_vm12, %vm255_vm10  ;;  %v267_v32 = vsel %vm4543_vm11, %v4478_v24, %v263_v19  ;;  %v81_v34 = vsel %vm44_vm0, %v4558_v28, 0.0  ;;  %v4578_v24 = vld [vmem:[%s6848_s0 + $0x78] sm:$0xff] }
 0x110   :  { %v247_v0 = vsel %vm246_vm7, %v3942_v27, %v243_v58  ;;  %v250_v1 = vmul.f32 %v3944_v53, %v249_v59  ;;  %v175_v8 = vsel %vm44_vm0, %v141_v2, 0.0  ;;  %82 = vadd.xlane.f32.xlu2 %v81_v34  ;;  %v391_v43 = vmul.f32 %v267_v32, %v4402_v35 }
 0x111   :  { %v389_v57 = vmul.f32 %v247_v0, %v4407_v37  ;;  %176 = vadd.xlane.f32.xlu1 %v175_v8  ;;  %v270_v33 = vmul.f32 %v4532_v10, %v269_v21  ;;  %v87_v35 = vsel %vm44_vm0, %v4583_v46, 0.0  ;;  %vm284_vm14 = vweird.f32 %v4509_v54 }
 0x112   :  { %v251_v3 = vmul.f32 0.5, %v250_v1  ;;  %79 = vadd.xlane.f32.xlu0 %v78_v63  ;;  %v77_v5 = vpop.xlane.xlu1 %76  ;;  %v408_v49 = vmul.f32 %v4515_v56, %v391_v43  ;;  %vm275_vm2 = vweird.f32 %v4532_v10 }
 0x113   :  { %v406_v7 = vmul.f32 %v4515_v56, %v389_v57  ;;  %v110_v11 = vmul.f32 %v4390_v20, %v77_v5  ;;  %v271_v44 = vmul.f32 0.5, %v270_v33  ;;  %vm276_vm4 = vmor %vm274_vm1, %vm275_vm2 }
 0x114   :  { %v252_v37 = vsub.f32 1.5, %v251_v3  ;;  %v425_v61 = vadd.f32 %v4528_v25, %v408_v49 }
 0x115   :  { %v423_v13 = vadd.f32 %v4528_v25, %v406_v7  ;;  %v3948_v14 = vpop.eup %3947  ;;  %v4540_v18 = vsub.f32 %v4448_v60, %v110_v11  ;;  %v218_v7 = vadd.f32 1e-05, %v202_v6 }
 0x116   :  { %v253_v15 = vmul.f32 %v3944_v53, %v252_v37  ;;  %v279_v22 = vmul.f32 %v3948_v14, %v4509_v54  ;;  %vm285_vm15 = vweird.f32 %v3948_v14 }
 0x117   :  { %v438_v26 = vpack.c.bf16 %v423_v13, %v422_v17  ;;  %v142_v27 = vmul.f32 %v4540_v18, %v4540_v18  ;;  %vm286_vm3 = vmor %vm284_vm14, %vm285_vm15  ;;  %3949 = vrsqrt.f32 %v218_v7  ;;  %vm294_vm5 = vweird.f32 %v218_v7 }
 0x118   :  { %v257_v60 = vsel %vm256_vm13, %v3944_v53, %v253_v15  ;;  %v280_v29 = vmul.f32 %v3948_v14, %v279_v22  ;;  %v272_v53 = vsub.f32 1.5, %v271_v44 }
 0x119   :  { %3564 = vmatmul.msk.bf16.vlgmr.msra.gmra.mxu0 %vm44_vm0, %v438_v26  ;;  %v178_v30 = vsel %vm44_vm0, %v142_v27, 0.0  ;;  %v390_v38 = vmul.f32 %v257_v60, %v4413_v40  ;;  %v90_v40 = vsel %vm44_vm0, %v4578_v24, 0.0 }
 0x11a   :  { %179 = vadd.xlane.f32.xlu1 %v178_v30  ;;  %v281_v41 = vmul.f32 0.5, %v280_v29  ;;  %85 = vadd.xlane.f32.xlu0 %v84_v36  ;;  %v273_v62 = vmul.f32 %v4532_v10, %v272_v53 }
 0x11b   :  { %v407_v47 = vmul.f32 %v4515_v56, %v390_v38  ;;  %91 = vadd.xlane.f32.xlu2 %v90_v40 }
 0x11c   :  { %v282_v48 = vsub.f32 1.5, %v281_v41  ;;  %v277_v54 = vsel %vm276_vm4, %v4532_v10, %v273_v62 }
 0x11d   :  { %v424_v58 = vadd.f32 %v4528_v25, %v407_v47  ;;  %v392_v42 = vmul.f32 %v277_v54, %v4411_v39  ;;  %v3950_v8 = vpop.eup %3949 }
 0x11e   :  { %v283_v59 = vmul.f32 %v3948_v14, %v282_v48  ;;  %vm295_vm6 = vweird.f32 %v3950_v8 }
 0x11f   :  { %v439_v63 = vpack.c.bf16 %v425_v61, %v424_v58  ;;  %v409_v2 = vmul.f32 %v4515_v56, %v392_v42  ;;  %vm296_vm7 = vmor %vm294_vm5, %vm295_vm6 }
 0x120   :  { %v287_v0 = vsel %vm286_vm3, %v3948_v14, %v283_v59 }
 0x121   :  { %v393_v1 = vmul.f32 %v287_v0, %v4430_v52  ;;  %v426_v4 = vadd.f32 %v4528_v25, %v409_v2  ;;  %v289_v52 = vmul.f32 %v3950_v8, %v218_v7 }
 0x122   :  { %88 = vadd.xlane.f32.xlu0 %v87_v35  ;;  %v4631_v35 = vperm.slane %v4498_v45, 7 }
 0x123   :  { %v410_v57 = vmul.f32 %v4515_v56, %v393_v1  ;;  %v290_v10 = vmul.f32 %v3950_v8, %v289_v52 }
 0x125   :  { %v427_v3 = vadd.f32 %v4528_v25, %v410_v57  ;;  %v291_v13 = vmul.f32 0.5, %v290_v10 }
 0x127   :  { %v440_v5 = vpack.c.bf16 %v427_v3, %v426_v4  ;;  %v292_v14 = vsub.f32 1.5, %v291_v13 }
 0x129   :  { %3565 = vmatmul.msk.bf16.gmra.mxu0 %vm44_vm0, %v439_v63  ;;  %v293_v9 = vmul.f32 %v3950_v8, %v292_v14 }
 0x12b   :  { %v297_v60 = vsel %vm296_vm7, %v3950_v8, %v293_v9 }
 0x12c   :  { %v394_v34 = vmul.f32 %v297_v60, %v4426_v50 }
 0x12e   :  { %v411_v47 = vmul.f32 %v4515_v56, %v394_v34 }
 0x139   :  { %3566 = vmatmul.msk.bf16.gmra.mxu0 %vm44_vm0, %v440_v5 }
 0x175   :  { %v171_v39 = vpop.xlane.xlu0 %170 }
 0x176   :  { %v203_v37 = vmul.f32 %v171_v39, %v4390_v20 }
 0x178   :  { %v219_v11 = vadd.f32 1e-05, %v203_v37 }
 0x17a   :  { %3951 = vrsqrt.f32 %v219_v11  ;;  %vm304_vm8 = vweird.f32 %v219_v11 }
 0x17d   :  { %v71_v15 = vpop.xlane.xlu0 %70 }
 0x17e   :  { %v108_v17 = vmul.f32 %v4390_v20, %v71_v15 }
 0x180   :  { %v3952_v19 = vpop.eup %3951  ;;  %v4611_v16 = vsub.f32 %v4476_v23, %v108_v17 }
 0x181   :  { %v299_v21 = vmul.f32 %v3952_v19, %v219_v11  ;;  %vm305_vm9 = vweird.f32 %v3952_v19 }
 0x182   :  { %v140_v22 = vmul.f32 %v4611_v16, %v4611_v16  ;;  %vm306_vm10 = vmor %vm304_vm8, %vm305_vm9 }
 0x183   :  { %v300_v26 = vmul.f32 %v3952_v19, %v299_v21  ;;  %v83_v54 = vpop.xlane.xlu2 %82 }
 0x184   :  { %v172_v27 = vsel %vm44_vm0, %v140_v22, 0.0  ;;  %v112_v39 = vmul.f32 %v4390_v20, %v83_v54  ;;  %v177_v17 = vpop.xlane.xlu1 %176 }
 0x185   :  { %v301_v29 = vmul.f32 0.5, %v300_v26  ;;  %173 = vadd.xlane.f32.xlu2 %v172_v27  ;;  %v80_v30 = vpop.xlane.xlu0 %79  ;;  %v205_v9 = vmul.f32 %v177_v17, %v4390_v20 }
 0x186   :  { %v111_v32 = vmul.f32 %v4390_v20, %v80_v30  ;;  %v4672_v11 = vsub.f32 %v4558_v28, %v112_v39 }
 0x187   :  { %v302_v33 = vsub.f32 1.5, %v301_v29  ;;  %v221_v28 = vadd.f32 1e-05, %v205_v9 }
 0x188   :  { %v4618_v23 = vsub.f32 %v4507_v51, %v111_v32  ;;  %v428_v51 = vadd.f32 %v4528_v25, %v411_v47 }
 0x189   :  { %v303_v36 = vmul.f32 %v3952_v19, %v302_v33  ;;  %3953 = vrsqrt.f32 %v221_v28  ;;  %vm324_vm11 = vweird.f32 %v221_v28 }
 0x18a   :  { %v143_v38 = vmul.f32 %v4618_v23, %v4618_v23 }
 0x18b   :  { %v307_v41 = vsel %vm306_vm10, %v3952_v19, %v303_v36 }
 0x18c   :  { %v181_v43 = vsel %vm44_vm0, %v143_v38, 0.0  ;;  %v395_v44 = vmul.f32 %v307_v41, %v4464_v12 }
 0x18d   :  { %182 = vadd.xlane.f32.xlu0 %v181_v43  ;;  %v86_v1 = vpop.xlane.xlu0 %85  ;;  %v180_v26 = vpop.xlane.xlu1 %179 }
 0x18e   :  { %v412_v48 = vmul.f32 %v4515_v56, %v395_v44  ;;  %v92_v42 = vpop.xlane.xlu2 %91  ;;  %v113_v57 = vmul.f32 %v4390_v20, %v86_v1  ;;  %v206_v60 = vmul.f32 %v180_v26, %v4390_v20 }
 0x18f   :  { %v115_v2 = vmul.f32 %v4390_v20, %v92_v42  ;;  %v3954_v27 = vpop.eup %3953 }
 0x190   :  { %v429_v40 = vadd.f32 %v4528_v25, %v412_v48  ;;  %v4652_v3 = vsub.f32 %v4563_v31, %v113_v57  ;;  %v319_v29 = vmul.f32 %v3954_v27, %v221_v28  ;;  %v222_v30 = vadd.f32 1e-05, %v206_v60 }
 0x191   :  { %v4655_v4 = vsub.f32 %v4578_v24, %v115_v2  ;;  %vm325_vm12 = vweird.f32 %v3954_v27 }
 0x192   :  { %v441_v50 = vpack.c.bf16 %v429_v40, %v428_v51  ;;  %v145_v6 = vmul.f32 %v4652_v3, %v4652_v3  ;;  %v320_v32 = vmul.f32 %v3954_v27, %v319_v29  ;;  %3955 = vrsqrt.f32 %v222_v30  ;;  %vm326_vm13 = vmor %vm324_vm11, %vm325_vm12 }
 0x193   :  { %v147_v8 = vmul.f32 %v4655_v4, %v4655_v4  ;;  %vm334_vm2 = vweird.f32 %v222_v30 }
 0x194   :  { %3567 = vmatmul.msk.bf16.gmra.mxu0 %vm44_vm0, %v441_v50  ;;  %v187_v52 = vsel %vm44_vm0, %v145_v6, 0.0  ;;  %v321_v38 = vmul.f32 0.5, %v320_v32 }
 0x195   :  { %v89_v5 = vpop.xlane.xlu0 %88  ;;  %v193_v31 = vsel %vm44_vm0, %v147_v8, 0.0 }
 0x196   :  { %v496_v49 = vpop.f32.mrf.mxu0  ;;  %v114_v7 = vmul.f32 %v4390_v20, %v89_v5  ;;  %v322_v41 = vsub.f32 1.5, %v321_v38 }
 0x197   :  { %v497_v58 = vadd.f32 %v496_v49, %v4631_v35 }
 0x198   :  { %v4664_v10 = vsub.f32 %v4583_v46, %v114_v7  ;;  %v144_v46 = vmul.f32 %v4672_v11, %v4672_v11  ;;  %v3956_v44 = vpop.eup %3955  ;;  %v323_v40 = vmul.f32 %v3954_v27, %v322_v41 }
 0x199   :  { %v329_v50 = vmul.f32 %v3956_v44, %v222_v30  ;;  %vm335_vm3 = vweird.f32 %v3956_v44 }
 0x19a   :  { %v146_v24 = vmul.f32 %v4664_v10, %v4664_v10  ;;  %v184_v14 = vsel %vm44_vm0, %v144_v46, 0.0  ;;  %vm336_vm6 = vmor %vm334_vm2, %vm335_vm3 }
 0x19c   :  { %v190_v37 = vsel %vm44_vm0, %v146_v24, 0.0 }
 0x19e   :  { %v498_v53 = vpop.f32.mrf.mxu0 }
 0x19f   :  { %v499_v12 = vadd.f32 %v498_v53, %v4631_v35 }
 0x1a1   :  { %v4635_v59 = vpack.c.bf16 %v499_v12, %v497_v58  ;;  %v327_v58 = vsel %vm326_vm13, %v3954_v27, %v323_v40  ;;  %v330_v12 = vmul.f32 %v3956_v44, %v329_v50 }
 0x1a3   :  { %801 = vrot.lane.b32.xlu1 %v4635_v59, %s4308_s15  ;;  %560 = vrot.lane.b32.xlu2 %v4635_v59, %s4309_s16  ;;  %v331_v54 = vmul.f32 0.5, %v330_v12 }
 0x1a4   :  { %793 = vrot.lane.b32.xlu0 %v4635_v59, %s4310_s17 }
 0x1a5   :  { %v332_v7 = vsub.f32 1.5, %v331_v54 }
 0x1a6   :  { %v501_v45 = vpop.f32.mrf.mxu0 }
 0x1a7   :  { %v502_v62 = vadd.f32 %v501_v45, %v4631_v35  ;;  %v333_v39 = vmul.f32 %v3956_v44, %v332_v7 }
 0x1ae   :  { %v503_v61 = vpop.f32.mrf.mxu0 }
 0x1af   :  { %v504_v63 = vadd.f32 %v503_v61, %v4631_v35 }
 0x1b1   :  { %v4645_v0 = vpack.c.bf16 %v504_v63, %v502_v62  ;;  %v397_v63 = vmul.f32 %v327_v58, %v4512_v55 }
 0x1b3   :  { %562 = vrot.lane.b32.xlu0 %v4645_v0, %s4309_s16  ;;  %v414_v6 = vmul.f32 %v4515_v56, %v397_v63 }
 0x1b6   :  { %v506_v13 = vpop.f32.mrf.mxu0 }
 0x1b7   :  { %v507_v21 = vadd.f32 %v506_v13, %v4631_v35 }
 0x1be   :  { %v508_v15 = vpop.f32.mrf.mxu0 }
 0x1bf   :  { %v509_v19 = vadd.f32 %v508_v15, %v4631_v35 }
 0x1c1   :  { %v4680_v22 = vpack.c.bf16 %v509_v19, %v507_v21 }
 0x1cc   :  { %188 = vadd.xlane.f32.xlu2 %v187_v52 }
 0x1cd   :  { %194 = vadd.xlane.f32.xlu1 %v193_v31 }
 0x1d4   :  { %191 = vadd.xlane.f32.xlu2 %v190_v37 }
 0x1dd   :  { %185 = vadd.xlane.f32.xlu0 %v184_v14  ;;  %v337_v14 = vsel %vm336_vm6, %v3956_v44, %v333_v39  ;;  %vm622_vm6 = vcmask 523264  }
 0x1de   :  { %v398_v21 = vmul.f32 %v337_v14, %v4540_v18 }
 0x1e6   :  { %797 = vrot.lane.b32.xlu1 %v4680_v22, %s4310_s17 }
 0x1ec   :  { %715 = vrot.lane.b32.xlu2 %v4635_v59, %s4311_s18 }
 0x1ee   :  { %719 = vrot.lane.b32.xlu1 %v4680_v22, %s4311_s18 }
 0x1f1   :  { %717 = vrot.lane.b32.xlu0 %v4645_v0, %s4311_s18 }
 0x1f4   :  { %803 = vrot.lane.b32.xlu2 %v4645_v0, %s4308_s15 }
 0x1f8   :  { %v174_v33 = vpop.xlane.xlu2 %173 }
 0x1f9   :  { %v204_v34 = vmul.f32 %v174_v33, %v4390_v20  ;;  %956 = vrot.lane.b32.xlu0 %v4645_v0, %s4312_s19 }
 0x1fb   :  { %v220_v36 = vadd.f32 1e-05, %v204_v34 }
 0x1fc   :  { %795 = vrot.lane.b32.xlu2 %v4645_v0, %s4310_s17 }
 0x1fd   :  { %3957 = vrsqrt.f32 %v220_v36  ;;  %vm314_vm14 = vweird.f32 %v220_v36 }
 0x200   :  { %v183_v43 = vpop.xlane.xlu0 %182  ;;  %v4753_v29 = vpop.permute.xlu2 %560 }
 0x201   :  { %v207_v47 = vmul.f32 %v183_v43, %v4390_v20  ;;  %805 = vrot.lane.b32.xlu0 %v4680_v22, %s4308_s15 }
 0x203   :  { %v3958_v48 = vpop.eup %3957  ;;  %v223_v51 = vadd.f32 1e-05, %v207_v47 }
 0x204   :  { %v309_v49 = vmul.f32 %v3958_v48, %v220_v36  ;;  %564 = vrot.lane.b32.xlu2 %v4680_v22, %s4309_s16  ;;  %vm315_vm15 = vweird.f32 %v3958_v48 }
 0x205   :  { %3959 = vrsqrt.f32 %v223_v51  ;;  %vm316_vm1 = vmor %vm314_vm14, %vm315_vm15  ;;  %vm344_vm4 = vweird.f32 %v223_v51 }
 0x206   :  { %v310_v53 = vmul.f32 %v3958_v48, %v309_v49 }
 0x208   :  { %v311_v45 = vmul.f32 0.5, %v310_v53 }
 0x209   :  { %1077 = vrot.lane.b32.xlu0 %v4680_v22, %s4313_s20 }
 0x20a   :  { %v312_v61 = vsub.f32 1.5, %v311_v45 }
 0x20b   :  { %v3960_v62 = vpop.eup %3959 }
 0x20c   :  { %v313_v1 = vmul.f32 %v3958_v48, %v312_v61  ;;  %v339_v42 = vmul.f32 %v3960_v62, %v223_v51  ;;  %958 = vrot.lane.b32.xlu2 %v4680_v22, %s4312_s19  ;;  %vm345_vm5 = vweird.f32 %v3960_v62 }
 0x20d   :  { %vm346_vm7 = vmor %vm344_vm4, %vm345_vm5  ;;  %vm568_vm5 = vcmask 64512  }
 0x20e   :  { %v317_v57 = vsel %vm316_vm1, %v3958_v48, %v313_v1  ;;  %v340_v2 = vmul.f32 %v3960_v62, %v339_v42 }
 0x20f   :  { %v396_v5 = vmul.f32 %v317_v57, %v4611_v16  ;;  %v431_v16 = vadd.f32 %v4528_v25, %v414_v6 }
 0x210   :  { %v341_v8 = vmul.f32 0.5, %v340_v2 }
 0x211   :  { %v511_v52 = vpop.f32.mrf.mxu0  ;;  %v413_v55 = vmul.f32 %v4515_v56, %v396_v5  ;;  %1347 = vrot.lane.b32.xlu0 %v4645_v0, %s4314_s21 }
 0x212   :  { %v342_v31 = vsub.f32 1.5, %v341_v8  ;;  %v512_v19 = vadd.f32 %v511_v52, %v4631_v35 }
 0x213   :  { %v430_v24 = vadd.f32 %v4528_v25, %v413_v55 }
 0x214   :  { %v343_v37 = vmul.f32 %v3960_v62, %v342_v31  ;;  %1075 = vrot.lane.b32.xlu2 %v4645_v0, %s4313_s20 }
 0x215   :  { %v442_v13 = vpack.c.bf16 %v431_v16, %v430_v24  ;;  %v4759_v32 = vpop.permute.xlu1 %801 }
 0x216   :  { %v347_v46 = vsel %vm346_vm7, %v3960_v62, %v343_v37  ;;  %v4761_v33 = vpop.permute.xlu0 %793  ;;  %vm1039_vm7 = vcmask 130112  }
 0x217   :  { %3568 = vmatmul.msk.bf16.gmra.mxu0 %vm44_vm0, %v442_v13  ;;  %v399_v17 = vmul.f32 %v347_v46, %v4618_v23  ;;  %v415_v23 = vmul.f32 %v4515_v56, %v398_v21 }
 0x219   :  { %v513_v15 = vpop.f32.mrf.mxu0  ;;  %1345 = vrot.lane.b32.xlu0 %v4635_v59, %s4314_s21  ;;  %v416_v26 = vmul.f32 %v4515_v56, %v399_v17  ;;  %v432_v18 = vadd.f32 %v4528_v25, %v415_v23 }
 0x21a   :  { %v514_v9 = vadd.f32 %v513_v15, %v4631_v35 }
 0x21b   :  { %v433_v27 = vadd.f32 %v4528_v25, %v416_v26 }
 0x21c   :  { %v4724_v28 = vpack.c.bf16 %v514_v9, %v512_v19  ;;  %1337 = vrot.lane.b32.xlu2 %v4635_v59, %s4315_s22 }
 0x21d   :  { %v443_v60 = vpack.c.bf16 %v433_v27, %v432_v18 }
 0x21e   :  { %566 = vrot.lane.b32.xlu1 %v4724_v28, %s4309_s16 }
 0x221   :  { %1065 = vrot.lane.b32.xlu0 %v4635_v59, %s4316_s23 }
 0x224   :  { %1067 = vrot.lane.b32.xlu2 %v4645_v0, %s4316_s23 }
 0x225   :  { %v4766_v41 = vpop.permute.xlu0 %562 }
 0x226   :  { %954 = vrot.lane.b32.xlu1 %v4635_v59, %s4312_s19 }
 0x227   :  { %3569 = vmatmul.msk.bf16.gmra.mxu0 %vm44_vm0, %v443_v60 }
 0x229   :  { %1341 = vrot.lane.b32.xlu0 %v4680_v22, %s4315_s22 }
 0x22c   :  { %721 = vrot.lane.b32.xlu2 %v4724_v28, %s4311_s18 }
 0x22e   :  { %1349 = vrot.lane.b32.xlu1 %v4680_v22, %s4314_s21 }
 0x231   :  { %1351 = vrot.lane.b32.xlu0 %v4724_v28, %s4314_s21 }
 0x234   :  { %1079 = vrot.lane.b32.xlu2 %v4724_v28, %s4313_s20 }
 0x236   :  { %1073 = vrot.lane.b32.xlu1 %v4635_v59, %s4313_s20 }
 0x239   :  { %1343 = vrot.lane.b32.xlu0 %v4724_v28, %s4315_s22 }
 0x23e   :  { %1339 = vrot.lane.b32.xlu1 %v4645_v0, %s4315_s22 }
 0x23f   :  { %v189_v30 = vpop.xlane.xlu2 %188 }
 0x240   :  { %v209_v34 = vmul.f32 %v189_v30, %v4390_v20  ;;  %v195_v43 = vpop.xlane.xlu1 %194 }
 0x241   :  { %v211_v48 = vmul.f32 %v195_v43, %v4390_v20 }
 0x242   :  { %v225_v36 = vadd.f32 1e-05, %v209_v34 }
 0x243   :  { %v227_v50 = vadd.f32 1e-05, %v211_v48 }
 0x244   :  { %3961 = vrsqrt.f32 %v225_v36  ;;  %vm364_vm8 = vweird.f32 %v225_v36 }
 0x245   :  { %vm384_vm1 = vweird.f32 %v227_v50 }
 0x246   :  { %1069 = vrot.lane.b32.xlu1 %v4680_v22, %s4316_s23 }
 0x247   :  { %v192_v38 = vpop.xlane.xlu2 %191 }
 0x248   :  { %v210_v44 = vmul.f32 %v192_v38, %v4390_v20 }
 0x24a   :  { %v3962_v47 = vpop.eup %3961  ;;  %v226_v40 = vadd.f32 1e-05, %v210_v44 }
 0x24b   :  { %v359_v51 = vmul.f32 %v3962_v47, %v225_v36  ;;  %vm365_vm9 = vweird.f32 %v3962_v47 }
 0x24c   :  { %3963 = vrsqrt.f32 %v226_v40  ;;  %vm366_vm10 = vmor %vm364_vm8, %vm365_vm9  ;;  %vm374_vm14 = vweird.f32 %v226_v40  ;;  %vm1311_vm8 = vcmask 195712   ;;  %vm1583_vm9 = vcmask 261312  }
 0x24d   :  { %v360_v53 = vmul.f32 %v3962_v47, %v359_v51  ;;  %3965 = vrsqrt.f32 %v227_v50 }
 0x24e   :  { %807 = vrot.lane.b32.xlu1 %v4724_v28, %s4308_s15 }
 0x24f   :  { %v4772_v49 = vpop.permute.xlu2 %715  ;;  %v361_v61 = vmul.f32 0.5, %v360_v53 }
 0x250   :  { %v186_v58 = vpop.xlane.xlu0 %185 }
 0x251   :  { %v208_v12 = vmul.f32 %v186_v58, %v4390_v20  ;;  %v362_v54 = vsub.f32 1.5, %v361_v61 }
 0x252   :  { %v3964_v62 = vpop.eup %3963 }
 0x253   :  { %v224_v45 = vadd.f32 1e-05, %v208_v12  ;;  %v3966_v1 = vpop.eup %3965  ;;  %v369_v42 = vmul.f32 %v3964_v62, %v226_v40  ;;  %v363_v2 = vmul.f32 %v3962_v47, %v362_v54  ;;  %vm375_vm15 = vweird.f32 %v3964_v62 }
 0x254   :  { %v379_v5 = vmul.f32 %v3966_v1, %v227_v50  ;;  %vm385_vm2 = vweird.f32 %v3966_v1  ;;  %vm376_vm3 = vmor %vm374_vm14, %vm375_vm15 }
 0x255   :  { %3967 = vrsqrt.f32 %v224_v45  ;;  %v370_v7 = vmul.f32 %v3964_v62, %v369_v42  ;;  %v367_v55 = vsel %vm366_vm10, %v3962_v47, %v363_v2  ;;  %vm354_vm12 = vweird.f32 %v224_v45  ;;  %vm386_vm4 = vmor %vm384_vm1, %vm385_vm2 }
 0x256   :  { %799 = vrot.lane.b32.xlu1 %v4724_v28, %s4310_s17  ;;  %v380_v31 = vmul.f32 %v3966_v1, %v379_v5  ;;  %v401_v37 = vmul.f32 %v367_v55, %v4652_v3 }
 0x257   :  { %v4777_v63 = vpop.permute.xlu2 %803  ;;  %v371_v16 = vmul.f32 0.5, %v370_v7 }
 0x258   :  { %v381_v13 = vmul.f32 0.5, %v380_v31  ;;  %v418_v9 = vmul.f32 %v4515_v56, %v401_v37  ;;  %v4800_v40 = vpop.permute.xlu1 %797  ;;  %v582_v31 = vsel %vm568_vm5, %v4753_v29, 0 }
 0x259   :  { %v372_v14 = vsub.f32 1.5, %v371_v16 }
 0x25a   :  { %v382_v21 = vsub.f32 1.5, %v381_v13  ;;  %v435_v27 = vadd.f32 %v4528_v25, %v418_v9 }
 0x25b   :  { %v3968_v57 = vpop.eup %3967  ;;  %v373_v3 = vmul.f32 %v3964_v62, %v372_v14 }
 0x25c   :  { %v349_v6 = vmul.f32 %v3968_v57, %v224_v45  ;;  %vm355_vm11 = vweird.f32 %v3968_v57  ;;  %v383_v18 = vmul.f32 %v3966_v1, %v382_v21 }
 0x25d   :  { %vm356_vm13 = vmor %vm354_vm12, %vm355_vm11  ;;  %v377_v30 = vsel %vm376_vm3, %v3964_v62, %v373_v3 }
 0x25e   :  { %960 = vrot.lane.b32.xlu1 %v4724_v28, %s4312_s19  ;;  %v350_v8 = vmul.f32 %v3968_v57, %v349_v6  ;;  %v387_v34 = vsel %vm386_vm4, %v3966_v1, %v383_v18  ;;  %v402_v36 = vmul.f32 %v377_v30, %v4664_v10  ;;  %v585_v6 = vsel %vm568_vm5, %v4766_v41, 0 }
 0x25f   :  { %v4781_v52 = vpop.permute.xlu2 %795  ;;  %v403_v38 = vmul.f32 %v387_v34, %v4655_v4 }
 0x260   :  { %v351_v24 = vmul.f32 0.5, %v350_v8  ;;  %v419_v43 = vmul.f32 %v4515_v56, %v402_v36  ;;  %v720_v58 = vpop.permute.xlu1 %719 }
 0x261   :  { %v420_v47 = vmul.f32 %v4515_v56, %v403_v38 }
 0x262   :  { %v352_v39 = vsub.f32 1.5, %v351_v24  ;;  %v436_v48 = vadd.f32 %v4528_v25, %v419_v43 }
 0x263   :  { %v437_v51 = vadd.f32 %v4528_v25, %v420_v47  ;;  %v718_v45 = vpop.permute.xlu0 %717 }
 0x264   :  { %v353_v46 = vmul.f32 %v3968_v57, %v352_v39 }
 0x265   :  { %v445_v50 = vpack.c.bf16 %v437_v51, %v436_v48 }
 0x266   :  { %1071 = vrot.lane.b32.xlu1 %v4724_v28, %s4316_s23  ;;  %v357_v15 = vsel %vm356_vm13, %v3968_v57, %v353_v46 }
 0x267   :  { %v565_v17 = vpop.permute.xlu2 %564  ;;  %v400_v19 = vmul.f32 %v357_v15, %v4672_v11 }
 0x268   :  { %v588_v62 = vsel %vm568_vm5, %v565_v17, 0 }
 0x269   :  { %v417_v26 = vmul.f32 %v4515_v56, %v400_v19 }
 0x26b   :  { %v434_v23 = vadd.f32 %v4528_v25, %v417_v26  ;;  %v957_v54 = vpop.permute.xlu0 %956 }
 0x26d   :  { %v444_v60 = vpack.c.bf16 %v435_v27, %v434_v23  ;;  %v825_v23 = vsel %vm568_vm5, %v4777_v63, 0  ;;  %v822_v27 = vsel %vm568_vm5, %v4759_v32, 0 }
 0x26f   :  { %v4791_v11 = vpop.permute.xlu2 %958  ;;  %3570 = vmatmul.msk.bf16.gmra.mxu0 %vm44_vm0, %v444_v60 }
 0x273   :  { %v806_v8 = vpop.permute.xlu0 %805 }
 0x274   :  { %v828_v26 = vsel %vm568_vm5, %v806_v8, 0 }
 0x277   :  { %v1076_v44 = vpop.permute.xlu2 %1075 }
 0x278   :  { %v1097_v15 = vsel %vm568_vm5, %v1076_v44, 0 }
 0x27b   :  { %v1078_v37 = vpop.permute.xlu0 %1077 }
 0x27c   :  { %v1100_v29 = vsel %vm568_vm5, %v1078_v37, 0 }
 0x27f   :  { %v4802_v53 = vpop.permute.xlu2 %1337  ;;  %3571 = vmatmul.msk.bf16.gmra.mxu0 %vm44_vm0, %v445_v50 }
 0x280   :  { %6913 = vst [vmem:[#allocation4_spill] sm:$0xff] %v4802_v53 }
 0x283   :  { %v4873_v18 = vpop.permute.xlu0 %1347 }
 0x287   :  { %v4805_v10 = vpop.permute.xlu2 %1067 }
 0x28b   :  { %v4880_v63 = vpop.permute.xlu0 %1345 }
 0x28f   :  { %v722_v4 = vpop.permute.xlu2 %721 }
 0x290   :  { %v567_v12 = vpop.permute.xlu1 %566  ;;  %743 = vmatpush.bf16.msra.mxu2 %v722_v4 }
 0x291   :  { %v591_v56 = vsel %vm568_vm5, %v567_v12, 0 }
 0x292   :  { %597 = vmatpush.bf16.xpose.msra.mxu1 %v591_v56  ;;  %v4949_v56 = vld [vmem:[%s6851_s6 + $0x8] sm:$0xff]  }
 0x293   :  { %v1066_v30 = vpop.permute.xlu0 %1065 }
 0x294   :  { %v516_v61 = vpop.f32.mrf.mxu0  ;;  %744 = vmatpush.bf16.msra.mxu2 %v720_v58  ;;  %v4937_v58 = vld [vmem:[%s6851_s6] sm:$0xff]  }
 0x295   :  { %v517_v42 = vadd.f32 %v516_v61, %v4631_v35  ;;  %v6860_v8 = vunpack.c.l.bf16 %v4937_v58 }
 0x298   :  { %v4808_v25 = vpop.permute.xlu1 %954  ;;  %745 = vmatpush.bf16.msra.mxu2 %v718_v45 }
 0x29a   :  { %598 = vmatpush.bf16.xpose.msra.mxu1 %v588_v62  ;;  %v6857_v62 = vunpack.c.l.bf16 %v4949_v56 }
 0x29c   :  { %v518_v1 = vpop.f32.mrf.mxu0  ;;  %746 = vmatpush.bf16.msra.mxu2 %v4772_v49  ;;  %v1080_v49 = vpop.permute.xlu2 %1079 }
 0x29d   :  { %v519_v57 = vadd.f32 %v518_v1, %v4631_v35  ;;  %v1103_v41 = vsel %vm568_vm5, %v1080_v49, 0 }
 0x29f   :  { %v4814_v2 = vpack.c.bf16 %v519_v57, %v517_v42 }
 0x2a0   :  { %v4816_v5 = vpop.permute.xlu1 %1349 }
 0x2a1   :  { %1616 = vrot.lane.b32.xlu1 %v4814_v2, %s4309_s16  ;;  %1846 = vrot.lane.b32.xlu0 %v4814_v2, %s4310_s17 }
 0x2a2   :  { %1854 = vrot.lane.b32.xlu2 %v4814_v2, %s4308_s15  ;;  %599 = vmatpush.bf16.xpose.msra.mxu1 %v585_v6 }
 0x2a4   :  { %v521_v7 = vpop.f32.mrf.mxu0 }
 0x2a5   :  { %v522_v16 = vadd.f32 %v521_v7, %v4631_v35 }
 0x2a8   :  { %v1074_v55 = vpop.permute.xlu1 %1073 }
 0x2a9   :  { %2124 = vrot.lane.b32.xlu1 %v4814_v2, %s4313_s20  ;;  %2116 = vrot.lane.b32.xlu0 %v4814_v2, %s4316_s23  ;;  %v1094_v9 = vsel %vm568_vm5, %v1074_v55, 0 }
 0x2aa   :  { %2394 = vrot.lane.b32.xlu2 %v4814_v2, %s4314_s21  ;;  %600 = vmatpush.bf16.xpose.msra.mxu1 %v582_v31 }
 0x2ac   :  { %v523_v24 = vpop.f32.mrf.mxu0 }
 0x2ad   :  { %v524_v39 = vadd.f32 %v523_v24, %v4631_v35 }
 0x2af   :  { %v4837_v13 = vpack.c.bf16 %v524_v39, %v522_v16 }
 0x2b0   :  { %v4839_v46 = vpop.permute.xlu1 %1339 }
 0x2b1   :  { %6914 = vst [vmem:[#allocation5_spill] sm:$0xff] %v4839_v46  ;;  %2386 = vrot.lane.b32.xlu1 %v4814_v2, %s4315_s22  ;;  %1856 = vrot.lane.b32.xlu0 %v4837_v13, %s4308_s15 }
 0x2b2   :  { %1109 = vmatpush.bf16.xpose.msrb.mxu1 %v1103_v41  ;;  %1618 = vrot.lane.b32.xlu2 %v4837_v13, %s4309_s16 }
 0x2b3   :  { %3572 = vmatmul.msk.bf16.vlgmr.msra.gmra.mxu1 %vm568_vm5, %v4635_v59 }
 0x2b8   :  { %v1070_v14 = vpop.permute.xlu1 %1069 }
 0x2b9   :  { %1848 = vrot.lane.b32.xlu1 %v4837_v13, %s4310_s17  ;;  %2396 = vrot.lane.b32.xlu0 %v4837_v13, %s4314_s21 }
 0x2ba   :  { %1110 = vmatpush.bf16.xpose.msrb.mxu1 %v1100_v29  ;;  %2118 = vrot.lane.b32.xlu2 %v4837_v13, %s4316_s23 }
 0x2c0   :  { %v808_v17 = vpop.permute.xlu1 %807 }
 0x2c1   :  { %2126 = vrot.lane.b32.xlu1 %v4837_v13, %s4313_s20  ;;  %2388 = vrot.lane.b32.xlu0 %v4837_v13, %s4315_s22  ;;  %v831_v19 = vsel %vm568_vm5, %v808_v17, 0 }
 0x2c2   :  { %1111 = vmatpush.bf16.xpose.msrb.mxu1 %v1097_v15  ;;  %837 = vmatpush.bf16.xpose.msra.mxu3 %v831_v19  ;;  %v4990_v19 = vld [vmem:[%s6851_s6 + $0x20] sm:$0xff]  }
 0x2c3   :  { %3573 = vmatmul.msk.bf16.gmra.mxu1 %vm568_vm5, %v4645_v0 }
 0x2c8   :  { %v800_v21 = vpop.permute.xlu1 %799 }
 0x2ca   :  { %1112 = vmatpush.bf16.xpose.msrb.mxu1 %v1094_v9  ;;  %838 = vmatpush.bf16.xpose.msra.mxu3 %v828_v26 }
 0x2d0   :  { %v961_v3 = vpop.permute.xlu1 %960 }
 0x2d1   :  { %982 = vmatpush.bf16.msrb.mxu2 %v961_v3 }
 0x2d2   :  { %839 = vmatpush.bf16.xpose.msra.mxu3 %v825_v23 }
 0x2d3   :  { %3574 = vmatmul.msk.bf16.gmra.mxu1 %vm568_vm5, %v4680_v22 }
 0x2d5   :  { %983 = vmatpush.bf16.msrb.mxu2 %v4791_v11 }
 0x2d8   :  { %v1072_v47 = vpop.permute.xlu1 %1071 }
 0x2d9   :  { %984 = vmatpush.bf16.msrb.mxu2 %v957_v54 }
 0x2da   :  { %840 = vmatpush.bf16.xpose.msra.mxu3 %v822_v27 }
 0x2dd   :  { %985 = vmatpush.bf16.msrb.mxu2 %v4808_v25 }
 0x2e1   :  { %3588 = vmatmul.msk.bf16.vlgmr.msra.gmra.mxu3 %vm568_vm5, %v4761_v33 }
 0x2e3   :  { %3575 = vmatmul.msk.bf16.gmra.mxu1 %vm568_vm5, %v4724_v28 }
 0x2ec   :  { %v526_v60 = vpop.f32.mrf.mxu0 }
 0x2ed   :  { %v527_v11 = vadd.f32 %v526_v60, %v4631_v35  ;;  %v5006_v60 = vld [vmem:[%s6851_s6 + $0x10] sm:$0xff]  }
 0x2f1   :  { %3589 = vmatmul.msk.bf16.gmra.mxu3 %vm568_vm5, %v4781_v52 }
 0x2f3   :  { %3604 = vmatmul.msk.bf16.vlgmr.msrb.gmra.mxu1 %vm568_vm5, %v1066_v30  ;;  %v6856_v30 = vunpack.c.h.bf16 %v5006_v60 }
 0x2f4   :  { %v528_v32 = vpop.f32.mrf.mxu0 }
 0x2f5   :  { %v529_v34 = vadd.f32 %v528_v32, %v4631_v35 }
 0x2f7   :  { %v4887_v36 = vpack.c.bf16 %v529_v34, %v527_v11 }
 0x2f9   :  { %1850 = vrot.lane.b32.xlu0 %v4887_v36, %s4310_s17  ;;  %1858 = vrot.lane.b32.xlu2 %v4887_v36, %s4308_s15 }
 0x2fa   :  { %1620 = vrot.lane.b32.xlu1 %v4887_v36, %s4309_s16 }
 0x2fc   :  { %v531_v33 = vpop.f32.mrf.mxu0  ;;  %v4930_v51 = vpop.permute.xlu2 %1854 }
 0x2fd   :  { %v532_v38 = vadd.f32 %v531_v33, %v4631_v35  ;;  %v6859_v33 = vunpack.c.h.bf16 %v4990_v19 }
 0x301   :  { %3590 = vmatmul.msk.bf16.gmra.mxu3 %vm568_vm5, %v4800_v40  ;;  %2398 = vrot.lane.b32.xlu0 %v4887_v36, %s4314_s21 }
 0x302   :  { %2128 = vrot.lane.b32.xlu2 %v4887_v36, %s4313_s20  ;;  %2120 = vrot.lane.b32.xlu1 %v4887_v36, %s4316_s23 }
 0x303   :  { %3605 = vmatmul.msk.bf16.gmra.mxu1 %vm568_vm5, %v4805_v10  ;;  %v6858_v10 = vunpack.c.h.bf16 %v4937_v58 }
 0x304   :  { %v533_v52 = vpop.f32.mrf.mxu0  ;;  %v4940_v12 = vpop.permute.xlu2 %2394 }
 0x305   :  { %v534_v43 = vadd.f32 %v533_v52, %v4631_v35  ;;  %v4921_v35 = vpop.permute.xlu0 %1341 }
 0x306   :  { %6915 = vst [vmem:[#allocation6_spill] sm:$0xff] %v4921_v35  ;;  %v1875_v35 = vsel %vm568_vm5, %v4930_v51, 0 }
 0x307   :  { %v4907_v44 = vpack.c.bf16 %v534_v43, %v532_v38 }
 0x309   :  { %1860 = vrot.lane.b32.xlu0 %v4907_v44, %s4308_s15 }
 0x30a   :  { %2390 = vrot.lane.b32.xlu2 %v4887_v36, %s4315_s22  ;;  %2400 = vrot.lane.b32.xlu1 %v4907_v44, %s4314_s21 }
 0x30c   :  { %v1619_v42 = vpop.permute.xlu2 %1618 }
 0x30d   :  { %v4926_v48 = vpop.permute.xlu0 %1351 }
 0x311   :  { %3591 = vmatmul.msk.bf16.gmra.mxu3 %vm568_vm5, %v800_v21  ;;  %v6864_v21 = vunpack.c.l.bf16 %v4990_v19 }
 0x312   :  { %1622 = vrot.lane.b32.xlu2 %v4907_v44, %s4309_s16 }
 0x313   :  { %3606 = vmatmul.msk.bf16.gmra.mxu1 %vm568_vm5, %v1070_v14  ;;  %v4960_v57 = vpop.permute.xlu1 %1616 }
 0x314   :  { %v4967_v55 = vpop.permute.xlu2 %2118 }
 0x315   :  { %v4932_v50 = vpop.permute.xlu0 %1343 }
 0x316   :  { %6916 = vst [vmem:[#allocation7_spill] sm:$0xff] %v4932_v50 }
 0x31a   :  { %2130 = vrot.lane.b32.xlu2 %v4907_v44, %s4313_s20 }
 0x31b   :  { %v4969_v31 = vpop.permute.xlu1 %2124 }
 0x31d   :  { %v4953_v25 = vpop.permute.xlu0 %1846 }
 0x322   :  { %1852 = vrot.lane.b32.xlu2 %v4907_v44, %s4310_s17 }
 0x323   :  { %3607 = vmatmul.msk.bf16.gmra.mxu1 %vm568_vm5, %v1072_v47  ;;  %v4981_v29 = vpop.permute.xlu1 %2386 }
 0x325   :  { %v4964_v7 = vpop.permute.xlu0 %2116 }
 0x32a   :  { %2122 = vrot.lane.b32.xlu2 %v4907_v44, %s4316_s23 }
 0x32b   :  { %v4992_v9 = vpop.permute.xlu1 %1848 }
 0x32d   :  { %v4975_v24 = vpop.permute.xlu0 %1856 }
 0x330   :  { %v602_v40 = vpop.f32.mrf.mxu1 }
 0x331   :  { %v4973_v41 = vadd.f32 %v6860_v8, %v602_v40 }
 0x333   :  { %v623_v16 = vsel %vm622_vm6, %v4973_v41, -inf  ;;  %v5013_v34 = vpop.permute.xlu1 %2126 }
 0x335   :  { %v4983_v14 = vpop.permute.xlu0 %2396 }
 0x338   :  { %v604_v4 = vpop.f32.mrf.mxu1 }
 0x339   :  { %v4944_v45 = vadd.f32 %v6858_v10, %v604_v4 }
 0x33b   :  { %v626_v61 = vsel %vm622_vm6, %v4944_v45, -inf }
 0x33c   :  { %627 = vmax.xlane.f32.xlu1 %v626_v61 }
 0x33d   :  { %v4995_v26 = vpop.permute.xlu0 %2388 }
 0x340   :  { %v607_v54 = vpop.f32.mrf.mxu1 }
 0x341   :  { %v4958_v1 = vadd.f32 %v6857_v62, %v607_v54  ;;  %v5032_v54 = vld [vmem:[%s6851_s6 + $0x28] sm:$0xff]  }
 0x343   :  { %v629_v6 = vsel %vm622_vm6, %v4958_v1, -inf }
 0x344   :  { %630 = vmax.xlane.f32.xlu1 %v629_v6 }
 0x348   :  { %v609_v49 = vpop.f32.mrf.mxu1 }
 0x350   :  { %v612_v39 = vpop.f32.mrf.mxu1 }
 0x353   :  { %624 = vmax.xlane.f32.xlu2 %v623_v16  ;;  %v4979_v37 = vpop.permute.xlu2 %1858 }
 0x358   :  { %v614_v17 = vpop.f32.mrf.mxu1 }
 0x359   :  { %v5018_v52 = vadd.f32 %v6856_v30, %v614_v17  ;;  %v6861_v30 = vunpack.c.h.bf16 %v4949_v56 }
 0x35b   :  { %v638_v61 = vsel %vm622_vm6, %v5018_v52, -inf  ;;  %v5050_v62 = vadd.f32 %v6861_v30, %v609_v49  ;;  %v6867_v49 = vunpack.c.l.bf16 %v5006_v60 }
 0x35c   :  { %v4985_v15 = vpop.permute.xlu2 %2128 }
 0x360   :  { %v5011_v11 = vpop.f32.mrf.mxu1 }
 0x364   :  { %v4997_v3 = vpop.permute.xlu2 %2390  ;;  %v842_v23 = vpop.f32.mrf.mxu3 }
 0x365   :  { %v5001_v27 = vadd.f32 %v6864_v21, %v842_v23  ;;  %v6863_v23 = vunpack.c.l.bf16 %v5032_v54 }
 0x367   :  { %v862_v32 = vsel %vm622_vm6, %v5001_v27, -inf }
 0x368   :  { %863 = vmax.xlane.f32.xlu2 %v862_v32  ;;  %v619_v16 = vpop.f32.mrf.mxu1 }
 0x36b   :  { %v5020_v43 = vpop.permute.xlu0 %1850 }
 0x36c   :  { %v1623_v38 = vpop.permute.xlu2 %1622  ;;  %v844_v40 = vpop.f32.mrf.mxu3 }
 0x36d   :  { %v1646_v47 = vsel %vm568_vm5, %v1623_v38, 0  ;;  %v5025_v4 = vadd.f32 %v6859_v33, %v844_v40  ;;  %v1621_v17 = vpop.permute.xlu1 %1620 }
 0x36e   :  { %1652 = vmatpush.bf16.xpose.msra.mxu1 %v1646_v47  ;;  %v1643_v47 = vsel %vm568_vm5, %v1621_v17, 0 }
 0x36f   :  { %v865_v6 = vsel %vm622_vm6, %v5025_v4, -inf }
 0x370   :  { %639 = vmax.xlane.f32.xlu2 %v638_v61  ;;  %866 = vmax.xlane.f32.xlu0 %v865_v6  ;;  %v6862_v6 = vunpack.c.h.bf16 %v5032_v54  ;;  %v5052_v10 = vpop.f32.mrf.mxu1 }
 0x373   :  { %v5037_v32 = vpop.permute.xlu0 %2398 }
 0x374   :  { %v847_v38 = vpop.f32.mrf.mxu3 }
 0x375   :  { %v5042_v40 = vadd.f32 %v6863_v23, %v847_v38  ;;  %v1640_v38 = vsel %vm568_vm5, %v1619_v42, 0  ;;  %v632_v42 = vsel %vm622_vm6, %v5050_v62, -inf  ;;  %v1637_v23 = vsel %vm568_vm5, %v4960_v57, 0  ;;  %v5095_v50 = vpop.permute.xlu1 %2120 }
 0x376   :  { %1653 = vmatpush.bf16.xpose.msra.mxu1 %v1643_v47 }
 0x377   :  { %v868_v61 = vsel %vm622_vm6, %v5042_v40, -inf }
 0x378   :  { %869 = vmax.xlane.f32.xlu0 %v868_v61  ;;  %v5063_v61 = vld [vmem:[%s6851_s6 + $0x30] sm:$0xff]   ;;  %v1116_v21 = vpop.f32.mrf.mxu1 }
 0x37b   :  { %v1861_v17 = vpop.permute.xlu0 %1860 }
 0x37c   :  { %v849_v33 = vpop.f32.mrf.mxu3  ;;  %v1884_v47 = vsel %vm568_vm5, %v1861_v17, 0  ;;  %v2131_v17 = vpop.permute.xlu2 %2130 }
 0x37d   :  { %v5058_v8 = vadd.f32 %v6862_v6, %v849_v33  ;;  %1890 = vmatpush.bf16.xpose.msrb.mxu0 %v1884_v47  ;;  %v6869_v33 = vunpack.c.l.bf16 %v5063_v61  ;;  %v5078_v47 = vld [vmem:[%s6851_s6 + $0x18] sm:$0xff]  }
 0x37e   :  { %1654 = vmatpush.bf16.xpose.msra.mxu1 %v1640_v38  ;;  %v5073_v38 = vadd.f32 %v6867_v49, %v612_v39  ;;  %v6868_v39 = vunpack.c.l.bf16 %v5078_v47  ;;  %v6870_v49 = vunpack.c.h.bf16 %v5078_v47 }
 0x37f   :  { %v871_v30 = vsel %vm622_vm6, %v5058_v8, -inf }
 0x380   :  { %872 = vmax.xlane.f32.xlu1 %v871_v30  ;;  %633 = vmax.xlane.f32.xlu0 %v632_v42  ;;  %v1881_v30 = vsel %vm568_vm5, %v4979_v37, 0  ;;  %v2154_v42 = vsel %vm568_vm5, %v2131_v17, 0  ;;  %v635_v37 = vsel %vm622_vm6, %v5073_v38, -inf  ;;  %v5105_v17 = vadd.f32 %v6870_v49, %v619_v16  ;;  %v5120_v16 = vld [vmem:[%s6851_s6 + $0x40] sm:$0xff]  }
 0x384   :  { %v852_v6 = vpop.f32.mrf.mxu3 }
 0x385   :  { %v5087_v20 = vadd.f32 %v6869_v33, %v852_v6  ;;  %1891 = vmatpush.bf16.xpose.msrb.mxu0 %v1881_v30  ;;  %v6871_v6 = vunpack.c.h.bf16 %v5063_v61  ;;  %v2401_v33 = vpop.permute.xlu1 %2400 }
 0x386   :  { %1655 = vmatpush.bf16.xpose.msra.mxu1 %v1637_v23  ;;  %v5101_v23 = vadd.f32 %v6868_v39, %v5011_v11  ;;  %v2151_v11 = vsel %vm568_vm5, %v4985_v15, 0  ;;  %v1119_v39 = vpop.f32.mrf.mxu1  ;;  %v644_v15 = vsel %vm622_vm6, %v5105_v17, -inf  ;;  %v2424_v46 = vsel %vm568_vm5, %v2401_v33, 0 }
 0x387   :  { %v874_v57 = vsel %vm622_vm6, %v5087_v20, -inf }
 0x388   :  { %875 = vmax.xlane.f32.xlu1 %v874_v57  ;;  %636 = vmax.xlane.f32.xlu0 %v635_v37  ;;  %v5125_v37 = vld [vmem:[%s6851_s6 + $0x38] sm:$0xff]  }
 0x38c   :  { %v854_v30 = vpop.f32.mrf.mxu3 }
 0x38d   :  { %3628 = vmatmul.msk.bf16.vlgmr.msra.gmra.mxu1 %vm568_vm5, %v4814_v2  ;;  %v5113_v57 = vadd.f32 %v6871_v6, %v854_v30  ;;  %v641_v30 = vsel %vm622_vm6, %v5101_v23, -inf }
 0x38e   :  { %2160 = vmatpush.bf16.xpose.msrb.mxu1 %v2154_v42  ;;  %v1878_v42 = vsel %vm568_vm5, %v4975_v24, 0  ;;  %v6877_v24 = vunpack.c.h.bf16 %v5120_v16 }
 0x38f   :  { %1892 = vmatpush.bf16.xpose.msrb.mxu0 %v1878_v42  ;;  %v877_v42 = vsel %vm622_vm6, %v5113_v57, -inf }
 0x390   :  { %642 = vmax.xlane.f32.xlu1 %v641_v30  ;;  %645 = vmax.xlane.f32.xlu0 %v644_v15  ;;  %v5137_v49 = vadd.f32 %v6877_v24, %v1116_v21  ;;  %v2148_v30 = vsel %vm568_vm5, %v5013_v34, 0  ;;  %v5151_v21 = vld [vmem:[%s6851_s6 + $0x48] sm:$0xff]   ;;  %v6880_v34 = vunpack.c.h.bf16 %v5125_v37 }
 0x391   :  { %878 = vmax.xlane.f32.xlu2 %v877_v42 }
 0x392   :  { %v1137_v33 = vsel %vm622_vm6, %v5137_v49, -inf }
 0x394   :  { %v857_v6 = vpop.f32.mrf.mxu3 }
 0x396   :  { %2161 = vmatpush.bf16.xpose.msrb.mxu1 %v2151_v11  ;;  %v6878_v11 = vunpack.c.l.bf16 %v5125_v37 }
 0x397   :  { %1893 = vmatpush.bf16.xpose.msrb.mxu0 %v1875_v35  ;;  %v1121_v35 = vpop.f32.mrf.mxu1 }
 0x398   :  { %v5144_v53 = vadd.f32 %v6878_v11, %v857_v6  ;;  %v6872_v6 = vunpack.c.h.bf16 %v5151_v21  ;;  %1138 = vmax.xlane.f32.xlu1 %v1137_v33  ;;  %v6873_v33 = vunpack.c.l.bf16 %v5120_v16 }
 0x39a   :  { %v880_v51 = vsel %vm622_vm6, %v5144_v53, -inf }
 0x39b   :  { %881 = vmax.xlane.f32.xlu2 %v880_v51  ;;  %v2421_v51 = vsel %vm568_vm5, %v5037_v32, 0  ;;  %v6876_v32 = vunpack.c.l.bf16 %v5151_v21 }
 0x39c   :  { %v859_v15 = vpop.f32.mrf.mxu3 }
 0x39d   :  { %3629 = vmatmul.msk.bf16.gmra.mxu1 %vm568_vm5, %v4837_v13  ;;  %v5169_v42 = vadd.f32 %v6880_v34, %v859_v15  ;;  %v5183_v15 = vadd.f32 %v6873_v33, %v5052_v10 }
 0x39e   :  { %2162 = vmatpush.bf16.xpose.msrb.mxu1 %v2148_v30  ;;  %3644 = vmatmul.msk.bf16.vlgmr.msrb.gmra.mxu0 %vm568_vm5, %v4953_v25  ;;  %v2145_v30 = vsel %vm568_vm5, %v4969_v31, 0  ;;  %v2418_v31 = vsel %vm568_vm5, %v4983_v14, 0  ;;  %v2415_v14 = vsel %vm568_vm5, %v4940_v12, 0 }
 0x39f   :  { %2430 = vmatpush.bf16.xpose.msra.mxu0 %v2424_v46  ;;  %v5161_v46 = vadd.f32 %v6872_v6, %v1121_v35  ;;  %v883_v35 = vsel %vm622_vm6, %v5169_v42, -inf }
 0x3a0   :  { %884 = vmax.xlane.f32.xlu0 %v883_v35 }
 0x3a1   :  { %v1143_v25 = vsel %vm622_vm6, %v5161_v46, -inf }
 0x3a3   :  { %1144 = vmax.xlane.f32.xlu2 %v1143_v25 }
 0x3a6   :  { %2163 = vmatpush.bf16.xpose.msrb.mxu1 %v2145_v30  ;;  %v1134_v30 = vsel %vm622_vm6, %v5183_v15, -inf }
 0x3a7   :  { %2431 = vmatpush.bf16.xpose.msra.mxu0 %v2421_v51  ;;  %v5192_v51 = vadd.f32 %v6876_v32, %v1119_v39  ;;  %v1853_v39 = vpop.permute.xlu2 %1852 }
 0x3a8   :  { %1135 = vmax.xlane.f32.xlu0 %v1134_v30  ;;  %v5206_v30 = vld [vmem:[%s6851_s6 + $0x50] sm:$0xff]  }
 0x3a9   :  { %v1140_v25 = vsel %vm622_vm6, %v5192_v51, -inf  ;;  %6917 = vst [vmem:[#allocation8_spill] sm:$0xff] %v5206_v30  ;;  %v6874_v6 = vunpack.c.l.bf16 %v5206_v30 }
 0x3ad   :  { %3630 = vmatmul.msk.bf16.gmra.mxu1 %vm568_vm5, %v4887_v36 }
 0x3ae   :  { %3645 = vmatmul.msk.bf16.gmra.mxu0 %vm568_vm5, %v4992_v9 }
 0x3af   :  { %2432 = vmatpush.bf16.xpose.msra.mxu0 %v2418_v31  ;;  %v628_v10 = vpop.xlane.xlu1 %627 }
 0x3b0   :  { %v648_v35 = vsub.f32 %v4944_v45, %v628_v10  ;;  %1141 = vmax.xlane.f32.xlu0 %v1140_v25  ;;  %v1124_v45 = vpop.f32.mrf.mxu1  ;;  %v2123_v10 = vpop.permute.xlu2 %2122 }
 0x3b2   :  { %v657_v31 = vmul.f32 1.442695, %v648_v35 }
 0x3b4   :  { %3969 = vpow2.f32 %v657_v31 }
 0x3b7   :  { %2433 = vmatpush.bf16.xpose.msra.mxu0 %v2415_v14  ;;  %v5219_v14 = vadd.f32 %v6874_v6, %v1124_v45 }
 0x3b9   :  { %6918 = vst [vmem:[#allocation9_spill] sm:$0xff] %v5219_v14  ;;  %v1146_v35 = vsel %vm622_vm6, %v5219_v14, -inf }
 0x3ba   :  { %v5208_v9 = vpop.eup %3969 }
 0x3bb   :  { %v674_v12 = vsel %vm622_vm6, %v5208_v9, 0.0 }
 0x3bc   :  { %675 = vadd.xlane.f32.xlu0 %v674_v12 }
 0x3bd   :  { %3631 = vmatmul.msk.bf16.gmra.mxu1 %vm568_vm5, %v4907_v44 }
 0x3be   :  { %3646 = vmatmul.msk.bf16.gmra.mxu0 %vm568_vm5, %v5020_v43 }
 0x3c4   :  { %1147 = vmax.xlane.f32.xlu0 %v1146_v35  ;;  %v1126_v35 = vpop.f32.mrf.mxu1 }
 0x3c6   :  { %v625_v25 = vpop.xlane.xlu2 %624 }
 0x3c7   :  { %v647_v31 = vsub.f32 %v4973_v41, %v625_v25  ;;  %v6875_v25 = vunpack.c.h.bf16 %v5206_v30 }
 0x3c9   :  { %v655_v33 = vmul.f32 1.442695, %v647_v31 }
 0x3cb   :  { %3971 = vpow2.f32 %v655_v33 }
 0x3cd   :  { %3660 = vmatmul.msk.bf16.vlgmr.msrb.gmra.mxu1 %vm568_vm5, %v4964_v7 }
 0x3ce   :  { %3647 = vmatmul.msk.bf16.gmra.mxu0 %vm568_vm5, %v1853_v39 }
 0x3d1   :  { %v5227_v43 = vpop.eup %3971 }
 0x3d2   :  { %v671_v12 = vsel %vm622_vm6, %v5227_v43, 0.0 }
 0x3d3   :  { %672 = vadd.xlane.f32.xlu1 %v671_v12 }
 0x3db   :  { %v864_v45 = vpop.xlane.xlu2 %863 }
 0x3dc   :  { %v886_v6 = vsub.f32 %v5001_v27, %v864_v45 }
 0x3dd   :  { %3661 = vmatmul.msk.bf16.gmra.mxu1 %vm568_vm5, %v4967_v55  ;;  %v5244_v55 = vadd.f32 %v6875_v25, %v1126_v35 }
 0x3de   :  { %3676 = vmatmul.msk.bf16.vlgmr.msra.gmra.mxu0 %vm568_vm5, %v4981_v29  ;;  %v894_v41 = vmul.f32 1.442695, %v886_v6  ;;  %v5249_v29 = vld [vmem:[%s6851_s6 + $0x58] sm:$0xff]  }
 0x3df   :  { %6919 = vst [vmem:[#allocation10_spill] sm:$0xff] %v5249_v29  ;;  %v6879_v45 = vunpack.c.l.bf16 %v5249_v29 }
 0x3e0   :  { %3973 = vpow2.f32 %v894_v41  ;;  %v1149_v41 = vsel %vm622_vm6, %v5244_v55, -inf }
 0x3e3   :  { %v867_v33 = vpop.xlane.xlu0 %866 }
 0x3e4   :  { %v887_v7 = vsub.f32 %v5025_v4, %v867_v33  ;;  %v631_v4 = vpop.xlane.xlu1 %630  ;;  %v1129_v33 = vpop.f32.mrf.mxu1 }
 0x3e5   :  { %v5266_v35 = vadd.f32 %v6879_v45, %v1129_v33 }
 0x3e6   :  { %v5237_v39 = vpop.eup %3973  ;;  %v896_v31 = vmul.f32 1.442695, %v887_v7 }
 0x3e7   :  { %v910_v27 = vsel %vm622_vm6, %v5237_v39, 0.0  ;;  %6920 = vst [vmem:[#allocation11_spill] sm:$0xff] %v5266_v35 }
 0x3e8   :  { %911 = vadd.xlane.f32.xlu2 %v910_v27  ;;  %3975 = vpow2.f32 %v896_v31 }
 0x3eb   :  { %v870_v6 = vpop.xlane.xlu0 %869 }
 0x3ec   :  { %2392 = vrot.lane.b32.xlu1 %v4907_v44, %s4315_s22  ;;  %s4317_s22 = smov 48  }
 0x3ed   :  { %3662 = vmatmul.msk.bf16.gmra.mxu1 %vm568_vm5, %v5095_v50  ;;  %v640_v50 = vpop.xlane.xlu2 %639 }
 0x3ee   :  { %3677 = vmatmul.msk.bf16.gmra.mxu0 %vm568_vm5, %v4995_v26  ;;  %v5257_v12 = vpop.eup %3975  ;;  %v652_v32 = vsub.f32 %v5018_v52, %v640_v50 }
 0x3ef   :  { %v913_v7 = vsel %vm622_vm6, %v5257_v12, 0.0 }
 0x3f0   :  { %1150 = vmax.xlane.f32.xlu2 %v1149_v41  ;;  %914 = vadd.xlane.f32.xlu0 %v913_v7  ;;  %v1152_v41 = vsel %vm622_vm6, %v5266_v35, -inf  ;;  %v665_v7 = vmul.f32 1.442695, %v652_v32 }
 0x3f3   :  { %v873_v31 = vpop.xlane.xlu1 %872  ;;  %v634_v26 = vpop.xlane.xlu0 %633 }
 0x3f4   :  { %v889_v27 = vsub.f32 %v5058_v8, %v873_v31  ;;  %v650_v25 = vsub.f32 %v5050_v62, %v634_v26  ;;  %v1131_v26 = vpop.f32.mrf.mxu1 }
 0x3f6   :  { %v900_v24 = vmul.f32 1.442695, %v889_v27  ;;  %v661_v11 = vmul.f32 1.442695, %v650_v25 }
 0x3f8   :  { %1153 = vmax.xlane.f32.xlu2 %v1152_v41  ;;  %3977 = vpow2.f32 %v900_v24 }
 0x3f9   :  { %3979 = vpow2.f32 %v661_v11  ;;  %v649_v11 = vsub.f32 %v4958_v1, %v631_v4 }
 0x3fa   :  { %3981 = vpow2.f32 %v665_v7 }
 0x3fb   :  { %v876_v33 = vpop.xlane.xlu1 %875  ;;  %v637_v45 = vpop.xlane.xlu0 %636  ;;  %v659_v50 = vmul.f32 1.442695, %v649_v11 }
 0x3fc   :  { %v651_v34 = vsub.f32 %v5073_v38, %v637_v45  ;;  %v890_v25 = vsub.f32 %v5087_v20, %v876_v33  ;;  %v6881_v20 = vunpack.c.h.bf16 %v5249_v29 }
 0x3fd   :  { %3663 = vmatmul.msk.bf16.gmra.mxu1 %vm568_vm5, %v2123_v10 }
 0x3fe   :  { %3678 = vmatmul.msk.bf16.gmra.mxu0 %vm568_vm5, %v4997_v3  ;;  %v5277_v62 = vpop.eup %3977  ;;  %v663_v8 = vmul.f32 1.442695, %v651_v34  ;;  %v902_v3 = vmul.f32 1.442695, %v890_v25  ;;  %v5299_v27 = vadd.f32 %v6881_v20, %v1131_v26 }
 0x3ff   :  { %v5279_v52 = vpop.eup %3979  ;;  %v919_v24 = vsel %vm622_vm6, %v5277_v62, 0.0 }
 0x400   :  { %920 = vadd.xlane.f32.xlu0 %v919_v24  ;;  %v680_v38 = vsel %vm622_vm6, %v5279_v52, 0.0  ;;  %3983 = vpow2.f32 %v663_v8  ;;  %v5287_v10 = vpop.eup %3981  ;;  %6921 = vst [vmem:[#allocation12_spill] sm:$0xff] %v5299_v27  ;;  %v1155_v33 = vsel %vm622_vm6, %v5299_v27, -inf }
 0x401   :  { %681 = vadd.xlane.f32.xlu2 %v680_v38  ;;  %3985 = vpow2.f32 %v902_v3  ;;  %v686_v31 = vsel %vm622_vm6, %v5287_v10, 0.0 }
 0x402   :  { %3987 = vpow2.f32 %v659_v50 }
 0x403   :  { %v643_v32 = vpop.xlane.xlu1 %642 }
 0x404   :  { %v653_v34 = vsub.f32 %v5101_v23, %v643_v32  ;;  %v888_v23 = vsub.f32 %v5042_v40, %v870_v6  ;;  %v879_v8 = vpop.xlane.xlu2 %878  ;;  %v646_v32 = vpop.xlane.xlu0 %645 }
 0x405   :  { %v891_v38 = vsub.f32 %v5113_v57, %v879_v8  ;;  %v654_v50 = vsub.f32 %v5105_v17, %v646_v32 }
 0x406   :  { %v5290_v45 = vpop.eup %3983  ;;  %v667_v4 = vmul.f32 1.442695, %v653_v34  ;;  %v898_v7 = vmul.f32 1.442695, %v888_v23 }
 0x407   :  { %v683_v1 = vsel %vm622_vm6, %v5290_v45, 0.0  ;;  %v5302_v41 = vpop.eup %3985  ;;  %v904_v6 = vmul.f32 1.442695, %v891_v38 }
 0x408   :  { %687 = vadd.xlane.f32.xlu0 %v686_v31  ;;  %3989 = vpow2.f32 %v667_v4  ;;  %v922_v25 = vsel %vm622_vm6, %v5302_v41, 0.0  ;;  %v5308_v24 = vpop.eup %3987  ;;  %v669_v31 = vmul.f32 1.442695, %v654_v50 }
 0x409   :  { %684 = vadd.xlane.f32.xlu2 %v683_v1  ;;  %3991 = vpow2.f32 %v898_v7  ;;  %v677_v40 = vsel %vm622_vm6, %v5308_v24, 0.0 }
 0x40a   :  { %3993 = vpow2.f32 %v904_v6 }
 0x40b   :  { %3995 = vpow2.f32 %v669_v31  ;;  %v5342_v38 = vpop.xlane.xlu1 %1138 }
 0x40e   :  { %v5311_v11 = vpop.eup %3989 }
 0x40f   :  { %v689_v3 = vsel %vm622_vm6, %v5311_v11, 0.0  ;;  %v5317_v34 = vpop.eup %3991 }
 0x410   :  { %1156 = vmax.xlane.f32.xlu0 %v1155_v33  ;;  %v916_v57 = vsel %vm622_vm6, %v5317_v34, 0.0  ;;  %v5322_v26 = vpop.eup %3993  ;;  %v1657_v33 = vpop.f32.mrf.mxu1 }
 0x411   :  { %923 = vadd.xlane.f32.xlu2 %v922_v25  ;;  %v925_v1 = vsel %vm622_vm6, %v5322_v26, 0.0  ;;  %v5326_v23 = vpop.eup %3995  ;;  %v882_v25 = vpop.xlane.xlu2 %881 }
 0x412   :  { %v692_v17 = vsel %vm622_vm6, %v5326_v23, 0.0 }
 0x413   :  { %v885_v4 = vpop.xlane.xlu0 %884 }
 0x416   :  { %678 = vadd.xlane.f32.xlu1 %v677_v40 }
 0x418   :  { %690 = vadd.xlane.f32.xlu0 %v689_v3  ;;  %v5345_v3 = vpop.f32.mrf.mxu1 }
 0x41b   :  { %v5334_v7 = vpop.xlane.xlu0 %1135  ;;  %v1895_v40 = vpop.f32.mrf.mxu0 }
 0x41e   :  { %917 = vadd.xlane.f32.xlu1 %v916_v57 }
 0x423   :  { %v5338_v8 = vpop.xlane.xlu0 %1141  ;;  %v1897_v31 = vpop.f32.mrf.mxu0 }
 0x426   :  { %926 = vadd.xlane.f32.xlu1 %v925_v1 }
 0x429   :  { %1232 = vrot.lane.b32.xlu2 %v4724_v28, %s4317_s22 }
 0x42c   :  { %1504 = vrot.lane.b32.xlu0 %v4724_v28, %s4318_s26  ;;  %v892_v28 = vsub.f32 %v5144_v53, %v882_v25 }
 0x42e   :  { %693 = vadd.xlane.f32.xlu1 %v692_v17  ;;  %v906_v32 = vmul.f32 1.442695, %v892_v28  ;;  %v5349_v17 = vpop.f32.mrf.mxu1  ;;  %v1375_v28 = vsel %vm568_vm5, %v4926_v48, 0 }
 0x42f   :  { %v676_v6 = vpop.xlane.xlu0 %675 }
 0x430   :  { %3997 = vrcp.f32 %v676_v6 }
 0x434   :  { %1228 = vrot.lane.b32.xlu0 %v4645_v0, %s4317_s22 }
 0x436   :  { %v3998_v57 = vpop.eup %3997  ;;  %v1664_v30 = vpop.f32.mrf.mxu1 }
 0x437   :  { %v704_v53 = vmul.f32 %v3998_v57, %v5208_v9  ;;  %v1372_v9 = vsel %vm568_vm5, %v4816_v5, 0 }
 0x43c   :  { %1498 = vrot.lane.b32.xlu0 %v4635_v59, %s4318_s26 }
 0x43e   :  { %v1667_v48 = vpop.f32.mrf.mxu1 }
 0x446   :  { %v673_v50 = vpop.xlane.xlu1 %672  ;;  %v5386_v35 = vpop.f32.mrf.mxu1 }
 0x447   :  { %3999 = vrcp.f32 %v673_v50  ;;  %1230 = vrot.lane.b32.xlu1 %v4680_v22, %s4317_s22  ;;  %v1900_v50 = vpop.f32.mrf.mxu0 }
 0x448   :  { %4001 = vpow2.f32 %v906_v32  ;;  %v5360_v32 = vpop.xlane.xlu2 %1144 }
 0x44d   :  { %v4000_v1 = vpop.eup %3999 }
 0x44e   :  { %v703_v20 = vmul.f32 %v4000_v1, %v5227_v43  ;;  %v5353_v25 = vpop.eup %4001 }
 0x44f   :  { %v928_v6 = vsel %vm622_vm6, %v5353_v25, 0.0  ;;  %v5366_v57 = vpop.f32.mrf.mxu0 }
 0x450   :  { %v711_v29 = vpack.c.bf16 %v704_v53, %v703_v20  ;;  %v1369_v53 = vsel %vm568_vm5, %v4873_v18, 0 }
 0x452   :  { %3576 = vmatmul.msk.bf16.vlgmr.msra.gmra.mxu2 %vm622_vm6, %v711_v29  ;;  %929 = vadd.xlane.f32.xlu2 %v928_v6  ;;  %v6922_v29 = vunpack.c.l.bf16 %v4990_v19  ;;  %v893_v6 = vsub.f32 %v5169_v42, %v885_v4  ;;  %v6925_v42 = vunpack.c.l.bf16 %v4937_v58 }
 0x453   :  { %1381 = vmatpush.bf16.xpose.msra.mxu2 %v1375_v28 }
 0x454   :  { %v5371_v1 = vadd.f32 %v6922_v29, %v1895_v40  ;;  %v1366_v40 = vsel %vm568_vm5, %v4880_v63, 0  ;;  %v908_v29 = vmul.f32 1.442695, %v893_v6  ;;  %v5394_v4 = vadd.f32 %v6925_v42, %v1657_v33  ;;  %v1672_v33 = vpop.f32.mrf.mxu1 }
 0x456   :  { %v1915_v5 = vsel %vm622_vm6, %v5371_v1, -inf  ;;  %6926 = vst [vmem:[#allocation14_spill] sm:$0xff] %v5394_v4  ;;  %4003 = vpow2.f32 %v908_v29  ;;  %v1677_v63 = vsel %vm622_vm6, %v5394_v4, -inf  ;;  %v5410_v29 = vpop.xlane.xlu0 %1147 }
 0x457   :  { %6929 = vst [vmem:[#allocation16_spill] sm:$0xff] %v5410_v29 }
 0x45b   :  { %1382 = vmatpush.bf16.xpose.msra.mxu2 %v1372_v9  ;;  %v5364_v43 = vpop.xlane.xlu2 %911  ;;  %v1905_v9 = vpop.f32.mrf.mxu0 }
 0x45c   :  { %v5406_v6 = vpop.eup %4003 }
 0x45d   :  { %v931_v42 = vsel %vm622_vm6, %v5406_v6, 0.0 }
 0x45e   :  { %v2393_v20 = vpop.permute.xlu1 %2392 }
 0x45f   :  { %3679 = vmatmul.msk.bf16.gmra.mxu0 %vm568_vm5, %v2393_v20  ;;  %v6923_v20 = vunpack.c.l.bf16 %v5032_v54 }
 0x461   :  { %v5382_v27 = vadd.f32 %v6923_v20, %v1900_v50 }
 0x463   :  { %1383 = vmatpush.bf16.xpose.msra.mxu2 %v1369_v53  ;;  %v5375_v28 = vpop.xlane.xlu2 %1150  ;;  %v1921_v50 = vsel %vm622_vm6, %v5382_v27, -inf  ;;  %v6927_v53 = vunpack.c.l.bf16 %v5006_v60  ;;  %v5426_v14 = vpop.xlane.xlu0 %914 }
 0x466   :  { %1916 = vmax.xlane.f32.xlu0 %v1915_v5  ;;  %v5402_v5 = vadd.f32 %v6927_v53, %v1667_v48  ;;  %v6930_v48 = vunpack.c.h.bf16 %v5063_v61 }
 0x468   :  { %6928 = vst [vmem:[#allocation15_spill] sm:$0xff] %v5402_v5 }
 0x46a   :  { %1502 = vrot.lane.b32.xlu2 %v4680_v22, %s4318_s26  ;;  %v1907_v22 = vpop.f32.mrf.mxu0 }
 0x46b   :  { %1384 = vmatpush.bf16.xpose.msra.mxu2 %v1366_v40  ;;  %v5390_v18 = vpop.xlane.xlu2 %1153  ;;  %v1689_v40 = vsel %vm622_vm6, %v5402_v5, -inf }
 0x46c   :  { %6924 = vst [vmem:[#allocation13_spill] sm:$0xff] %v5390_v18  ;;  %v1674_v18 = vpop.f32.mrf.mxu1 }
 0x46e   :  { %1922 = vmax.xlane.f32.xlu0 %v1921_v50  ;;  %v5416_v50 = vadd.f32 %v6930_v48, %v1907_v22 }
 0x470   :  { %6931 = vst [vmem:[#allocation17_spill] sm:$0xff] %v5416_v50 }
 0x471   :  { %1678 = vmax.xlane.f32.xlu1 %v1677_v63 }
 0x472   :  { %1500 = vrot.lane.b32.xlu2 %v4645_v0, %s4318_s26  ;;  %v6932_v0 = vunpack.c.h.bf16 %v4990_v19  ;;  %v1910_v53 = vpop.f32.mrf.mxu0  ;;  %v6936_v19 = vunpack.c.h.bf16 %v4949_v56 }
 0x473   :  { %v5442_v29 = vpop.xlane.xlu0 %920 }
 0x474   :  { %v682_v20 = vpop.xlane.xlu2 %681  ;;  %v5422_v63 = vadd.f32 %v6932_v0, %v1897_v31  ;;  %v5436_v31 = vadd.f32 %v6936_v19, %v1664_v30  ;;  %v6939_v30 = vunpack.c.l.bf16 %v5063_v61 }
 0x475   :  { %4005 = vrcp.f32 %v682_v20 }
 0x476   :  { %1690 = vmax.xlane.f32.xlu0 %v1689_v40  ;;  %6933 = vst [vmem:[#allocation18_spill] sm:$0xff] %v5422_v63  ;;  %v1930_v40 = vsel %vm622_vm6, %v5416_v50, -inf  ;;  %v1918_v22 = vsel %vm622_vm6, %v5422_v63, -inf  ;;  %v5452_v19 = vadd.f32 %v6939_v30, %v1905_v9 }
 0x477   :  { %6937 = vst [vmem:[#allocation20_spill] sm:$0xff] %v5436_v31 }
 0x479   :  { %932 = vadd.xlane.f32.xlu1 %v931_v42  ;;  %v6934_v42 = vunpack.c.h.bf16 %v5078_v47 }
 0x47a   :  { %1226 = vrot.lane.b32.xlu2 %v4635_v59, %s4317_s22  ;;  %v1912_v50 = vpop.f32.mrf.mxu0 }
 0x47b   :  { %v5432_v59 = vadd.f32 %v6934_v42, %v1674_v18  ;;  %v6938_v18 = vunpack.c.h.bf16 %v5125_v37  ;;  %v4006_v63 = vpop.eup %4005 }
 0x47c   :  { %v685_v5 = vpop.xlane.xlu2 %684  ;;  %v706_v61 = vmul.f32 %v4006_v63, %v5279_v52  ;;  %v6941_v52 = vunpack.c.l.bf16 %v5125_v37 }
 0x47d   :  { %6935 = vst [vmem:[#allocation19_spill] sm:$0xff] %v5432_v59  ;;  %v1698_v0 = vsel %vm622_vm6, %v5432_v59, -inf  ;;  %v5448_v42 = vadd.f32 %v6938_v18, %v1912_v50 }
 0x47e   :  { %1931 = vmax.xlane.f32.xlu0 %v1930_v40  ;;  %v1686_v40 = vsel %vm622_vm6, %v5436_v31, -inf  ;;  %v688_v31 = vpop.xlane.xlu0 %687  ;;  %v5475_v63 = vadd.f32 %v6941_v52, %v1910_v53 }
 0x47f   :  { %v1936_v20 = vsel %vm622_vm6, %v5448_v42, -inf }
 0x481   :  { %1919 = vmax.xlane.f32.xlu1 %v1918_v22 }
 0x484   :  { %v5438_v48 = vpop.xlane.xlu2 %923 }
 0x486   :  { %1699 = vmax.xlane.f32.xlu0 %v1698_v0 }
 0x489   :  { %v679_v22 = vpop.xlane.xlu1 %678  ;;  %1687 = vmax.xlane.f32.xlu1 %v1686_v40  ;;  %v1927_v40 = vsel %vm622_vm6, %v5452_v19, -inf }
 0x48a   :  { %4007 = vrcp.f32 %v679_v22  ;;  %v6940_v22 = vunpack.c.l.bf16 %v5078_v47  ;;  %v6942_v47 = vunpack.c.h.bf16 %v4937_v58 }
 0x48b   :  { %4009 = vrcp.f32 %v688_v31 }
 0x48c   :  { %v1233_v59 = vpop.permute.xlu2 %1232  ;;  %4011 = vrcp.f32 %v685_v5 }
 0x48d   :  { %1254 = vmatpush.bf16.msrb.mxu3 %v1233_v59  ;;  %v5464_v59 = vadd.f32 %v6940_v22, %v1672_v33  ;;  %v5480_v33 = vadd.f32 %v6942_v47, %v5345_v3  ;;  %v6944_v22 = vunpack.c.h.bf16 %v5032_v54  ;;  %v6945_v54 = vunpack.c.h.bf16 %v5006_v60 }
 0x48e   :  { %1937 = vmax.xlane.f32.xlu0 %v1936_v20 }
 0x48f   :  { %v1695_v18 = vsel %vm622_vm6, %v5464_v59, -inf  ;;  %v1680_v37 = vsel %vm622_vm6, %v5480_v33, -inf }
 0x490   :  { %v4008_v0 = vpop.eup %4007 }
 0x491   :  { %v5458_v4 = vpop.xlane.xlu1 %917  ;;  %1928 = vmax.xlane.f32.xlu1 %v1927_v40  ;;  %v705_v50 = vmul.f32 %v4008_v0, %v5308_v24  ;;  %v4010_v20 = vpop.eup %4009  ;;  %v1933_v0 = vsel %vm622_vm6, %v5475_v63, -inf }
 0x492   :  { %v5471_v40 = vpop.xlane.xlu0 %1156  ;;  %v4012_v24 = vpop.eup %4011  ;;  %v708_v31 = vmul.f32 %v4010_v20, %v5287_v10  ;;  %v6943_v10 = vunpack.c.l.bf16 %v4949_v56 }
 0x493   :  { %v712_v9 = vpack.c.bf16 %v706_v61, %v705_v50  ;;  %v707_v5 = vmul.f32 %v4012_v24, %v5290_v45  ;;  %v5505_v20 = vpop.f32.mrf.mxu0 }
 0x494   :  { %v5494_v45 = vadd.f32 %v6943_v10, %v5349_v17 }
 0x495   :  { %3577 = vmatmul.msk.bf16.gmra.mxu2 %vm622_vm6, %v712_v9  ;;  %v713_v53 = vpack.c.bf16 %v708_v31, %v707_v5 }
 0x496   :  { %v1683_v3 = vsel %vm622_vm6, %v5494_v45, -inf }
 0x499   :  { %v5469_v30 = vpop.xlane.xlu1 %926  ;;  %1696 = vmax.xlane.f32.xlu1 %v1695_v18  ;;  %v5503_v18 = vadd.f32 %v6944_v22, %v5366_v57  ;;  %v5516_v57 = vadd.f32 %v6945_v54, %v5386_v35 }
 0x49a   :  { %v691_v58 = vpop.xlane.xlu0 %690 }
 0x49b   :  { %v1924_v52 = vsel %vm622_vm6, %v5503_v18, -inf  ;;  %v1692_v5 = vsel %vm622_vm6, %v5516_v57, -inf }
 0x4a1   :  { %1934 = vmax.xlane.f32.xlu1 %v1933_v0  ;;  %v694_v50 = vpop.xlane.xlu1 %693 }
 0x4a2   :  { %1771 = vrot.lane.b32.xlu0 %v4837_v13, %s4311_s18  ;;  %4013 = vrcp.f32 %v694_v50  ;;  %v1505_v24 = vpop.permute.xlu0 %1504 }
 0x4a3   :  { %1681 = vmax.xlane.f32.xlu2 %v1680_v37  ;;  %4015 = vrcp.f32 %v691_v58 }
 0x4a4   :  { %4017 = vrcp.f32 %v5426_v14 }
 0x4a5   :  { %3578 = vmatmul.msk.bf16.gmra.mxu2 %vm622_vm6, %v713_v53  ;;  %4019 = vrcp.f32 %v5364_v43 }
 0x4a6   :  { %4021 = vrcp.f32 %v5458_v4 }
 0x4a7   :  { %4023 = vrcp.f32 %v5442_v29 }
 0x4a8   :  { %v4014_v61 = vpop.eup %4013  ;;  %4025 = vrcp.f32 %v5469_v30 }
 0x4a9   :  { %v4016_v9 = vpop.eup %4015  ;;  %v710_v56 = vmul.f32 %v4014_v61, %v5326_v23  ;;  %v5519_v23 = vpop.f32.mrf.mxu0  ;;  %4027 = vrcp.f32 %v5438_v48 }
 0x4aa   :  { %2007 = vrot.lane.b32.xlu0 %v4814_v2, %s4312_s19  ;;  %v709_v17 = vmul.f32 %v4016_v9, %v5311_v11  ;;  %v4018_v31 = vpop.eup %4017  ;;  %v1229_v14 = vpop.permute.xlu0 %1228 }
 0x4ab   :  { %1684 = vmax.xlane.f32.xlu2 %v1683_v3  ;;  %v4020_v0 = vpop.eup %4019  ;;  %v943_v60 = vmul.f32 %v4018_v31, %v5257_v12 }
 0x4ac   :  { %v714_v47 = vpack.c.bf16 %v710_v56, %v709_v17  ;;  %v942_v35 = vmul.f32 %v4020_v0, %v5237_v39  ;;  %v5539_v39 = vld [vmem:[%s6851_s6 + $0x68] sm:$0xff]   ;;  %v4022_v12 = vpop.eup %4021 }
 0x4ad   :  { %v6896_v53 = vunpack.c.h.bf16 %v5539_v39  ;;  %v4024_v10 = vpop.eup %4023  ;;  %v944_v4 = vmul.f32 %v4022_v12, %v5317_v34 }
 0x4ae   :  { %v950_v50 = vpack.c.bf16 %v943_v60, %v942_v35  ;;  %v945_v61 = vmul.f32 %v4024_v10, %v5277_v62 }
 0x4b0   :  { %v951_v22 = vpack.c.bf16 %v945_v61, %v944_v4  ;;  %v6948_v4 = vunpack.c.l.bf16 %v5151_v21 }
 0x4b1   :  { %v5529_v43 = vpop.f32.mrf.mxu0 }
 0x4b2   :  { %v1499_v9 = vpop.permute.xlu0 %1498 }
 0x4b3   :  { %1925 = vmax.xlane.f32.xlu2 %v1924_v52 }
 0x4b5   :  { %3579 = vmatmul.msk.bf16.gmra.mxu2 %vm622_vm6, %v714_v47  ;;  %v4026_v47 = vpop.eup %4025 }
 0x4b6   :  { %v947_v30 = vmul.f32 %v4026_v47, %v5322_v26 }
 0x4b9   :  { %v1231_v11 = vpop.permute.xlu1 %1230  ;;  %v2442_v58 = vpop.f32.mrf.mxu0 }
 0x4ba   :  { %1255 = vmatpush.bf16.msrb.mxu3 %v1231_v11  ;;  %2013 = vrot.lane.b32.xlu1 %v4907_v44, %s4312_s19  ;;  %v5545_v29 = vadd.f32 %v6896_v53, %v2442_v58 }
 0x4bb   :  { %1693 = vmax.xlane.f32.xlu2 %v1692_v5  ;;  %v4028_v5 = vpop.eup %4027 }
 0x4bc   :  { %v2464_v56 = vsel %vm622_vm6, %v5545_v29, -inf  ;;  %v946_v48 = vmul.f32 %v4028_v5, %v5302_v41 }
 0x4be   :  { %1256 = vmatpush.bf16.msrb.mxu3 %v1229_v14  ;;  %v952_v14 = vpack.c.bf16 %v947_v30, %v946_v48 }
 0x4c2   :  { %2011 = vrot.lane.b32.xlu1 %v4887_v36, %s4312_s19 }
 0x4c5   :  { %3592 = vmatmul.msk.bf16.vlgmr.msrb.gmra.mxu2 %vm622_vm6, %v950_v50  ;;  %v930_v37 = vpop.xlane.xlu2 %929  ;;  %v6947_v50 = vunpack.c.h.bf16 %v5120_v16 }
 0x4c6   :  { %1526 = vmatpush.bf16.msrb.mxu2 %v1505_v24  ;;  %v2165_v24 = vpop.f32.mrf.mxu1 }
 0x4ca   :  { %2009 = vrot.lane.b32.xlu1 %v4837_v13, %s4312_s19 }
 0x4cd   :  { %v1503_v3 = vpop.permute.xlu2 %1502 }
 0x4ce   :  { %1527 = vmatpush.bf16.msrb.mxu2 %v1503_v3  ;;  %v2167_v60 = vpop.f32.mrf.mxu1  ;;  %v1159_v3 = vsub.f32 %v5137_v49, %v5342_v38  ;;  %v5597_v49 = vld [vmem:[%s6851_s6 + $0x60] sm:$0xff]   ;;  %v1160_v38 = vsub.f32 %v5192_v51, %v5338_v8 }
 0x4cf   :  { %v5573_v12 = vadd.f32 %v6947_v50, %v2167_v60 }
 0x4d1   :  { %v2188_v41 = vsel %vm622_vm6, %v5573_v12, -inf }
 0x4d2   :  { %1769 = vrot.lane.b32.xlu1 %v4814_v2, %s4311_s18 }
 0x4d3   :  { %1775 = vrot.lane.b32.xlu2 %v4907_v44, %s4311_s18 }
 0x4d4   :  { %2465 = vmax.xlane.f32.xlu0 %v2464_v56 }
 0x4d5   :  { %v748_v17 = vpop.f32.mrf.mxu2  ;;  %3593 = vmatmul.msk.bf16.gmra.mxu2 %vm622_vm6, %v951_v22  ;;  %v1501_v34 = vpop.permute.xlu2 %1500 }
 0x4d6   :  { %768 = vst.msk [vmem:[#allocation2] sm:$0xff] %vm568_vm5, %v748_v17  ;;  %1528 = vmatpush.bf16.msrb.mxu2 %v1501_v34  ;;  %v2170_v58 = vpop.f32.mrf.mxu1  ;;  %v1168_v17 = vmul.f32 1.442695, %v1159_v3 }
 0x4d7   :  { %v5581_v61 = vadd.f32 %v6948_v4, %v2170_v58  ;;  %v6897_v58 = vunpack.c.l.bf16 %v5539_v39 }
 0x4d9   :  { %v1917_v62 = vpop.xlane.xlu0 %1916  ;;  %v2191_v34 = vsel %vm622_vm6, %v5581_v61, -inf }
 0x4da   :  { %1529 = vmatpush.bf16.msrb.mxu2 %v1499_v9  ;;  %v1939_v52 = vsub.f32 %v5371_v1, %v1917_v62 }
 0x4db   :  { %1773 = vrot.lane.b32.xlu2 %v4887_v36, %s4311_s18 }
 0x4dc   :  { %v1947_v54 = vmul.f32 1.442695, %v1939_v52  ;;  %v6949_v52 = vunpack.c.l.bf16 %v5120_v16 }
 0x4dd   :  { %v750_v11 = vpop.f32.mrf.mxu2  ;;  %v1227_v31 = vpop.permute.xlu2 %1226 }
 0x4de   :  { %769 = vst.msk [vmem:[#allocation2 + $0x8] sm:$0xff] %vm568_vm5, %v750_v11  ;;  %4029 = vpow2.f32 %v1947_v54  ;;  %1257 = vmatpush.bf16.msrb.mxu3 %v1227_v31  ;;  %v5591_v47 = vadd.f32 %v6949_v52, %v2165_v24  ;;  %v1170_v24 = vmul.f32 1.442695, %v1160_v38  ;;  %v6898_v31 = vunpack.c.h.bf16 %v5597_v49  ;;  %v2172_v52 = vpop.f32.mrf.mxu1 }
 0x4df   :  { %4031 = vrcp.f32 %v930_v37 }
 0x4e1   :  { %v1923_v54 = vpop.xlane.xlu0 %1922 }
 0x4e2   :  { %v1941_v51 = vsub.f32 %v5382_v27, %v1923_v54  ;;  %v5627_v27 = vadd.f32 %v6898_v31, %v5519_v23 }
 0x4e4   :  { %v5564_v0 = vpop.xlane.xlu1 %1678  ;;  %v5566_v1 = vpop.eup %4029  ;;  %v1951_v60 = vmul.f32 1.442695, %v1941_v51  ;;  %v2458_v23 = vsel %vm622_vm6, %v5627_v27, -inf }
 0x4e5   :  { %6946 = vst [vmem:[#allocation21_spill] sm:$0xff] %v5566_v1  ;;  %3594 = vmatmul.msk.bf16.gmra.mxu2 %vm622_vm6, %v952_v14  ;;  %v1963_v35 = vsel %vm622_vm6, %v5566_v1, 0.0  ;;  %v4032_v10 = vpop.eup %4031 }
 0x4e6   :  { %1964 = vadd.xlane.f32.xlu0 %v1963_v35  ;;  %v948_v37 = vmul.f32 %v4032_v10, %v5353_v25  ;;  %v2185_v25 = vsel %vm622_vm6, %v5591_v47, -inf }
 0x4ec   :  { %v933_v26 = vpop.xlane.xlu1 %932 }
 0x4ed   :  { %4033 = vrcp.f32 %v933_v26  ;;  %v6950_v26 = vld [vmem:[#allocation4_spill] sm:$0xff] }
 0x4ee   :  { %2189 = vmax.xlane.f32.xlu0 %v2188_v41  ;;  %4035 = vpow2.f32 %v1168_v17  ;;  %v1161_v41 = vsub.f32 %v5161_v46, %v5360_v32  ;;  %v6952_v46 = vld [vmem:[#allocation14_spill] sm:$0xff] }
 0x4ef   :  { %4037 = vpow2.f32 %v1170_v24  ;;  %v1701_v32 = vsub.f32 %v6952_v46, %v5564_v0  ;;  %v6953_v17 = vld [vmem:[#allocation18_spill] sm:$0xff] }
 0x4f0   :  { %v1172_v10 = vmul.f32 1.442695, %v1161_v41 }
 0x4f3   :  { %v4034_v9 = vpop.eup %4033 }
 0x4f4   :  { %v5583_v22 = vpop.xlane.xlu1 %1919  ;;  %v949_v56 = vmul.f32 %v4034_v9, %v5406_v6  ;;  %v6899_v6 = vunpack.c.l.bf16 %v5597_v49  ;;  %v5606_v11 = vpop.eup %4035 }
 0x4f5   :  { %v1185_v8 = vsel %vm622_vm6, %v5606_v11, 0.0  ;;  %v5622_v50 = vpop.eup %4037  ;;  %v5651_v9 = vpop.xlane.xlu0 %1690 }
 0x4f6   :  { %v953_v62 = vpack.c.bf16 %v949_v56, %v948_v37  ;;  %2192 = vmax.xlane.f32.xlu0 %v2191_v34  ;;  %v5611_v5 = vadd.f32 %v6899_v6, %v5505_v20  ;;  %v1163_v20 = vsub.f32 %v5244_v55, %v5375_v28  ;;  %v1188_v28 = vsel %vm622_vm6, %v5622_v50, 0.0 }
 0x4f7   :  { %v1709_v56 = vmul.f32 1.442695, %v1701_v32  ;;  %v1940_v34 = vsub.f32 %v6953_v17, %v5583_v22  ;;  %v6954_v22 = vld [vmem:[#allocation5_spill] sm:$0xff] }
 0x4f8   :  { %3595 = vmatmul.msk.bf16.gmra.mxu2 %vm622_vm6, %v953_v62  ;;  %v2455_v30 = vsel %vm622_vm6, %v5611_v5, -inf  ;;  %v1176_v55 = vmul.f32 1.442695, %v1163_v20 }
 0x4f9   :  { %v1949_v38 = vmul.f32 1.442695, %v1940_v34 }
 0x4fc   :  { %2186 = vmax.xlane.f32.xlu1 %v2185_v25  ;;  %v5604_v16 = vpop.xlane.xlu1 %1687 }
 0x4fd   :  { %v1932_v20 = vpop.xlane.xlu0 %1931 }
 0x504   :  { %1186 = vadd.xlane.f32.xlu1 %v1185_v8  ;;  %v1929_v48 = vpop.xlane.xlu1 %1928  ;;  %2456 = vmax.xlane.f32.xlu2 %v2455_v30 }
 0x505   :  { %v1943_v14 = vsub.f32 %v5452_v19, %v1929_v48  ;;  %v1158_v19 = vsub.f32 %v5183_v15, %v5334_v7  ;;  %v5649_v7 = vadd.f32 %v6897_v58, %v5529_v43  ;;  %v6955_v48 = vld [vmem:[#allocation16_spill] sm:$0xff]  ;;  %v5697_v34 = vpop.xlane.xlu0 %1699 }
 0x507   :  { %v1955_v35 = vmul.f32 1.442695, %v1943_v14  ;;  %v1166_v4 = vmul.f32 1.442695, %v1158_v19  ;;  %v2461_v62 = vsel %vm622_vm6, %v5649_v7, -inf  ;;  %v6956_v14 = vld [vmem:[#allocation9_spill] sm:$0xff] }
 0x508   :  { %3620 = vmatmul.msk.bf16.vlgmr.msra.gmra.mxu2 %vm568_vm5, %v6950_v26 }
 0x509   :  { %4039 = vpow2.f32 %v1955_v35 }
 0x50a   :  { %4041 = vpow2.f32 %v1951_v60  ;;  %v1162_v60 = vsub.f32 %v6956_v14, %v6955_v48  ;;  %v6961_v14 = vld [vmem:[#allocation13_spill] sm:$0xff] }
 0x50b   :  { %4043 = vpow2.f32 %v1176_v55 }
 0x50c   :  { %1189 = vadd.xlane.f32.xlu1 %v1188_v28  ;;  %2459 = vmax.xlane.f32.xlu2 %v2458_v23  ;;  %4045 = vpow2.f32 %v1172_v10  ;;  %v5675_v35 = vpop.xlane.xlu1 %1696  ;;  %v1174_v55 = vmul.f32 1.442695, %v1162_v60  ;;  %v6957_v28 = vunpack.c.h.bf16 %v5151_v21  ;;  %v5687_v10 = vpop.f32.mrf.mxu1  ;;  %v6962_v60 = vld [vmem:[#allocation11_spill] sm:$0xff] }
 0x50d   :  { %4047 = vpow2.f32 %v1166_v4 }
 0x50e   :  { %4049 = vpow2.f32 %v1709_v56  ;;  %v5685_v23 = vadd.f32 %v6957_v28, %v2172_v52  ;;  %v6959_v56 = vld [vmem:[#allocation17_spill] sm:$0xff]  ;;  %v6964_v28 = vld [vmem:[#allocation8_spill] sm:$0xff] }
 0x50f   :  { %v5640_v3 = vpop.eup %4039  ;;  %4051 = vpow2.f32 %v1949_v38  ;;  %v1944_v17 = vsub.f32 %v6959_v56, %v1932_v20  ;;  %v1164_v20 = vsub.f32 %v6962_v60, %v6961_v14 }
 0x510   :  { %6951 = vst [vmem:[#allocation4_spill] sm:$0xff] %v5640_v3  ;;  %v5644_v15 = vpop.eup %4041  ;;  %v1975_v37 = vsel %vm622_vm6, %v5640_v3, 0.0  ;;  %v2194_v21 = vsel %vm622_vm6, %v5685_v23, -inf }
 0x511   :  { %1976 = vadd.xlane.f32.xlu0 %v1975_v37  ;;  %v1969_v0 = vsel %vm622_vm6, %v5644_v15, 0.0  ;;  %v5661_v43 = vpop.eup %4043  ;;  %v1957_v38 = vmul.f32 1.442695, %v1944_v17  ;;  %v1178_v17 = vmul.f32 1.442695, %v1164_v20 }
 0x512   :  { %v5663_v24 = vpop.eup %4045  ;;  %v1197_v8 = vsel %vm622_vm6, %v5661_v43, 0.0 }
 0x513   :  { %v5670_v30 = vpop.eup %4047  ;;  %v1191_v26 = vsel %vm622_vm6, %v5663_v24, 0.0 }
 0x514   :  { %1970 = vadd.xlane.f32.xlu1 %v1969_v0  ;;  %2462 = vmax.xlane.f32.xlu2 %v2461_v62  ;;  %v1182_v41 = vsel %vm622_vm6, %v5670_v30, 0.0  ;;  %v5681_v19 = vpop.eup %4049  ;;  %v5699_v0 = vpop.xlane.xlu1 %1934 }
 0x515   :  { %v1725_v32 = vsel %vm622_vm6, %v5681_v19, 0.0  ;;  %v5691_v37 = vpop.eup %4051 }
 0x516   :  { %v1682_v25 = vpop.xlane.xlu2 %1681  ;;  %6958 = vst [vmem:[#allocation14_spill] sm:$0xff] %v5691_v37  ;;  %v1966_v62 = vsel %vm622_vm6, %v5691_v37, 0.0 }
 0x517   :  { %v1702_v54 = vsub.f32 %v5480_v33, %v1682_v25 }
 0x518   :  { %v753_v51 = vpop.f32.mrf.mxu2  ;;  %3621 = vmatmul.msk.bf16.gmra.mxu2 %vm568_vm5, %v6954_v22 }
 0x519   :  { %770 = vst.msk [vmem:[#allocation2 + $0x10] sm:$0xff] %vm568_vm5, %v753_v51  ;;  %1198 = vadd.xlane.f32.xlu0 %v1197_v8  ;;  %v1711_v33 = vmul.f32 1.442695, %v1702_v54  ;;  %v6960_v8 = vld [vmem:[#allocation6_spill] sm:$0xff] }
 0x51b   :  { %4053 = vpow2.f32 %v1711_v33  ;;  %v2177_v33 = vpop.f32.mrf.mxu1 }
 0x51c   :  { %1192 = vadd.xlane.f32.xlu1 %v1191_v26  ;;  %1183 = vadd.xlane.f32.xlu2 %v1182_v41  ;;  %4055 = vpow2.f32 %v1174_v55  ;;  %v6963_v26 = vld [vmem:[#allocation12_spill] sm:$0xff] }
 0x51d   :  { %v1165_v41 = vsub.f32 %v6963_v26, %v5471_v40  ;;  %4057 = vpow2.f32 %v1957_v38 }
 0x51e   :  { %v1685_v4 = vpop.xlane.xlu2 %1684 }
 0x520   :  { %v755_v46 = vpop.f32.mrf.mxu2 }
 0x521   :  { %771 = vst.msk [vmem:[#allocation2 + $0x18] sm:$0xff] %vm568_vm5, %v755_v46  ;;  %1726 = vadd.xlane.f32.xlu0 %v1725_v32  ;;  %v5703_v52 = vpop.eup %4053  ;;  %v6965_v46 = vunpack.c.h.bf16 %v6964_v28 }
 0x522   :  { %v5705_v54 = vpop.eup %4055  ;;  %v1728_v48 = vsel %vm622_vm6, %v5703_v52, 0.0 }
 0x523   :  { %v5721_v32 = vadd.f32 %v6965_v46, %v2177_v33 }
 0x524   :  { %2195 = vmax.xlane.f32.xlu1 %v2194_v21  ;;  %1967 = vadd.xlane.f32.xlu2 %v1966_v62  ;;  %v1180_v21 = vmul.f32 1.442695, %v1165_v41  ;;  %v5723_v62 = vpop.xlane.xlu0 %1937 }
 0x525   :  { %6966 = vst [vmem:[#allocation18_spill] sm:$0xff] %v5721_v32  ;;  %v2200_v38 = vsel %vm622_vm6, %v5721_v32, -inf }
 0x526   :  { %v1926_v25 = vpop.xlane.xlu2 %1925 }
 0x527   :  { %v1942_v51 = vsub.f32 %v5503_v18, %v1926_v25  ;;  %v1194_v18 = vsel %vm622_vm6, %v5705_v54, 0.0 }
 0x528   :  { %v758_v22 = vpop.f32.mrf.mxu2  ;;  %3622 = vmatmul.msk.bf16.gmra.mxu2 %vm568_vm5, %v6960_v8  ;;  %v1703_v8 = vsub.f32 %v5494_v45, %v1685_v4  ;;  %v6969_v4 = vld [vmem:[#allocation7_spill] sm:$0xff] }
 0x529   :  { %772 = vst.msk [vmem:[#allocation2 + $0x20] sm:$0xff] %vm568_vm5, %v758_v22  ;;  %1729 = vadd.xlane.f32.xlu0 %v1728_v48  ;;  %v1953_v55 = vmul.f32 1.442695, %v1942_v51  ;;  %v5725_v22 = vpop.eup %4057  ;;  %v6968_v48 = vld [vmem:[#allocation15_spill] sm:$0xff] }
 0x52a   :  { %6967 = vst [vmem:[#allocation5_spill] sm:$0xff] %v5725_v22  ;;  %v1705_v14 = vsub.f32 %v6968_v48, %v5651_v9  ;;  %v1978_v20 = vsel %vm622_vm6, %v5725_v22, 0.0  ;;  %v1713_v41 = vmul.f32 1.442695, %v1703_v8 }
 0x52b   :  { %4059 = vpow2.f32 %v1953_v55 }
 0x52c   :  { %v2014_v56 = vpop.permute.xlu1 %2013  ;;  %1195 = vadd.xlane.f32.xlu1 %v1194_v18  ;;  %4061 = vpow2.f32 %v1178_v17  ;;  %v1772_v26 = vpop.permute.xlu0 %1771  ;;  %v1717_v18 = vmul.f32 1.442695, %v1705_v14 }
 0x52d   :  { %2035 = vmatpush.bf16.msra.mxu2 %v2014_v56  ;;  %4063 = vpow2.f32 %v1180_v21  ;;  %v6970_v56 = vld [vmem:[#allocation20_spill] sm:$0xff] }
 0x52e   :  { %v1694_v25 = vpop.xlane.xlu2 %1693  ;;  %v1704_v17 = vsub.f32 %v6970_v56, %v5604_v16  ;;  %4065 = vpow2.f32 %v1713_v41 }
 0x52f   :  { %4067 = vpow2.f32 %v1717_v18  ;;  %v1706_v41 = vsub.f32 %v5516_v57, %v1694_v25  ;;  %v6971_v18 = vld [vmem:[#allocation19_spill] sm:$0xff] }
 0x530   :  { %v760_v40 = vpop.f32.mrf.mxu2  ;;  %v1715_v8 = vmul.f32 1.442695, %v1704_v17  ;;  %v2445_v17 = vpop.f32.mrf.mxu0 }
 0x531   :  { %773 = vst.msk [vmem:[#allocation2 + $0x28] sm:$0xff] %vm568_vm5, %v760_v40  ;;  %2201 = vmax.xlane.f32.xlu0 %v2200_v38  ;;  %v5730_v51 = vpop.eup %4059 }
 0x532   :  { %v1972_v60 = vsel %vm622_vm6, %v5730_v51, 0.0  ;;  %v5739_v55 = vpop.eup %4061  ;;  %4069 = vpow2.f32 %v1715_v8 }
 0x533   :  { %1973 = vadd.xlane.f32.xlu2 %v1972_v60  ;;  %v5741_v45 = vpop.eup %4063  ;;  %v1200_v21 = vsel %vm622_vm6, %v5739_v55, 0.0 }
 0x534   :  { %v2012_v33 = vpop.permute.xlu1 %2011  ;;  %1979 = vadd.xlane.f32.xlu1 %v1978_v20  ;;  %v1203_v40 = vsel %vm622_vm6, %v5741_v45, 0.0  ;;  %v5752_v14 = vpop.eup %4065 }
 0x535   :  { %2036 = vmatpush.bf16.msra.mxu2 %v2012_v33  ;;  %v2008_v60 = vpop.permute.xlu0 %2007  ;;  %v5754_v16 = vpop.eup %4067  ;;  %v5759_v33 = vld [vmem:[%s6851_s6 + $0x70] sm:$0xff]  }
 0x536   :  { %v1776_v46 = vpop.permute.xlu2 %1775  ;;  %v1737_v56 = vsel %vm622_vm6, %v5754_v16, 0.0 }
 0x537   :  { %1797 = vmatpush.bf16.msra.mxu3 %v1776_v46  ;;  %v1708_v46 = vsub.f32 %v6971_v18, %v5697_v34 }
 0x538   :  { %v763_v9 = vpop.f32.mrf.mxu2  ;;  %3623 = vmatmul.msk.bf16.gmra.mxu2 %vm568_vm5, %v6969_v4  ;;  %v6895_v4 = vunpack.c.l.bf16 %v5759_v33  ;;  %v5770_v8 = vpop.eup %4069 }
 0x539   :  { %774 = vst.msk [vmem:[#allocation2 + $0x30] sm:$0xff] %vm568_vm5, %v763_v9  ;;  %v1731_v9 = vsel %vm622_vm6, %v5752_v14, 0.0  ;;  %v1734_v25 = vsel %vm622_vm6, %v5770_v8, 0.0 }
 0x53a   :  { %v5774_v57 = vadd.f32 %v6895_v4, %v2445_v17 }
 0x53b   :  { %1201 = vadd.xlane.f32.xlu2 %v1200_v21  ;;  %v1719_v21 = vmul.f32 1.442695, %v1706_v41 }
 0x53c   :  { %v2010_v38 = vpop.permute.xlu1 %2009  ;;  %1204 = vadd.xlane.f32.xlu1 %v1203_v40  ;;  %v1723_v40 = vmul.f32 1.442695, %v1708_v46  ;;  %v2180_v46 = vpop.f32.mrf.mxu1 }
 0x53d   :  { %2037 = vmatpush.bf16.msra.mxu2 %v2010_v38  ;;  %4071 = vpow2.f32 %v1719_v21 }
 0x53e   :  { %v1774_v48 = vpop.permute.xlu2 %1773  ;;  %4073 = vpow2.f32 %v1723_v40 }
 0x53f   :  { %1798 = vmatpush.bf16.msra.mxu3 %v1774_v48 }
 0x540   :  { %v765_v20 = vpop.f32.mrf.mxu2 }
 0x541   :  { %775 = vst.msk [vmem:[#allocation2 + $0x38] sm:$0xff] %vm568_vm5, %v765_v20  ;;  %2038 = vmatpush.bf16.msra.mxu2 %v2008_v60 }
 0x543   :  { %1732 = vadd.xlane.f32.xlu2 %v1731_v9  ;;  %1799 = vmatpush.bf16.msra.mxu3 %v1772_v26  ;;  %v2467_v26 = vsel %vm622_vm6, %v5774_v57, -inf  ;;  %v5782_v48 = vpop.eup %4071  ;;  %v6974_v9 = vld [vmem:[#allocation10_spill] sm:$0xff] }
 0x544   :  { %1738 = vadd.xlane.f32.xlu1 %v1737_v56  ;;  %v1770_v38 = vpop.permute.xlu1 %1769  ;;  %v5786_v20 = vpop.eup %4073  ;;  %v1740_v41 = vsel %vm622_vm6, %v5782_v48, 0.0  ;;  %v6975_v56 = vunpack.c.l.bf16 %v6974_v9 }
 0x545   :  { %v1746_v18 = vsel %vm622_vm6, %v5786_v20, 0.0 }
 0x546   :  { %v5794_v17 = vadd.f32 %v6975_v56, %v2180_v46 }
 0x547   :  { %1800 = vmatpush.bf16.msra.mxu3 %v1770_v38  ;;  %v5812_v46 = vpop.xlane.xlu0 %2465 }
 0x548   :  { %v5776_v34 = vpop.f32.mrf.mxu2  ;;  %6976 = vst [vmem:[#allocation17_spill] sm:$0xff] %v5794_v17  ;;  %v2203_v40 = vsel %vm622_vm6, %v5794_v17, -inf }
 0x549   :  { %6972 = vst [vmem:[#allocation16_spill] sm:$0xff] %v5776_v34 }
 0x54b   :  { %1735 = vadd.xlane.f32.xlu2 %v1734_v25 }
 0x54c   :  { %2468 = vmax.xlane.f32.xlu1 %v2467_v26 }
 0x550   :  { %v5784_v60 = vpop.f32.mrf.mxu2 }
 0x551   :  { %6973 = vst [vmem:[#allocation9_spill] sm:$0xff] %v5784_v60 }
 0x553   :  { %1741 = vadd.xlane.f32.xlu2 %v1740_v41 }
 0x554   :  { %1747 = vadd.xlane.f32.xlu1 %v1746_v18 }
 0x558   :  { %v5796_v21 = vpop.f32.mrf.mxu2 }
 0x559   :  { %6977 = vst [vmem:[#allocation6_spill] sm:$0xff] %v5796_v21 }
 0x55c   :  { %2204 = vmax.xlane.f32.xlu1 %v2203_v40  ;;  %v5818_v40 = vpop.xlane.xlu0 %1964 }
 0x560   :  { %v5800_v38 = vpop.f32.mrf.mxu2 }
 0x561   :  { %6978 = vst [vmem:[#allocation13_spill] sm:$0xff] %v5800_v38 }
 0x564   :  { %v5828_v60 = vpop.xlane.xlu0 %2189 }
 0x568   :  { %v5802_v25 = vpop.f32.mrf.mxu2 }
 0x569   :  { %6979 = vst [vmem:[#allocation11_spill] sm:$0xff] %v5802_v25 }
 0x56f   :  { %v5804_v26 = vpop.xlane.xlu1 %2186 }
 0x570   :  { %v5806_v41 = vpop.f32.mrf.mxu2 }
 0x571   :  { %6980 = vst [vmem:[#allocation12_spill] sm:$0xff] %v5806_v41  ;;  %v6983_v41 = vunpack.c.l.bf16 %v5597_v49 }
 0x577   :  { %v1187_v4 = vpop.xlane.xlu1 %1186  ;;  %v5808_v18 = vpop.xlane.xlu2 %2456 }
 0x578   :  { %4075 = vrcp.f32 %v1187_v4 }
 0x57b   :  { %v5810_v53 = vpop.f32.mrf.mxu2 }
 0x57c   :  { %6981 = vst [vmem:[#allocation8_spill] sm:$0xff] %v5810_v53 }
 0x57e   :  { %v4076_v4 = vpop.eup %4075 }
 0x57f   :  { %v1190_v56 = vpop.xlane.xlu1 %1189  ;;  %v5814_v58 = vpop.xlane.xlu2 %2459 }
 0x583   :  { %v5816_v31 = vpop.f32.mrf.mxu2 }
 0x584   :  { %6982 = vst [vmem:[#allocation15_spill] sm:$0xff] %v5816_v31  ;;  %v6984_v31 = vunpack.c.l.bf16 %v6964_v28 }
 0x586   :  { %v5833_v34 = vadd.f32 %v6984_v31, %v5687_v10  ;;  %v1215_v10 = vmul.f32 %v4076_v4, %v5606_v11 }
 0x587   :  { %v5820_v6 = vpop.xlane.xlu2 %2462  ;;  %v1971_v38 = vpop.xlane.xlu1 %1970 }
 0x58b   :  { %v1386_v25 = vpop.f32.mrf.mxu2 }
 0x58c   :  { %v5824_v21 = vadd.f32 %v6983_v41, %v1386_v25  ;;  %v1707_v25 = vsub.f32 %v5464_v59, %v5675_v35  ;;  %v6985_v41 = vunpack.c.h.bf16 %v5597_v49  ;;  %v5847_v59 = vpop.xlane.xlu0 %2192 }
 0x58e   :  { %v1406_v53 = vsel %vm622_vm6, %v5824_v21, -inf  ;;  %v1721_v31 = vmul.f32 1.442695, %v1707_v25  ;;  %v1946_v25 = vsub.f32 %v5448_v42, %v5723_v62  ;;  %v6988_v42 = vunpack.c.h.bf16 %v5539_v39 }
 0x58f   :  { %1407 = vmax.xlane.f32.xlu2 %v1406_v53  ;;  %v1184_v3 = vpop.xlane.xlu2 %1183  ;;  %v1193_v22 = vpop.xlane.xlu1 %1192  ;;  %v2197_v53 = vsel %vm622_vm6, %v5833_v34, -inf }
 0x590   :  { %4077 = vrcp.f32 %v1184_v3 }
 0x591   :  { %4079 = vpow2.f32 %v1721_v31 }
 0x592   :  { %4081 = vrcp.f32 %v1193_v22 }
 0x593   :  { %v1388_v17 = vpop.f32.mrf.mxu2  ;;  %4083 = vrcp.f32 %v1190_v56  ;;  %v3885_v56 = vunpack.c.h.bf16 %v5759_v33 }
 0x594   :  { %v5839_v1 = vadd.f32 %v6985_v41, %v1388_v17  ;;  %v6986_v41 = vunpack.c.l.bf16 %v5539_v39 }
 0x596   :  { %v1409_v3 = vsel %vm622_vm6, %v5839_v1, -inf  ;;  %v4078_v37 = vpop.eup %4077 }
 0x597   :  { %2198 = vmax.xlane.f32.xlu2 %v2197_v53  ;;  %1410 = vmax.xlane.f32.xlu0 %v1409_v3  ;;  %v1214_v28 = vmul.f32 %v4078_v37, %v5670_v30  ;;  %v5849_v17 = vpop.xlane.xlu1 %2195  ;;  %v5860_v30 = vpop.xlane.xlu2 %1967  ;;  %v1961_v37 = vmul.f32 1.442695, %v1946_v25 }
 0x598   :  { %v5862_v4 = vpop.eup %4079  ;;  %v5864_v53 = vpop.xlane.xlu0 %1976 }
 0x599   :  { %v1222_v49 = vpack.c.bf16 %v1215_v10, %v1214_v28  ;;  %6987 = vst [vmem:[#allocation7_spill] sm:$0xff] %v5864_v53  ;;  %v4082_v3 = vpop.eup %4081  ;;  %v1945_v10 = vsub.f32 %v5475_v63, %v5699_v0  ;;  %4085 = vpow2.f32 %v1961_v37  ;;  %v2447_v25 = vpop.f32.mrf.mxu0 }
 0x59a   :  { %v4084_v22 = vpop.eup %4083  ;;  %4087 = vrcp.f32 %v1971_v38 }
 0x59b   :  { %v1391_v35 = vpop.f32.mrf.mxu2  ;;  %3608 = vmatmul.msk.bf16.vlgmr.msrb.gmra.mxu3 %vm622_vm6, %v1222_v49  ;;  %v1959_v39 = vmul.f32 1.442695, %v1945_v10  ;;  %v1216_v0 = vmul.f32 %v4084_v22, %v5622_v50 }
 0x59c   :  { %v5854_v32 = vadd.f32 %v6986_v41, %v1391_v35  ;;  %v1743_v35 = vsel %vm622_vm6, %v5862_v4, 0.0  ;;  %v1217_v41 = vmul.f32 %v4082_v3, %v5663_v24  ;;  %v6989_v24 = vunpack.c.l.bf16 %v5759_v33 }
 0x59e   :  { %v1412_v11 = vsel %vm622_vm6, %v5854_v32, -inf  ;;  %v1223_v38 = vpack.c.bf16 %v1217_v41, %v1216_v0 }
 0x59f   :  { %1413 = vmax.xlane.f32.xlu0 %v1412_v11  ;;  %v1196_v28 = vpop.xlane.xlu1 %1195  ;;  %v5879_v11 = vadd.f32 %v3885_v56, %v2447_v25  ;;  %v5881_v37 = vpop.eup %4085 }
 0x5a0   :  { %v1199_v53 = vpop.xlane.xlu0 %1198  ;;  %v1984_v33 = vsel %vm622_vm6, %v5881_v37, 0.0 }
 0x5a1   :  { %v2470_v50 = vsel %vm622_vm6, %v5879_v11, -inf }
 0x5a3   :  { %v1393_v31 = vpop.f32.mrf.mxu2 }
 0x5a4   :  { %v5870_v62 = vadd.f32 %v6988_v42, %v1393_v31  ;;  %v4088_v42 = vpop.eup %4087 }
 0x5a6   :  { %v1415_v49 = vsel %vm622_vm6, %v5870_v62, -inf  ;;  %v1974_v63 = vpop.xlane.xlu2 %1973 }
 0x5a7   :  { %1416 = vmax.xlane.f32.xlu2 %v1415_v49  ;;  %1744 = vadd.xlane.f32.xlu0 %v1743_v35  ;;  %4089 = vrcp.f32 %v1974_v63  ;;  %v5893_v49 = vmul.f32 %v4088_v42, %v5644_v15  ;;  %v5916_v42 = vld [vmem:[%s6851_s6 + $0x78] sm:$0xff]   ;;  %s4319_s6 = smov 8  }
 0x5a8   :  { %4091 = vpow2.f32 %v1959_v39 }
 0x5a9   :  { %4093 = vrcp.f32 %v1196_v28  ;;  %v5900_v28 = vpop.xlane.xlu1 %1979 }
 0x5aa   :  { %4095 = vrcp.f32 %v1199_v53  ;;  %6990 = vst [vmem:[#allocation20_spill] sm:$0xff] %v5900_v28 }
 0x5ab   :  { %v1396_v31 = vpop.f32.mrf.mxu2  ;;  %3609 = vmatmul.msk.bf16.gmra.mxu3 %vm622_vm6, %v1223_v38 }
 0x5ac   :  { %v5886_v3 = vadd.f32 %v6989_v24, %v1396_v31  ;;  %v2182_v31 = vpop.f32.mrf.mxu1 }
 0x5ad   :  { %v4090_v10 = vpop.eup %4089 }
 0x5ae   :  { %v1418_v22 = vsel %vm622_vm6, %v5886_v3, -inf  ;;  %v5896_v35 = vmul.f32 %v4090_v10, %v5730_v51  ;;  %v5904_v25 = vpop.eup %4091  ;;  %v1202_v24 = vpop.xlane.xlu2 %1201  ;;  %v6991_v10 = vunpack.c.h.bf16 %v6974_v9 }
 0x5af   :  { %2471 = vmax.xlane.f32.xlu2 %v2470_v50  ;;  %1419 = vmax.xlane.f32.xlu1 %v1418_v22  ;;  %v4094_v63 = vpop.eup %4093  ;;  %v1981_v51 = vsel %vm622_vm6, %v5904_v25, 0.0  ;;  %v6906_v22 = vunpack.c.l.bf16 %v5916_v42  ;;  %4097 = vrcp.f32 %v1202_v24 }
 0x5b0   :  { %1985 = vadd.xlane.f32.xlu0 %v1984_v33  ;;  %v4096_v53 = vpop.eup %4095  ;;  %v1218_v38 = vmul.f32 %v4094_v63, %v5705_v54  ;;  %v5921_v50 = vadd.f32 %v6991_v10, %v2182_v31 }
 0x5b1   :  { %v1205_v33 = vpop.xlane.xlu1 %1204 }
 0x5b2   :  { %4099 = vrcp.f32 %v1205_v33 }
 0x5b3   :  { %v1398_v15 = vpop.f32.mrf.mxu2 }
 0x5b4   :  { %v5906_v39 = vadd.f32 %v3885_v56, %v1398_v15  ;;  %v1219_v56 = vmul.f32 %v4096_v53, %v5661_v43  ;;  %v2206_v43 = vsel %vm622_vm6, %v5921_v50, -inf  ;;  %v1727_v53 = vpop.xlane.xlu0 %1726 }
 0x5b6   :  { %v1421_v0 = vsel %vm622_vm6, %v5906_v39, -inf  ;;  %v1224_v15 = vpack.c.bf16 %v1219_v56, %v1218_v38 }
 0x5b7   :  { %1982 = vadd.xlane.f32.xlu2 %v1981_v51  ;;  %v4098_v51 = vpop.eup %4097 }
 0x5b8   :  { %1422 = vmax.xlane.f32.xlu0 %v1421_v0  ;;  %v6907_v0 = vunpack.c.h.bf16 %v5916_v42  ;;  %v4100_v38 = vpop.eup %4099  ;;  %v1220_v10 = vmul.f32 %v4098_v51, %v5739_v55 }
 0x5b9   :  { %v1221_v33 = vmul.f32 %v4100_v38, %v5741_v45 }
 0x5bb   :  { %v1401_v54 = vpop.f32.mrf.mxu2  ;;  %3610 = vmatmul.msk.bf16.gmra.mxu3 %vm622_vm6, %v1224_v15 }
 0x5bc   :  { %v5927_v63 = vadd.f32 %v6906_v22, %v1401_v54  ;;  %v1730_v15 = vpop.xlane.xlu0 %1729  ;;  %v1225_v54 = vpack.c.bf16 %v1221_v33, %v1220_v10  ;;  %v1739_v10 = vpop.xlane.xlu1 %1738 }
 0x5bd   :  { %4101 = vrcp.f32 %v1730_v15 }
 0x5be   :  { %v1424_v9 = vsel %vm622_vm6, %v5927_v63, -inf  ;;  %4103 = vrcp.f32 %v1727_v53 }
 0x5bf   :  { %2207 = vmax.xlane.f32.xlu2 %v2206_v43  ;;  %v1733_v43 = vpop.xlane.xlu2 %1732 }
 0x5c0   :  { %1425 = vmax.xlane.f32.xlu0 %v1424_v9 }
 0x5c3   :  { %v1403_v31 = vpop.f32.mrf.mxu2  ;;  %v4102_v9 = vpop.eup %4101 }
 0x5c4   :  { %v5936_v56 = vadd.f32 %v6907_v0, %v1403_v31  ;;  %v4104_v41 = vpop.eup %4103  ;;  %v1758_v31 = vmul.f32 %v4102_v9, %v5703_v52  ;;  %v5955_v33 = vpop.xlane.xlu1 %2468 }
 0x5c5   :  { %v1757_v22 = vmul.f32 %v4104_v41, %v5681_v19 }
 0x5c6   :  { %v1427_v24 = vsel %vm622_vm6, %v5936_v56, -inf }
 0x5c7   :  { %v1765_v0 = vpack.c.bf16 %v1758_v31, %v1757_v22  ;;  %v1736_v28 = vpop.xlane.xlu2 %1735 }
 0x5c8   :  { %1428 = vmax.xlane.f32.xlu0 %v1427_v24  ;;  %4105 = vrcp.f32 %v1736_v28 }
 0x5c9   :  { %4107 = vrcp.f32 %v1733_v43 }
 0x5cb   :  { %3611 = vmatmul.msk.bf16.gmra.mxu3 %vm622_vm6, %v1225_v54 }
 0x5cc   :  { %v1748_v31 = vpop.xlane.xlu1 %1747 }
 0x5ce   :  { %v4106_v55 = vpop.eup %4105 }
 0x5cf   :  { %v4108_v45 = vpop.eup %4107  ;;  %v1760_v51 = vmul.f32 %v4106_v55, %v5770_v8  ;;  %v1742_v53 = vpop.xlane.xlu2 %1741 }
 0x5d0   :  { %v1759_v38 = vmul.f32 %v4108_v45, %v5752_v14  ;;  %4109 = vrcp.f32 %v1742_v53 }
 0x5d1   :  { %4111 = vrcp.f32 %v1739_v10 }
 0x5d2   :  { %v1766_v24 = vpack.c.bf16 %v1760_v51, %v1759_v38 }
 0x5d4   :  { %v5969_v53 = vpop.xlane.xlu1 %2204 }
 0x5d6   :  { %v4110_v19 = vpop.eup %4109 }
 0x5d7   :  { %v4112_v52 = vpop.eup %4111  ;;  %v1762_v41 = vmul.f32 %v4110_v19, %v5782_v48 }
 0x5d8   :  { %v1761_v28 = vmul.f32 %v4112_v52, %v5754_v16 }
 0x5da   :  { %v1767_v22 = vpack.c.bf16 %v1762_v41, %v1761_v28 }
 0x5db   :  { %3632 = vmatmul.msk.bf16.vlgmr.msra.gmra.mxu3 %vm622_vm6, %v1765_v0  ;;  %v5952_v0 = vpop.xlane.xlu0 %2201 }
 0x5eb   :  { %3633 = vmatmul.msk.bf16.gmra.mxu3 %vm622_vm6, %v1766_v24 }
 0x5fb   :  { %3634 = vmatmul.msk.bf16.gmra.mxu3 %vm622_vm6, %v1767_v22 }
 0x602   :  { %v1408_v8 = vpop.xlane.xlu2 %1407 }
 0x603   :  { %v1430_v14 = vsub.f32 %v5824_v21, %v1408_v8 }
 0x605   :  { %v1438_v15 = vmul.f32 1.442695, %v1430_v14 }
 0x607   :  { %4113 = vpow2.f32 %v1438_v15 }
 0x60a   :  { %v1411_v54 = vpop.xlane.xlu0 %1410  ;;  %v5962_v55 = vpop.xlane.xlu2 %2198 }
 0x60b   :  { %v1431_v43 = vsub.f32 %v5839_v1, %v1411_v54 }
 0x60d   :  { %v5958_v9 = vpop.eup %4113  ;;  %v1440_v48 = vmul.f32 1.442695, %v1431_v43 }
 0x60e   :  { %v1454_v16 = vsel %vm622_vm6, %v5958_v9, 0.0 }
 0x60f   :  { %1455 = vadd.xlane.f32.xlu0 %v1454_v16  ;;  %4115 = vpow2.f32 %v1440_v48 }
 0x612   :  { %v1414_v45 = vpop.xlane.xlu0 %1413 }
 0x613   :  { %v1432_v21 = vsub.f32 %v5854_v32, %v1414_v45 }
 0x615   :  { %v1442_v51 = vmul.f32 1.442695, %v1432_v21  ;;  %v5965_v38 = vpop.eup %4115  ;;  %v2450_v21 = vpop.f32.mrf.mxu0 }
 0x616   :  { %v1457_v1 = vsel %vm622_vm6, %v5965_v38, 0.0 }
 0x617   :  { %4117 = vpow2.f32 %v1442_v51  ;;  %1458 = vadd.xlane.f32.xlu1 %v1457_v1 }
 0x618   :  { %4119 = vrcp.f32 %v1748_v31 }
 0x61a   :  { %v1417_v24 = vpop.xlane.xlu2 %1416  ;;  %v1745_v10 = vpop.xlane.xlu0 %1744 }
 0x61b   :  { %v1433_v19 = vsub.f32 %v5870_v62, %v1417_v24  ;;  %4121 = vrcp.f32 %v1745_v10  ;;  %v2209_v10 = vsub.f32 %v5591_v47, %v5804_v26  ;;  %v6992_v47 = vunpack.c.h.bf16 %v5916_v42 }
 0x61d   :  { %v5972_v52 = vpop.eup %4117  ;;  %v1444_v41 = vmul.f32 1.442695, %v1433_v19 }
 0x61e   :  { %v1460_v32 = vsel %vm622_vm6, %v5972_v52, 0.0  ;;  %v4120_v28 = vpop.eup %4119  ;;  %v5976_v22 = vpop.f32.mrf.mxu3 }
 0x61f   :  { %4123 = vpow2.f32 %v1444_v41  ;;  %1461 = vadd.xlane.f32.xlu1 %v1460_v32  ;;  %v1764_v62 = vmul.f32 %v4120_v28, %v5786_v20 }
 0x621   :  { %v4122_v8 = vpop.eup %4121 }
 0x622   :  { %v5978_v14 = vpop.xlane.xlu2 %2471  ;;  %v1420_v15 = vpop.xlane.xlu1 %1419  ;;  %v1763_v54 = vmul.f32 %v4122_v8, %v5862_v4 }
 0x623   :  { %v1434_v43 = vsub.f32 %v5886_v3, %v1420_v15  ;;  %v1986_v48 = vpop.xlane.xlu0 %1985  ;;  %v2452_v8 = vpop.f32.mrf.mxu0 }
 0x624   :  { %v1768_v16 = vpack.c.bf16 %v1764_v62, %v1763_v54  ;;  %v2217_v54 = vmul.f32 1.442695, %v2209_v10  ;;  %v6007_v26 = vadd.f32 %v6992_v47, %v2452_v8 }
 0x625   :  { %v5983_v31 = vpop.eup %4123  ;;  %v1446_v45 = vmul.f32 1.442695, %v1434_v43 }
 0x626   :  { %3635 = vmatmul.msk.bf16.gmra.mxu3 %vm622_vm6, %v1768_v16  ;;  %v1463_v51 = vsel %vm622_vm6, %v5983_v31, 0.0  ;;  %v5988_v1 = vpop.f32.mrf.mxu3 }
 0x627   :  { %4125 = vpow2.f32 %v1446_v45  ;;  %1464 = vadd.xlane.f32.xlu1 %v1463_v51 }
 0x628   :  { %4127 = vrcp.f32 %v1986_v48 }
 0x62a   :  { %v1983_v4 = vpop.xlane.xlu2 %1982 }
 0x62b   :  { %4129 = vrcp.f32 %v1983_v4  ;;  %v1423_v20 = vpop.xlane.xlu0 %1422 }
 0x62c   :  { %v1435_v3 = vsub.f32 %v5906_v39, %v1423_v20 }
 0x62d   :  { %v5991_v24 = vpop.eup %4125 }
 0x62e   :  { %v1448_v19 = vmul.f32 1.442695, %v1435_v3  ;;  %v4128_v41 = vpop.eup %4127  ;;  %v5995_v32 = vpop.f32.mrf.mxu3  ;;  %v1466_v28 = vsel %vm622_vm6, %v5991_v24, 0.0 }
 0x62f   :  { %1467 = vadd.xlane.f32.xlu2 %v1466_v28  ;;  %v6000_v62 = vmul.f32 %v4128_v41, %v5881_v37  ;;  %v2476_v37 = vsel %vm622_vm6, %v6007_v26, -inf }
 0x630   :  { %4131 = vpow2.f32 %v1448_v19 }
 0x631   :  { %v4130_v15 = vpop.eup %4129  ;;  %4133 = vpow2.f32 %v2217_v54 }
 0x632   :  { %v6003_v39 = vmul.f32 %v4130_v15, %v5904_v25 }
 0x633   :  { %v1426_v43 = vpop.xlane.xlu0 %1425 }
 0x634   :  { %v1436_v48 = vsub.f32 %v5927_v63, %v1426_v43  ;;  %v2006_v16 = vpack.c.bf16 %v6000_v62, %v6003_v39  ;;  %v6993_v63 = vunpack.c.l.bf16 %v5916_v42 }
 0x636   :  { %v6012_v45 = vpop.eup %4131  ;;  %v1450_v51 = vmul.f32 1.442695, %v1436_v48  ;;  %v6014_v4 = vpop.f32.mrf.mxu3  ;;  %v6022_v20 = vadd.f32 %v6993_v63, %v2450_v21 }
 0x637   :  { %v1469_v25 = vsel %vm622_vm6, %v6012_v45, 0.0  ;;  %2477 = vmax.xlane.f32.xlu2 %v2476_v37  ;;  %v6024_v10 = vpop.eup %4133 }
 0x638   :  { %4135 = vpow2.f32 %v1450_v51  ;;  %1470 = vadd.xlane.f32.xlu1 %v1469_v25  ;;  %v2233_v15 = vsel %vm622_vm6, %v6024_v10, 0.0  ;;  %v2473_v54 = vsel %vm622_vm6, %v6022_v20, -inf  ;;  %v2210_v25 = vsub.f32 %v5573_v12, %v5828_v60 }
 0x63b   :  { %v1429_v3 = vpop.xlane.xlu0 %1428 }
 0x63c   :  { %v1437_v19 = vsub.f32 %v5936_v56, %v1429_v3  ;;  %v2219_v3 = vmul.f32 1.442695, %v2210_v25 }
 0x63e   :  { %v6027_v41 = vpop.eup %4135  ;;  %v1452_v28 = vmul.f32 1.442695, %v1437_v19  ;;  %v6029_v8 = vpop.f32.mrf.mxu3  ;;  %v2479_v19 = vsub.f32 %v5611_v5, %v5808_v18 }
 0x63f   :  { %v1472_v42 = vsel %vm622_vm6, %v6027_v41, 0.0  ;;  %2234 = vadd.xlane.f32.xlu2 %v2233_v15 }
 0x640   :  { %4137 = vpow2.f32 %v1452_v28  ;;  %2474 = vmax.xlane.f32.xlu1 %v2473_v54  ;;  %1473 = vadd.xlane.f32.xlu0 %v1472_v42  ;;  %v2480_v28 = vsub.f32 %v5627_v27, %v5814_v58 }
 0x641   :  { %4139 = vpow2.f32 %v2219_v3 }
 0x642   :  { %v2489_v42 = vmul.f32 1.442695, %v2480_v28 }
 0x646   :  { %v6037_v21 = vpop.eup %4137  ;;  %v6039_v56 = vpop.f32.mrf.mxu3 }
 0x647   :  { %v1475_v47 = vsel %vm622_vm6, %v6037_v21, 0.0  ;;  %v6063_v54 = vpop.eup %4139 }
 0x648   :  { %1476 = vadd.xlane.f32.xlu2 %v1475_v47  ;;  %v2236_v12 = vsel %vm622_vm6, %v6063_v54, 0.0 }
 0x64e   :  { %v6043_v43 = vpop.f32.mrf.mxu3 }
 0x654   :  { %2283 = vrot.lane.b32.xlu0 %v4907_v44, %s4317_s22 }
 0x656   :  { %v6047_v48 = vpop.f32.mrf.mxu3 }
 0x659   :  { %2553 = vrot.lane.b32.xlu1 %v4907_v44, %s4318_s26  ;;  %v2487_v44 = vmul.f32 1.442695, %v2479_v19 }
 0x65b   :  { %4141 = vpow2.f32 %v2487_v44 }
 0x65c   :  { %4143 = vpow2.f32 %v2489_v42 }
 0x65e   :  { %v1802_v51 = vpop.f32.mrf.mxu3 }
 0x65f   :  { %1822 = vst.msk [vmem:[#allocation2 + $0x40] sm:$0xff] %vm568_vm5, %v1802_v51 }
 0x660   :  { %2281 = vrot.lane.b32.xlu2 %v4887_v36, %s4317_s22 }
 0x661   :  { %v6067_v60 = vpop.eup %4141 }
 0x662   :  { %v2503_v27 = vsel %vm622_vm6, %v6067_v60, 0.0  ;;  %v6072_v58 = vpop.eup %4143 }
 0x663   :  { %v2506_v51 = vsel %vm622_vm6, %v6072_v58, 0.0 }
 0x666   :  { %v1804_v37 = vpop.f32.mrf.mxu3 }
 0x667   :  { %1823 = vst.msk [vmem:[#allocation2 + $0x48] sm:$0xff] %vm568_vm5, %v1804_v37 }
 0x66e   :  { %v1807_v63 = vpop.f32.mrf.mxu3 }
 0x66f   :  { %1824 = vst.msk [vmem:[#allocation2 + $0x50] sm:$0xff] %vm568_vm5, %v1807_v63 }
 0x676   :  { %v1809_v15 = vpop.f32.mrf.mxu3 }
 0x677   :  { %1825 = vst.msk [vmem:[#allocation2 + $0x58] sm:$0xff] %vm568_vm5, %v1809_v15  ;;  %v6082_v15 = vpop.xlane.xlu2 %2207 }
 0x67e   :  { %2237 = vadd.xlane.f32.xlu0 %v2236_v12  ;;  %v1812_v5 = vpop.f32.mrf.mxu3 }
 0x67f   :  { %1826 = vst.msk [vmem:[#allocation2 + $0x60] sm:$0xff] %vm568_vm5, %v1812_v5 }
 0x682   :  { %v1456_v18 = vpop.xlane.xlu0 %1455 }
 0x683   :  { %2504 = vadd.xlane.f32.xlu1 %v2503_v27  ;;  %4145 = vrcp.f32 %v1456_v18 }
 0x686   :  { %v1814_v47 = vpop.f32.mrf.mxu3 }
 0x687   :  { %1827 = vst.msk [vmem:[#allocation2 + $0x68] sm:$0xff] %vm568_vm5, %v1814_v47 }
 0x689   :  { %2507 = vadd.xlane.f32.xlu2 %v2506_v51  ;;  %v4146_v25 = vpop.eup %4145 }
 0x68a   :  { %v1459_v37 = vpop.xlane.xlu1 %1458  ;;  %v1486_v3 = vmul.f32 %v4146_v25, %v5958_v9 }
 0x68b   :  { %4147 = vrcp.f32 %v1459_v37 }
 0x691   :  { %v4148_v63 = vpop.eup %4147 }
 0x692   :  { %v1487_v19 = vmul.f32 %v4148_v63, %v5965_v38  ;;  %2551 = vrot.lane.b32.xlu0 %v4887_v36, %s4318_s26  ;;  %v1462_v44 = vpop.xlane.xlu1 %1461 }
 0x693   :  { %4149 = vrcp.f32 %v1462_v44 }
 0x694   :  { %v1494_v28 = vpack.c.bf16 %v1487_v19, %v1486_v3 }
 0x696   :  { %3624 = vmatmul.msk.bf16.vlgmr.msrb.gmra.mxu2 %vm622_vm6, %v1494_v28  ;;  %v2481_v28 = vsub.f32 %v5649_v7, %v5820_v6 }
 0x699   :  { %v4150_v9 = vpop.eup %4149 }
 0x69a   :  { %2549 = vrot.lane.b32.xlu0 %v4837_v13, %s4318_s26  ;;  %v1465_v42 = vpop.xlane.xlu1 %1464  ;;  %v1488_v38 = vmul.f32 %v4150_v9, %v5972_v52 }
 0x69b   :  { %4151 = vrcp.f32 %v1465_v42  ;;  %v2211_v42 = vsub.f32 %v5581_v61, %v5847_v59  ;;  %v2482_v61 = vsub.f32 %v5545_v29, %v5812_v46 }
 0x69c   :  { %2279 = vrot.lane.b32.xlu1 %v4837_v13, %s4317_s22 }
 0x6a1   :  { %2277 = vrot.lane.b32.xlu2 %v4814_v2, %s4317_s22  ;;  %v4152_v36 = vpop.eup %4151 }
 0x6a2   :  { %v1489_v12 = vmul.f32 %v4152_v36, %v5983_v31  ;;  %2547 = vrot.lane.b32.xlu0 %v4814_v2, %s4318_s26  ;;  %v1468_v5 = vpop.xlane.xlu2 %1467  ;;  %v2212_v2 = vsub.f32 %v5685_v23, %v5849_v17  ;;  %v2491_v17 = vmul.f32 1.442695, %v2481_v28  ;;  %v2483_v36 = vsub.f32 %v5774_v57, %v5955_v33 }
 0x6a3   :  { %4153 = vrcp.f32 %v1468_v5  ;;  %v2484_v5 = vsub.f32 %v5879_v11, %v5978_v14 }
 0x6a4   :  { %v1495_v27 = vpack.c.bf16 %v1489_v12, %v1488_v38  ;;  %v2223_v19 = vmul.f32 1.442695, %v2212_v2 }
 0x6a5   :  { %v2497_v46 = vmul.f32 1.442695, %v2484_v5 }
 0x6a6   :  { %3625 = vmatmul.msk.bf16.gmra.mxu2 %vm622_vm6, %v1495_v27 }
 0x6a9   :  { %v1817_v18 = vpop.f32.mrf.mxu3  ;;  %v4154_v51 = vpop.eup %4153 }
 0x6aa   :  { %1828 = vst.msk [vmem:[#allocation2 + $0x70] sm:$0xff] %vm568_vm5, %v1817_v18  ;;  %v6096_v13 = vpop.xlane.xlu2 %2477  ;;  %v1490_v31 = vmul.f32 %v4154_v51, %v5991_v24  ;;  %v2213_v24 = vsub.f32 %v5833_v34, %v5962_v55  ;;  %v2495_v55 = vmul.f32 1.442695, %v2483_v36  ;;  %v2493_v18 = vmul.f32 1.442695, %v2482_v61 }
 0x6ab   :  { %v1471_v47 = vpop.xlane.xlu1 %1470 }
 0x6ac   :  { %4155 = vrcp.f32 %v1471_v47  ;;  %v2225_v38 = vmul.f32 1.442695, %v2213_v24  ;;  %v6997_v24 = vld [vmem:[#allocation17_spill] sm:$0xff] }
 0x6b1   :  { %v1819_v37 = vpop.f32.mrf.mxu3 }
 0x6b2   :  { %v4156_v52 = vpop.eup %4155  ;;  %1829 = vst.msk [vmem:[#allocation2 + $0x78] sm:$0xff] %vm568_vm5, %v1819_v37  ;;  %v6103_v63 = vpop.xlane.xlu2 %2234 }
 0x6b3   :  { %v1491_v25 = vmul.f32 %v4156_v52, %v6012_v45  ;;  %v1474_v44 = vpop.xlane.xlu0 %1473  ;;  %v2221_v45 = vmul.f32 1.442695, %v2211_v42  ;;  %v2475_v7 = vpop.xlane.xlu1 %2474 }
 0x6b4   :  { %4157 = vrcp.f32 %v1474_v44 }
 0x6b5   :  { %v1496_v3 = vpack.c.bf16 %v1491_v25, %v1490_v31  ;;  %4159 = vpow2.f32 %v2223_v19 }
 0x6b7   :  { %3626 = vmatmul.msk.bf16.gmra.mxu2 %vm622_vm6, %v1496_v3 }
 0x6ba   :  { %v4158_v9 = vpop.eup %4157 }
 0x6bb   :  { %v1477_v23 = vpop.xlane.xlu2 %1476  ;;  %v6114_v12 = vpop.eup %4159  ;;  %v1492_v59 = vmul.f32 %v4158_v9, %v6027_v41  ;;  %v2216_v41 = vsub.f32 %v5921_v50, %v6082_v15  ;;  %v2485_v50 = vsub.f32 %v6022_v20, %v2475_v7  ;;  %v6995_v20 = vld [vmem:[#allocation14_spill] sm:$0xff] }
 0x6bc   :  { %4161 = vrcp.f32 %v1477_v23  ;;  %v2242_v57 = vsel %vm622_vm6, %v6114_v12, 0.0  ;;  %v6996_v23 = vld [vmem:[#allocation21_spill] sm:$0xff] }
 0x6bd   :  { %4163 = vpow2.f32 %v2491_v17  ;;  %v2231_v52 = vmul.f32 1.442695, %v2216_v41  ;;  %v2499_v3 = vmul.f32 1.442695, %v2485_v50  ;;  %v7004_v50 = vld [vmem:[#allocation9_spill] sm:$0xff] }
 0x6be   :  { %4165 = vpow2.f32 %v2221_v45  ;;  %v2215_v45 = vsub.f32 %v6997_v24, %v5969_v53 }
 0x6bf   :  { %4167 = vpow2.f32 %v2225_v38 }
 0x6c0   :  { %4169 = vrcp.f32 %v5860_v30  ;;  %v6994_v30 = vld [vmem:[#allocation18_spill] sm:$0xff]  ;;  %v2229_v61 = vmul.f32 1.442695, %v2215_v45 }
 0x6c1   :  { %4171 = vpow2.f32 %v2495_v55  ;;  %v2214_v47 = vsub.f32 %v6994_v30, %v5952_v0 }
 0x6c2   :  { %v4162_v6 = vpop.eup %4161  ;;  %4173 = vrcp.f32 %v5818_v40 }
 0x6c3   :  { %v1493_v34 = vmul.f32 %v4162_v6, %v6037_v21  ;;  %v6124_v27 = vpop.eup %4163  ;;  %4175 = vpow2.f32 %v2493_v18  ;;  %v2282_v51 = vpop.permute.xlu2 %2281  ;;  %v2227_v0 = vmul.f32 1.442695, %v2214_v47  ;;  %v7001_v47 = vld [vmem:[#allocation5_spill] sm:$0xff] }
 0x6c4   :  { %v6130_v11 = vpop.eup %4165  ;;  %v2509_v14 = vsel %vm622_vm6, %v6124_v27, 0.0  ;;  %4177 = vpow2.f32 %v2497_v46  ;;  %v7000_v46 = vld [vmem:[#allocation7_spill] sm:$0xff] }
 0x6c5   :  { %v1497_v33 = vpack.c.bf16 %v1493_v34, %v1492_v59  ;;  %v6134_v21 = vpop.eup %4167  ;;  %v2239_v15 = vsel %vm622_vm6, %v6130_v11, 0.0  ;;  %4179 = vpow2.f32 %v2231_v52  ;;  %v2486_v34 = vsub.f32 %v6007_v26, %v6096_v13  ;;  %v6999_v26 = vld [vmem:[#allocation20_spill] sm:$0xff] }
 0x6c6   :  { %2243 = vadd.xlane.f32.xlu1 %v2242_v57  ;;  %v2284_v29 = vpop.permute.xlu0 %2283  ;;  %v4170_v2 = vpop.eup %4169  ;;  %v2245_v40 = vsel %vm622_vm6, %v6134_v21, 0.0  ;;  %4181 = vpow2.f32 %v2227_v0 }
 0x6c7   :  { %3627 = vmatmul.msk.bf16.gmra.mxu2 %vm622_vm6, %v1497_v33  ;;  %2305 = vmatpush.bf16.msrb.mxu3 %v2284_v29  ;;  %v6144_v31 = vpop.eup %4171  ;;  %v1996_v44 = vmul.f32 %v4170_v2, %v6995_v20  ;;  %4183 = vpow2.f32 %v2499_v3  ;;  %v2501_v57 = vmul.f32 1.442695, %v2486_v34  ;;  %v6998_v29 = vpack.c.bf16 %v5896_v35, %v5893_v49  ;;  %v7003_v49 = vld [vmem:[#allocation4_spill] sm:$0xff]  ;;  %v7005_v2 = vld [vmem:[#allocation6_spill] sm:$0xff]  ;;  %v7010_v34 = vld [vmem:[#allocation15_spill] sm:$0xff] }
 0x6c8   :  { %v4174_v25 = vpop.eup %4173  ;;  %v2515_v28 = vsel %vm622_vm6, %v6144_v31, 0.0  ;;  %4185 = vpow2.f32 %v2229_v61 }
 0x6c9   :  { %v6146_v19 = vpop.eup %4175  ;;  %v1995_v17 = vmul.f32 %v4174_v25, %v6996_v23  ;;  %4187 = vpow2.f32 %v2501_v57 }
 0x6ca   :  { %2510 = vadd.xlane.f32.xlu2 %v2509_v14  ;;  %v6151_v42 = vpop.eup %4177  ;;  %v2512_v9 = vsel %vm622_vm6, %v6146_v19, 0.0  ;;  %4189 = vrcp.f32 %v6999_v26 }
 0x6cb   :  { %v2554_v37 = vpop.permute.xlu1 %2553  ;;  %2306 = vmatpush.bf16.msrb.mxu3 %v2282_v51  ;;  %v2003_v36 = vpack.c.bf16 %v1996_v44, %v1995_v17  ;;  %v2518_v38 = vsel %vm622_vm6, %v6151_v42, 0.0  ;;  %v6160_v6 = vpop.eup %4179  ;;  %4191 = vrcp.f32 %v7000_v46 }
 0x6cc   :  { %2575 = vmatpush.bf16.msrb.mxu2 %v2554_v37  ;;  %2240 = vadd.xlane.f32.xlu0 %v2239_v15  ;;  %v6163_v7 = vpop.eup %4181  ;;  %v2254_v53 = vsel %vm622_vm6, %v6160_v6, 0.0  ;;  %v7002_v37 = vld [vmem:[#allocation16_spill] sm:$0xff] }
 0x6cd   :  { %v6167_v59 = vpop.eup %4183  ;;  %v2248_v55 = vsel %vm622_vm6, %v6163_v7, 0.0 }
 0x6ce   :  { %2246 = vadd.xlane.f32.xlu1 %v2245_v40  ;;  %v2521_v5 = vsel %vm622_vm6, %v6167_v59, 0.0  ;;  %v6175_v33 = vpop.eup %4185 }
 0x6cf   :  { %v2251_v18 = vsel %vm622_vm6, %v6175_v33, 0.0  ;;  %v6184_v13 = vpop.eup %4187 }
 0x6d0   :  { %v2524_v41 = vsel %vm622_vm6, %v6184_v13, 0.0  ;;  %v4190_v14 = vpop.eup %4189 }
 0x6d1   :  { %v4192_v30 = vpop.eup %4191  ;;  %v2000_v51 = vmul.f32 %v4190_v14, %v7001_v47 }
 0x6d2   :  { %2516 = vadd.xlane.f32.xlu2 %v2515_v28  ;;  %v1999_v35 = vmul.f32 %v4192_v30, %v7003_v49 }
 0x6d4   :  { %2513 = vadd.xlane.f32.xlu0 %v2512_v9  ;;  %v2005_v52 = vpack.c.bf16 %v2000_v51, %v1999_v35 }
 0x6d6   :  { %2519 = vadd.xlane.f32.xlu1 %v2518_v38 }
 0x6d7   :  { %3648 = vmatmul.msk.bf16.vlgmr.msra.gmra.mxu2 %vm622_vm6, %v2003_v36  ;;  %v7009_v36 = vld [vmem:[#allocation12_spill] sm:$0xff] }
 0x6da   :  { %2255 = vadd.xlane.f32.xlu2 %v2254_v53 }
 0x6dc   :  { %2249 = vadd.xlane.f32.xlu0 %v2248_v55 }
 0x6de   :  { %2522 = vadd.xlane.f32.xlu1 %v2521_v5 }
 0x6e4   :  { %2252 = vadd.xlane.f32.xlu0 %v2251_v18 }
 0x6e7   :  { %3649 = vmatmul.msk.bf16.gmra.mxu2 %vm622_vm6, %v6998_v29 }
 0x6ec   :  { %2525 = vadd.xlane.f32.xlu0 %v2524_v41 }
 0x6f1   :  { %v2238_v15 = vpop.xlane.xlu0 %2237 }
 0x6f2   :  { %1015 = vrot.lane.b32.xlu2 %v7002_v37, %s4319_s6  ;;  %4193 = vrcp.f32 %v2238_v15 }
 0x6f3   :  { %4195 = vrcp.f32 %v6103_v63 }
 0x6f6   :  { %v2505_v0 = vpop.xlane.xlu1 %2504 }
 0x6f7   :  { %1017 = vrot.lane.b32.xlu1 %v7004_v50, %s4319_s6  ;;  %3650 = vmatmul.msk.bf16.gmra.mxu2 %vm622_vm6, %v2005_v52 }
 0x6fa   :  { %1289 = vrot.lane.b32.xlu2 %v5988_v1, %s4320_s10 }
 0x6fc   :  { %v2508_v25 = vpop.xlane.xlu2 %2507 }
 0x6fd   :  { %4197 = vrcp.f32 %v2508_v25 }
 0x6fe   :  { %4199 = vrcp.f32 %v2505_v0 }
 0x700   :  { %1287 = vrot.lane.b32.xlu0 %v5976_v22, %s4320_s10  ;;  %v4194_v22 = vpop.eup %4193 }
 0x701   :  { %v4196_v20 = vpop.eup %4195  ;;  %v2266_v28 = vmul.f32 %v4194_v22, %v6063_v54  ;;  %v7007_v54 = vld [vmem:[#allocation8_spill] sm:$0xff] }
 0x702   :  { %1019 = vrot.lane.b32.xlu2 %v7005_v2, %s4319_s6  ;;  %v2265_v62 = vmul.f32 %v4196_v20, %v6024_v10 }
 0x703   :  { %v4198_v44 = vpop.eup %4197 }
 0x704   :  { %v2552_v40 = vpop.permute.xlu0 %2551  ;;  %v4200_v23 = vpop.eup %4199  ;;  %v2536_v63 = vmul.f32 %v4198_v44, %v6072_v58 }
 0x705   :  { %2576 = vmatpush.bf16.msrb.mxu2 %v2552_v40  ;;  %v2278_v39 = vpop.permute.xlu2 %2277  ;;  %v2535_v17 = vmul.f32 %v4200_v23, %v6067_v60  ;;  %v7008_v60 = vld [vmem:[#allocation13_spill] sm:$0xff] }
 0x707   :  { %3651 = vmatmul.msk.bf16.gmra.mxu2 %vm622_vm6, %v2006_v16  ;;  %v7006_v16 = vld [vmem:[#allocation11_spill] sm:$0xff]  ;;  %v2543_v45 = vpack.c.bf16 %v2536_v63, %v2535_v17 }
 0x70a   :  { %1293 = vrot.lane.b32.xlu2 %v6014_v4, %s4320_s10  ;;  %v2273_v4 = vpack.c.bf16 %v2266_v28, %v2265_v62 }
 0x70c   :  { %v2550_v1 = vpop.permute.xlu0 %2549 }
 0x70d   :  { %2577 = vmatpush.bf16.msrb.mxu2 %v2550_v1 }
 0x70e   :  { %v2280_v3 = vpop.permute.xlu1 %2279 }
 0x70f   :  { %2307 = vmatpush.bf16.msrb.mxu3 %v2280_v3 }
 0x712   :  { %1023 = vrot.lane.b32.xlu2 %v7006_v16, %s4319_s6 }
 0x713   :  { %2308 = vmatpush.bf16.msrb.mxu3 %v2278_v39 }
 0x714   :  { %v2548_v24 = vpop.permute.xlu0 %2547 }
 0x715   :  { %2578 = vmatpush.bf16.msrb.mxu2 %v2548_v24 }
 0x716   :  { %3664 = vmatmul.msk.bf16.vlgmr.msrb.gmra.mxu3 %vm622_vm6, %v2273_v4 }
 0x718   :  { %3680 = vmatmul.msk.bf16.vlgmr.msrb.gmra.mxu2 %vm622_vm6, %v2543_v45 }
 0x719   :  { %v1531_v10 = vpop.f32.mrf.mxu2 }
 0x71a   :  { %1297 = vrot.lane.b32.xlu2 %v6039_v56, %s4320_s10  ;;  %1559 = vrot.lane.b32.xlu0 %v1531_v10, %s4321_s11 }
 0x721   :  { %v1533_v58 = vpop.f32.mrf.mxu2 }
 0x722   :  { %1027 = vrot.lane.b32.xlu2 %v7007_v54, %s4319_s6  ;;  %1021 = vrot.lane.b32.xlu0 %v7008_v60, %s4319_s6 }
 0x723   :  { %1561 = vrot.lane.b32.xlu1 %v1533_v58, %s4321_s11 }
 0x729   :  { %v1536_v9 = vpop.f32.mrf.mxu2 }
 0x72a   :  { %1301 = vrot.lane.b32.xlu2 %v6047_v48, %s4320_s10  ;;  %1563 = vrot.lane.b32.xlu0 %v1536_v9, %s4321_s11 }
 0x72b   :  { %1291 = vrot.lane.b32.xlu1 %v5995_v32, %s4320_s10 }
 0x731   :  { %v1538_v56 = vpop.f32.mrf.mxu2 }
 0x732   :  { %1025 = vrot.lane.b32.xlu0 %v7009_v36, %s4319_s6 }
 0x733   :  { %1565 = vrot.lane.b32.xlu1 %v1538_v56, %s4321_s11 }
 0x739   :  { %v2244_v61 = vpop.xlane.xlu1 %2243 }
 0x73a   :  { %v1541_v38 = vpop.f32.mrf.mxu2  ;;  %4201 = vrcp.f32 %v2244_v61 }
 0x73b   :  { %1295 = vrot.lane.b32.xlu1 %v6029_v8, %s4320_s10  ;;  %1567 = vrot.lane.b32.xlu0 %v1541_v38, %s4321_s11 }
 0x73d   :  { %v2511_v48 = vpop.xlane.xlu2 %2510 }
 0x73f   :  { %v2241_v53 = vpop.xlane.xlu0 %2240 }
 0x740   :  { %4203 = vrcp.f32 %v2241_v53  ;;  %v4202_v55 = vpop.eup %4201 }
 0x741   :  { %4205 = vrcp.f32 %v2511_v48  ;;  %v2268_v18 = vmul.f32 %v4202_v55, %v6114_v12  ;;  %v2247_v29 = vpop.xlane.xlu1 %2246 }
 0x742   :  { %v1543_v32 = vpop.f32.mrf.mxu2 }
 0x743   :  { %1029 = vrot.lane.b32.xlu0 %v7010_v34, %s4319_s6  ;;  %1569 = vrot.lane.b32.xlu1 %v1543_v32, %s4321_s11 }
 0x745   :  { %v2517_v5 = vpop.xlane.xlu2 %2516 }
 0x746   :  { %v4204_v57 = vpop.eup %4203 }
 0x747   :  { %v2267_v8 = vmul.f32 %v4204_v57, %v6130_v11  ;;  %v2514_v26 = vpop.xlane.xlu0 %2513  ;;  %v4206_v14 = vpop.eup %4205 }
 0x748   :  { %4207 = vrcp.f32 %v2514_v26  ;;  %v2537_v12 = vmul.f32 %v4206_v14, %v6124_v27 }
 0x749   :  { %v2274_v41 = vpack.c.bf16 %v2268_v18, %v2267_v8  ;;  %4209 = vrcp.f32 %v2247_v29  ;;  %v2520_v37 = vpop.xlane.xlu1 %2519 }
 0x74a   :  { %v1546_v46 = vpop.f32.mrf.mxu2 }
 0x74b   :  { %1299 = vrot.lane.b32.xlu1 %v6043_v43, %s4320_s10  ;;  %1571 = vrot.lane.b32.xlu0 %v1546_v46, %s4321_s11  ;;  %v3751_v43 = vld [vmem:[%s6852_s3 + $0x8] sm:$0xff] }
 0x74c   :  { %3665 = vmatmul.msk.bf16.gmra.mxu3 %vm622_vm6, %v2274_v41  ;;  %2711 = vmatpush.bf16.msra.mxu1 %v3751_v43 }
 0x74d   :  { %v2256_v30 = vpop.xlane.xlu2 %2255 }
 0x74e   :  { %v4208_v47 = vpop.eup %4207 }
 0x74f   :  { %v2538_v11 = vmul.f32 %v4208_v47, %v6146_v19  ;;  %v2250_v51 = vpop.xlane.xlu0 %2249  ;;  %v4210_v52 = vpop.eup %4209 }
 0x750   :  { %4211 = vrcp.f32 %v2250_v51  ;;  %v2269_v19 = vmul.f32 %v4210_v52, %v6134_v21 }
 0x751   :  { %v2544_v35 = vpack.c.bf16 %v2538_v11, %v2537_v12  ;;  %4213 = vrcp.f32 %v2520_v37  ;;  %v2523_v44 = vpop.xlane.xlu1 %2522 }
 0x752   :  { %v1548_v49 = vpop.f32.mrf.mxu2  ;;  %4215 = vrcp.f32 %v2517_v5 }
 0x753   :  { %1573 = vrot.lane.b32.xlu1 %v1548_v49, %s4321_s11  ;;  %3681 = vmatmul.msk.bf16.gmra.mxu2 %vm622_vm6, %v2544_v35 }
 0x755   :  { %v1016_v50 = vpop.permute.xlu2 %1015 }
 0x756   :  { %1040 = vst.msk [vmem:[#allocation2] sm:$0xff] %vm1039_vm7, %v1016_v50  ;;  %v4212_v27 = vpop.eup %4211 }
 0x757   :  { %v2270_v15 = vmul.f32 %v4212_v27, %v6163_v7  ;;  %v2253_v2 = vpop.xlane.xlu0 %2252  ;;  %v4214_v25 = vpop.eup %4213 }
 0x758   :  { %v4216_v22 = vpop.eup %4215  ;;  %4217 = vrcp.f32 %v2253_v2  ;;  %v2540_v3 = vmul.f32 %v4214_v25, %v6151_v42 }
 0x759   :  { %v2275_v0 = vpack.c.bf16 %v2270_v15, %v2269_v19  ;;  %4219 = vrcp.f32 %v2256_v30  ;;  %v2539_v20 = vmul.f32 %v4216_v22, %v6144_v31 }
 0x75a   :  { %v2040_v40 = vpop.f32.mrf.mxu2 }
 0x75b   :  { %2068 = vrot.lane.b32.xlu2 %v2040_v40, %s4319_s6  ;;  %v2545_v7 = vpack.c.bf16 %v2540_v3, %v2539_v20 }
 0x75c   :  { %3666 = vmatmul.msk.bf16.gmra.mxu3 %vm622_vm6, %v2275_v0 }
 0x75d   :  { %v1290_v1 = vpop.permute.xlu2 %1289 }
 0x75e   :  { %v4218_v23 = vpop.eup %4217 }
 0x75f   :  { %v2526_v21 = vpop.xlane.xlu0 %2525  ;;  %v4220_v62 = vpop.eup %4219  ;;  %v2271_v16 = vmul.f32 %v4218_v23, %v6175_v33 }
 0x760   :  { %4221 = vrcp.f32 %v2526_v21  ;;  %v2272_v42 = vmul.f32 %v4220_v62, %v6160_v6  ;;  %v3750_v6 = vld [vmem:[%s6852_s3] sm:$0xff] }
 0x761   :  { %4223 = vrcp.f32 %v2523_v44  ;;  %2712 = vmatpush.bf16.msra.mxu1 %v3750_v6 }
 0x762   :  { %v2042_v28 = vpop.f32.mrf.mxu2  ;;  %v2276_v4 = vpack.c.bf16 %v2272_v42, %v2271_v16 }
 0x763   :  { %2070 = vrot.lane.b32.xlu0 %v2042_v28, %s4319_s6  ;;  %3682 = vmatmul.msk.bf16.gmra.mxu2 %vm622_vm6, %v2545_v7 }
 0x765   :  { %v1020_v39 = vpop.permute.xlu2 %1019 }
 0x766   :  { %1042 = vst.msk [vmem:[#allocation2 + $0x10] sm:$0xff] %vm1039_vm7, %v1020_v39  ;;  %v4222_v17 = vpop.eup %4221 }
 0x767   :  { %v4224_v24 = vpop.eup %4223  ;;  %v2542_v33 = vmul.f32 %v4222_v17, %v6184_v13 }
 0x768   :  { %v2541_v10 = vmul.f32 %v4224_v24, %v6167_v59 }
 0x769   :  { %v1018_v31 = vpop.permute.xlu1 %1017 }
 0x76a   :  { %1041 = vst.msk [vmem:[#allocation2 + $0x8] sm:$0xff] %vm1039_vm7, %v1018_v31  ;;  %v2045_v63 = vpop.f32.mrf.mxu2  ;;  %v2546_v58 = vpack.c.bf16 %v2542_v33, %v2541_v10  ;;  %v6342_v33 = vld [vmem:[%s6850_s1] sm:$0xff] }
 0x76b   :  { %1313 = vst.msk [vmem:[#allocation2 + $0x8] sm:$0xff] %vm1311_vm8, %v1290_v1  ;;  %v6345_v10 = vperm.slane %v6342_v33, 4 }
 0x76c   :  { %3667 = vmatmul.msk.bf16.gmra.mxu3 %vm622_vm6, %v2276_v4 }
 0x76d   :  { %v1294_v45 = vpop.permute.xlu2 %1293 }
 0x772   :  { %v2047_v54 = vpop.f32.mrf.mxu2  ;;  %v1288_v60 = vpop.permute.xlu0 %1287 }
 0x773   :  { %1312 = vst.msk [vmem:[#allocation2] sm:$0xff] %vm1311_vm8, %v1288_v60  ;;  %3683 = vmatmul.msk.bf16.gmra.mxu2 %vm622_vm6, %v2546_v58 }
 0x775   :  { %v1024_v9 = vpop.permute.xlu2 %1023 }
 0x776   :  { %1044 = vst.msk [vmem:[#allocation2 + $0x20] sm:$0xff] %vm1039_vm7, %v1024_v9  ;;  %v4290_v9 = vld [vmem:[%s6848_s0] sm:$0xff] }
 0x77a   :  { %v6275_v56 = vpop.f32.mrf.mxu2 }
 0x77d   :  { %v1298_v13 = vpop.permute.xlu2 %1297 }
 0x782   :  { %v6277_v36 = vpop.f32.mrf.mxu2 }
 0x785   :  { %v1028_v59 = vpop.permute.xlu2 %1027 }
 0x786   :  { %1046 = vst.msk [vmem:[#allocation2 + $0x30] sm:$0xff] %vm1039_vm7, %v1028_v59 }
 0x78a   :  { %v6280_v38 = vpop.f32.mrf.mxu2 }
 0x78c   :  { %v1560_v61 = vpop.permute.xlu0 %1559 }
 0x78d   :  { %1584 = vst.msk [vmem:[#allocation2] sm:$0xff] %vm1583_vm9, %v1560_v61  ;;  %v1302_v30 = vpop.permute.xlu2 %1301  ;;  %v4291_v61 = vld [vmem:[%s6848_s0 + $0x8] sm:$0xff] }
 0x792   :  { %v6283_v48 = vpop.f32.mrf.mxu2 }
 0x794   :  { %v1022_v32 = vpop.permute.xlu0 %1021  ;;  %v2640_v18 = vld [vmem:[#allocation2] sm:$0xff] }
 0x795   :  { %v1562_v53 = vpop.permute.xlu1 %1561  ;;  %1043 = vst.msk [vmem:[#allocation2 + $0x18] sm:$0xff] %vm1039_vm7, %v1022_v32 }
 0x796   :  { %1585 = vst.msk [vmem:[#allocation2 + $0x8] sm:$0xff] %vm1583_vm9, %v1562_v53 }
 0x797   :  { %1315 = vst.msk [vmem:[#allocation2 + $0x18] sm:$0xff] %vm1311_vm8, %v1294_v45 }
 0x799   :  { %v2310_v34 = vpop.f32.mrf.mxu3 }
 0x79a   :  { %2338 = vrot.lane.b32.xlu1 %v2310_v34, %s4320_s10 }
 0x79b   :  { %v2580_v55 = vpop.f32.mrf.mxu2 }
 0x79c   :  { %2608 = vrot.lane.b32.xlu0 %v2580_v55, %s4321_s11  ;;  %v1564_v57 = vpop.permute.xlu0 %1563  ;;  %v4292_v55 = vld [vmem:[%s6848_s0 + $0x10] sm:$0xff] }
 0x79d   :  { %v1292_v5 = vpop.permute.xlu1 %1291  ;;  %v2641_v8 = vld [vmem:[#allocation2 + $0x8] sm:$0xff] }
 0x79e   :  { %1314 = vst.msk [vmem:[#allocation2 + $0x10] sm:$0xff] %vm1311_vm8, %v1292_v5  ;;  %v2656_v29 = vpack.c.bf16 %v2641_v8, %v2640_v18 }
 0x79f   :  { %1586 = vst.msk [vmem:[#allocation2 + $0x10] sm:$0xff] %vm1583_vm9, %v1564_v57 }
 0x7a0   :  { %3692 = vmatmul.msk.bf16.vlgmr.msra.gmra.mxu1 %vm44_vm0, %v2656_v29 }
 0x7a1   :  { %v2312_v26 = vpop.f32.mrf.mxu3 }
 0x7a2   :  { %2340 = vrot.lane.b32.xlu2 %v2312_v26, %s4320_s10  ;;  %v4293_v26 = vld [vmem:[%s6848_s0 + $0x18] sm:$0xff] }
 0x7a3   :  { %v2582_v46 = vpop.f32.mrf.mxu2 }
 0x7a4   :  { %2074 = vrot.lane.b32.xlu0 %v2047_v54, %s4319_s6  ;;  %2610 = vrot.lane.b32.xlu1 %v2582_v46, %s4321_s11  ;;  %v1026_v14 = vpop.permute.xlu0 %1025 }
 0x7a5   :  { %v1566_v41 = vpop.permute.xlu1 %1565  ;;  %1045 = vst.msk [vmem:[#allocation2 + $0x28] sm:$0xff] %vm1039_vm7, %v1026_v14 }
 0x7a6   :  { %1587 = vst.msk [vmem:[#allocation2 + $0x18] sm:$0xff] %vm1583_vm9, %v1566_v41  ;;  %v2642_v11 = vld [vmem:[#allocation2 + $0x10] sm:$0xff] }
 0x7a7   :  { %1317 = vst.msk [vmem:[#allocation2 + $0x28] sm:$0xff] %vm1311_vm8, %v1298_v13 }
 0x7aa   :  { %2072 = vrot.lane.b32.xlu2 %v2045_v63, %s4319_s6 }
 0x7ad   :  { %v1296_v47 = vpop.permute.xlu1 %1295  ;;  %v1568_v12 = vpop.permute.xlu0 %1567  ;;  %v2643_v51 = vld [vmem:[#allocation2 + $0x18] sm:$0xff] }
 0x7ae   :  { %1316 = vst.msk [vmem:[#allocation2 + $0x20] sm:$0xff] %vm1311_vm8, %v1296_v47  ;;  %v2657_v37 = vpack.c.bf16 %v2643_v51, %v2642_v11 }
 0x7af   :  { %1588 = vst.msk [vmem:[#allocation2 + $0x20] sm:$0xff] %vm1583_vm9, %v1568_v12  ;;  %v4294_v12 = vld [vmem:[%s6848_s0 + $0x20] sm:$0xff] }
 0x7b0   :  { %3693 = vmatmul.msk.bf16.gmra.mxu1 %vm44_vm0, %v2657_v37 }
 0x7b5   :  { %v1570_v49 = vpop.permute.xlu1 %1569  ;;  %v2069_v35 = vpop.permute.xlu2 %2068 }
 0x7b6   :  { %1589 = vst.msk [vmem:[#allocation2 + $0x28] sm:$0xff] %vm1583_vm9, %v1570_v49  ;;  %v1030_v43 = vpop.permute.xlu0 %1029  ;;  %v2644_v50 = vld [vmem:[#allocation2 + $0x20] sm:$0xff] }
 0x7b7   :  { %2092 = vst.msk [vmem:[#allocation2 + $0x40] sm:$0xff] %vm1039_vm7, %v2069_v35 }
 0x7b8   :  { %1047 = vst.msk [vmem:[#allocation2 + $0x38] sm:$0xff] %vm1039_vm7, %v1030_v43 }
 0x7b9   :  { %1319 = vst.msk [vmem:[#allocation2 + $0x38] sm:$0xff] %vm1311_vm8, %v1302_v30 }
 0x7bd   :  { %v1300_v52 = vpop.permute.xlu1 %1299  ;;  %v2645_v27 = vld [vmem:[#allocation2 + $0x28] sm:$0xff] }
 0x7be   :  { %1318 = vst.msk [vmem:[#allocation2 + $0x30] sm:$0xff] %vm1311_vm8, %v1300_v52  ;;  %v1572_v19 = vpop.permute.xlu0 %1571  ;;  %v2658_v15 = vpack.c.bf16 %v2645_v27, %v2644_v50  ;;  %v4295_v52 = vld [vmem:[%s6848_s0 + $0x28] sm:$0xff] }
 0x7bf   :  { %1590 = vst.msk [vmem:[#allocation2 + $0x30] sm:$0xff] %vm1583_vm9, %v1572_v19 }
 0x7c0   :  { %3694 = vmatmul.msk.bf16.gmra.mxu1 %vm44_vm0, %v2658_v15 }
 0x7c5   :  { %v1574_v2 = vpop.permute.xlu1 %1573 }
 0x7c6   :  { %1591 = vst.msk [vmem:[#allocation2 + $0x38] sm:$0xff] %vm1583_vm9, %v1574_v2  ;;  %v2646_v40 = vld [vmem:[#allocation2 + $0x30] sm:$0xff] }
 0x7cd   :  { %v2647_v0 = vld [vmem:[#allocation2 + $0x38] sm:$0xff] }
 0x7ce   :  { %v2659_v25 = vpack.c.bf16 %v2647_v0, %v2646_v40  ;;  %v4296_v0 = vld [vmem:[%s6848_s0 + $0x30] sm:$0xff] }
 0x7cf   :  { %v2315_v22 = vpop.f32.mrf.mxu3 }
 0x7d0   :  { %2342 = vrot.lane.b32.xlu1 %v2315_v22, %s4320_s10  ;;  %3695 = vmatmul.msk.bf16.gmra.mxu1 %vm44_vm0, %v2659_v25 }
 0x7d5   :  { %v2071_v1 = vpop.permute.xlu0 %2070 }
 0x7d6   :  { %2093 = vst.msk [vmem:[#allocation2 + $0x48] sm:$0xff] %vm1039_vm7, %v2071_v1  ;;  %v2585_v20 = vpop.f32.mrf.mxu2 }
 0x7d7   :  { %v2317_v3 = vpop.f32.mrf.mxu3  ;;  %2612 = vrot.lane.b32.xlu0 %v2585_v20, %s4321_s11 }
 0x7d8   :  { %2344 = vrot.lane.b32.xlu2 %v2317_v3, %s4320_s10 }
 0x7de   :  { %v2587_v21 = vpop.f32.mrf.mxu2 }
 0x7df   :  { %v2320_v44 = vpop.f32.mrf.mxu3  ;;  %2078 = vrot.lane.b32.xlu0 %v6277_v36, %s4319_s6  ;;  %2614 = vrot.lane.b32.xlu1 %v2587_v21, %s4321_s11 }
 0x7e0   :  { %2076 = vrot.lane.b32.xlu2 %v6275_v56, %s4319_s6 }
 0x7e6   :  { %v2590_v7 = vpop.f32.mrf.mxu2 }
 0x7e7   :  { %v2322_v28 = vpop.f32.mrf.mxu3  ;;  %2616 = vrot.lane.b32.xlu0 %v2590_v7, %s4321_s11  ;;  %2346 = vrot.lane.b32.xlu1 %v2320_v44, %s4320_s10 }
 0x7e8   :  { %2348 = vrot.lane.b32.xlu2 %v2322_v28, %s4320_s10 }
 0x7ee   :  { %v2592_v62 = vpop.f32.mrf.mxu2 }
 0x7ef   :  { %v2325_v23 = vpop.f32.mrf.mxu3  ;;  %2082 = vrot.lane.b32.xlu0 %v6283_v48, %s4319_s6  ;;  %2618 = vrot.lane.b32.xlu1 %v2592_v62, %s4321_s11 }
 0x7f0   :  { %2080 = vrot.lane.b32.xlu2 %v6280_v38, %s4319_s6 }
 0x7f6   :  { %v2595_v16 = vpop.f32.mrf.mxu2 }
 0x7f7   :  { %v2327_v39 = vpop.f32.mrf.mxu3  ;;  %2620 = vrot.lane.b32.xlu0 %v2595_v16, %s4321_s11  ;;  %2350 = vrot.lane.b32.xlu1 %v2325_v23, %s4320_s10 }
 0x7f8   :  { %2352 = vrot.lane.b32.xlu2 %v2327_v39, %s4320_s10 }
 0x7fc   :  { %v2341_v42 = vpop.permute.xlu2 %2340 }
 0x7fd   :  { %2363 = vst.msk [vmem:[#allocation2 + $0x48] sm:$0xff] %vm1311_vm8, %v2341_v42 }
 0x7fe   :  { %v2597_v31 = vpop.f32.mrf.mxu2 }
 0x7ff   :  { %2622 = vrot.lane.b32.xlu1 %v2597_v31, %s4321_s11 }
 0x804   :  { %v2073_v63 = vpop.permute.xlu2 %2072 }
 0x805   :  { %2094 = vst.msk [vmem:[#allocation2 + $0x50] sm:$0xff] %vm1039_vm7, %v2073_v63 }
 0x80c   :  { %v2339_v4 = vpop.permute.xlu1 %2338 }
 0x80d   :  { %2362 = vst.msk [vmem:[#allocation2 + $0x40] sm:$0xff] %vm1311_vm8, %v2339_v4 }
 0x80e   :  { %v2609_v17 = vpop.permute.xlu0 %2608 }
 0x80f   :  { %2632 = vst.msk [vmem:[#allocation2 + $0x40] sm:$0xff] %vm1583_vm9, %v2609_v17 }
 0x816   :  { %v2611_v24 = vpop.permute.xlu1 %2610  ;;  %v2075_v45 = vpop.permute.xlu0 %2074  ;;  %v2648_v6 = vld [vmem:[#allocation2 + $0x40] sm:$0xff] }
 0x817   :  { %2633 = vst.msk [vmem:[#allocation2 + $0x48] sm:$0xff] %vm1583_vm9, %v2611_v24 }
 0x818   :  { %2095 = vst.msk [vmem:[#allocation2 + $0x58] sm:$0xff] %vm1039_vm7, %v2075_v45 }
 0x81d   :  { %v2714_v54 = vpop.f32.mrf.mxu1 }
 0x81e   :  { %v2715_v58 = vadd.f32 %v2714_v54, %v6345_v10  ;;  %v2649_v60 = vld [vmem:[#allocation2 + $0x48] sm:$0xff] }
 0x81f   :  { %v2660_v13 = vpack.c.bf16 %v2649_v60, %v2648_v6  ;;  %v7011_v6 = vld [vmem:[#allocation3_spill] sm:$0xff] }
 0x820   :  { %v6351_v56 = vadd.f32 %v4290_v9, %v2715_v58 }
 0x821   :  { %3696 = vmatmul.msk.bf16.gmra.mxu1 %vm44_vm0, %v2660_v13 }
 0x822   :  { %v2770_v36 = vsel %vm44_vm0, %v6351_v56, 0.0 }
 0x823   :  { %2771 = vadd.xlane.f32.xlu2 %v2770_v36 }
 0x825   :  { %v2716_v59 = vpop.f32.mrf.mxu1 }
 0x826   :  { %v2717_v38 = vadd.f32 %v2716_v59, %v6345_v10 }
 0x828   :  { %v6360_v48 = vadd.f32 %v4291_v61, %v2717_v38 }
 0x82a   :  { %v2773_v53 = vsel %vm44_vm0, %v6360_v48, 0.0 }
 0x82b   :  { %2774 = vadd.xlane.f32.xlu0 %v2773_v53 }
 0x82d   :  { %v2719_v32 = vpop.f32.mrf.mxu1 }
 0x82e   :  { %v2720_v34 = vadd.f32 %v2719_v32, %v6345_v10 }
 0x830   :  { %v6368_v5 = vadd.f32 %v4292_v55, %v2720_v34  ;;  %v4297_v34 = vld [vmem:[%s6848_s0 + $0x38] sm:$0xff] }
 0x832   :  { %v2345_v57 = vpop.permute.xlu2 %2344  ;;  %v2776_v18 = vsel %vm44_vm0, %v6368_v5, 0.0 }
 0x833   :  { %2365 = vst.msk [vmem:[#allocation2 + $0x58] sm:$0xff] %vm1311_vm8, %v2345_v57  ;;  %2777 = vadd.xlane.f32.xlu1 %v2776_v18 }
 0x835   :  { %v2721_v8 = vpop.f32.mrf.mxu1 }
 0x836   :  { %v2722_v29 = vadd.f32 %v2721_v8, %v6345_v10 }
 0x838   :  { %v6377_v46 = vadd.f32 %v4293_v26, %v2722_v29 }
 0x83a   :  { %v2077_v41 = vpop.permute.xlu2 %2076  ;;  %v2779_v14 = vsel %vm44_vm0, %v6377_v46, 0.0 }
 0x83b   :  { %2096 = vst.msk [vmem:[#allocation2 + $0x60] sm:$0xff] %vm1039_vm7, %v2077_v41  ;;  %2780 = vadd.xlane.f32.xlu2 %v2779_v14 }
 0x83d   :  { %v2724_v30 = vpop.f32.mrf.mxu1 }
 0x83e   :  { %v2725_v47 = vadd.f32 %v2724_v30, %v6345_v10  ;;  %v4298_v30 = vld [vmem:[%s6848_s0 + $0x40] sm:$0xff] }
 0x840   :  { %v6386_v11 = vadd.f32 %v4294_v12, %v2725_v47 }
 0x842   :  { %v2343_v51 = vpop.permute.xlu1 %2342  ;;  %v2349_v37 = vpop.permute.xlu2 %2348  ;;  %v2782_v49 = vsel %vm44_vm0, %v6386_v11, 0.0 }
 0x843   :  { %2364 = vst.msk [vmem:[#allocation2 + $0x50] sm:$0xff] %vm1311_vm8, %v2343_v51  ;;  %2783 = vadd.xlane.f32.xlu0 %v2782_v49 }
 0x845   :  { %v2726_v35 = vpop.f32.mrf.mxu1 }
 0x846   :  { %v2727_v43 = vadd.f32 %v2726_v35, %v6345_v10 }
 0x848   :  { %v6395_v50 = vadd.f32 %v4295_v52, %v2727_v43 }
 0x849   :  { %v2613_v19 = vpop.permute.xlu0 %2612 }
 0x84a   :  { %v2081_v27 = vpop.permute.xlu2 %2080  ;;  %v2785_v15 = vsel %vm44_vm0, %v6395_v50, 0.0  ;;  %2634 = vst.msk [vmem:[#allocation2 + $0x50] sm:$0xff] %vm1583_vm9, %v2613_v19  ;;  %v4299_v19 = vld [vmem:[%s6848_s0 + $0x48] sm:$0xff] }
 0x84b   :  { %2098 = vst.msk [vmem:[#allocation2 + $0x70] sm:$0xff] %vm1039_vm7, %v2081_v27  ;;  %2786 = vadd.xlane.f32.xlu1 %v2785_v15 }
 0x84d   :  { %v2729_v2 = vpop.f32.mrf.mxu1 }
 0x84e   :  { %v2730_v40 = vadd.f32 %v2729_v2, %v6345_v10 }
 0x850   :  { %v6405_v25 = vadd.f32 %v4296_v0, %v2730_v40 }
 0x851   :  { %v2079_v22 = vpop.permute.xlu0 %2078  ;;  %v2615_v3 = vpop.permute.xlu1 %2614  ;;  %v2650_v21 = vld [vmem:[#allocation2 + $0x50] sm:$0xff] }
 0x852   :  { %v2788_v1 = vsel %vm44_vm0, %v6405_v25, 0.0  ;;  %2097 = vst.msk [vmem:[#allocation2 + $0x68] sm:$0xff] %vm1039_vm7, %v2079_v22  ;;  %v2353_v39 = vpop.permute.xlu2 %2352 }
 0x853   :  { %2789 = vadd.xlane.f32.xlu1 %v2788_v1  ;;  %2635 = vst.msk [vmem:[#allocation2 + $0x58] sm:$0xff] %vm1583_vm9, %v2615_v3 }
 0x854   :  { %2367 = vst.msk [vmem:[#allocation2 + $0x68] sm:$0xff] %vm1311_vm8, %v2349_v37 }
 0x855   :  { %v2731_v9 = vpop.f32.mrf.mxu1 }
 0x856   :  { %v2732_v59 = vadd.f32 %v2731_v9, %v6345_v10 }
 0x858   :  { %v6435_v55 = vadd.f32 %v4297_v34, %v2732_v59 }
 0x859   :  { %v2617_v20 = vpop.permute.xlu0 %2616  ;;  %v2347_v44 = vpop.permute.xlu1 %2346 }
 0x85a   :  { %v2651_v28 = vld [vmem:[#allocation2 + $0x58] sm:$0xff]  ;;  %2366 = vst.msk [vmem:[#allocation2 + $0x60] sm:$0xff] %vm1311_vm8, %v2347_v44  ;;  %v2791_v29 = vsel %vm44_vm0, %v6435_v55, 0.0 }
 0x85b   :  { %v2661_v7 = vpack.c.bf16 %v2651_v28, %v2650_v21  ;;  %2636 = vst.msk [vmem:[#allocation2 + $0x60] sm:$0xff] %vm1583_vm9, %v2617_v20 }
 0x85d   :  { %3697 = vmatmul.msk.bf16.gmra.mxu1 %vm44_vm0, %v2661_v7 }
 0x861   :  { %v2083_v23 = vpop.permute.xlu0 %2082  ;;  %v2619_v62 = vpop.permute.xlu1 %2618 }
 0x862   :  { %2099 = vst.msk [vmem:[#allocation2 + $0x78] sm:$0xff] %vm1039_vm7, %v2083_v23  ;;  %v2652_v31 = vld [vmem:[#allocation2 + $0x60] sm:$0xff] }
 0x863   :  { %2637 = vst.msk [vmem:[#allocation2 + $0x68] sm:$0xff] %vm1583_vm9, %v2619_v62 }
 0x864   :  { %2369 = vst.msk [vmem:[#allocation2 + $0x78] sm:$0xff] %vm1311_vm8, %v2353_v39 }
 0x869   :  { %v2621_v16 = vpop.permute.xlu0 %2620  ;;  %v2351_v42 = vpop.permute.xlu1 %2350 }
 0x86a   :  { %v2653_v63 = vld [vmem:[#allocation2 + $0x68] sm:$0xff]  ;;  %2368 = vst.msk [vmem:[#allocation2 + $0x70] sm:$0xff] %vm1311_vm8, %v2351_v42 }
 0x86b   :  { %v2662_v4 = vpack.c.bf16 %v2653_v63, %v2652_v31  ;;  %2638 = vst.msk [vmem:[#allocation2 + $0x70] sm:$0xff] %vm1583_vm9, %v2621_v16 }
 0x86d   :  { %3698 = vmatmul.msk.bf16.gmra.mxu1 %vm44_vm0, %v2662_v4 }
 0x871   :  { %v2623_v17 = vpop.permute.xlu1 %2622 }
 0x872   :  { %2639 = vst.msk [vmem:[#allocation2 + $0x78] sm:$0xff] %vm1583_vm9, %v2623_v17  ;;  %v2654_v24 = vld [vmem:[#allocation2 + $0x70] sm:$0xff] }
 0x879   :  { %v2655_v45 = vld [vmem:[#allocation2 + $0x78] sm:$0xff] }
 0x87a   :  { %v2663_v54 = vpack.c.bf16 %v2655_v45, %v2654_v24  ;;  %v4300_v45 = vld [vmem:[%s6848_s0 + $0x50] sm:$0xff] }
 0x87d   :  { %3699 = vmatmul.msk.bf16.gmra.mxu1 %vm44_vm0, %v2663_v54 }
 0x896   :  { %v2772_v58 = vpop.xlane.xlu2 %2771 }
 0x897   :  { %v2818_v60 = vmul.f32 %v2772_v58, %v7011_v6 }
 0x899   :  { %v6425_v13 = vsub.f32 %v6351_v56, %v2818_v60 }
 0x89b   :  { %v2850_v36 = vmul.f32 %v6425_v13, %v6425_v13 }
 0x89d   :  { %v2866_v38 = vsel %vm44_vm0, %v2850_v36, 0.0  ;;  %v4301_v36 = vld [vmem:[%s6848_s0 + $0x58] sm:$0xff] }
 0x89e   :  { %2867 = vadd.xlane.f32.xlu2 %v2866_v38  ;;  %v2775_v61 = vpop.xlane.xlu0 %2774  ;;  %v2734_v32 = vpop.f32.mrf.mxu1 }
 0x89f   :  { %v2819_v53 = vmul.f32 %v2775_v61, %v7011_v6  ;;  %v2735_v8 = vadd.f32 %v2734_v32, %v6345_v10  ;;  %v4302_v32 = vld [vmem:[%s6848_s0 + $0x60] sm:$0xff] }
 0x8a1   :  { %v6438_v57 = vsub.f32 %v6360_v48, %v2819_v53  ;;  %v6450_v47 = vadd.f32 %v4298_v30, %v2735_v8 }
 0x8a3   :  { %v2851_v18 = vmul.f32 %v6438_v57, %v6438_v57  ;;  %v2794_v35 = vsel %vm44_vm0, %v6450_v47, 0.0 }
 0x8a5   :  { %v2869_v26 = vsel %vm44_vm0, %v2851_v18, 0.0 }
 0x8a6   :  { %v2778_v41 = vpop.xlane.xlu1 %2777  ;;  %2792 = vadd.xlane.f32.xlu2 %v2791_v29  ;;  %2870 = vadd.xlane.f32.xlu0 %v2869_v26  ;;  %v2736_v51 = vpop.f32.mrf.mxu1  ;;  %v4303_v26 = vld [vmem:[%s6848_s0 + $0x68] sm:$0xff] }
 0x8a7   :  { %v2820_v14 = vmul.f32 %v2778_v41, %v7011_v6  ;;  %v2737_v49 = vadd.f32 %v2736_v51, %v6345_v10 }
 0x8a9   :  { %v6453_v12 = vsub.f32 %v6368_v5, %v2820_v14  ;;  %v6465_v15 = vadd.f32 %v4299_v19, %v2737_v49 }
 0x8ab   :  { %v2852_v37 = vmul.f32 %v6453_v12, %v6453_v12  ;;  %v2797_v22 = vsel %vm44_vm0, %v6465_v15, 0.0 }
 0x8ad   :  { %v2872_v43 = vsel %vm44_vm0, %v2852_v37, 0.0  ;;  %v4304_v37 = vld [vmem:[%s6848_s0 + $0x70] sm:$0xff] }
 0x8ae   :  { %v2781_v52 = vpop.xlane.xlu2 %2780  ;;  %2795 = vadd.xlane.f32.xlu2 %v2794_v35  ;;  %2873 = vadd.xlane.f32.xlu0 %v2872_v43 }
 0x8af   :  { %v2821_v27 = vmul.f32 %v2781_v52, %v7011_v6  ;;  %v3753_v52 = vld [vmem:[%s6853_s4 + $0x8] sm:$0xff] }
 0x8b0   :  { %3211 = vmatpush.bf16.msra.mxu3 %v3753_v52 }
 0x8b1   :  { %v6468_v2 = vsub.f32 %v6377_v46, %v2821_v27 }
 0x8b3   :  { %v2853_v40 = vmul.f32 %v6468_v2, %v6468_v2 }
 0x8b5   :  { %v2875_v0 = vsel %vm44_vm0, %v2853_v40, 0.0  ;;  %v3752_v40 = vld [vmem:[%s6853_s4] sm:$0xff] }
 0x8b6   :  { %2876 = vadd.xlane.f32.xlu1 %v2875_v0  ;;  %2798 = vadd.xlane.f32.xlu0 %v2797_v22  ;;  %v2784_v1 = vpop.xlane.xlu0 %2783 }
 0x8b7   :  { %v2822_v3 = vmul.f32 %v2784_v1, %v7011_v6  ;;  %3212 = vmatpush.bf16.msra.mxu3 %v3752_v40 }
 0x8b9   :  { %v6477_v20 = vsub.f32 %v6386_v11, %v2822_v3 }
 0x8bb   :  { %v2854_v44 = vmul.f32 %v6477_v20, %v6477_v20 }
 0x8bd   :  { %v2878_v21 = vsel %vm44_vm0, %v2854_v44, 0.0 }
 0x8be   :  { %v2787_v28 = vpop.xlane.xlu1 %2786  ;;  %2879 = vadd.xlane.f32.xlu1 %v2878_v21 }
 0x8bf   :  { %v2823_v7 = vmul.f32 %v2787_v28, %v7011_v6 }
 0x8c1   :  { %v6484_v23 = vsub.f32 %v6395_v50, %v2823_v7 }
 0x8c3   :  { %v2855_v62 = vmul.f32 %v6484_v23, %v6484_v23 }
 0x8c5   :  { %v2881_v39 = vsel %vm44_vm0, %v2855_v62, 0.0 }
 0x8c6   :  { %v2790_v16 = vpop.xlane.xlu1 %2789  ;;  %2882 = vadd.xlane.f32.xlu2 %v2881_v39 }
 0x8c7   :  { %v2824_v42 = vmul.f32 %v2790_v16, %v7011_v6 }
 0x8c9   :  { %v6491_v31 = vsub.f32 %v6405_v25, %v2824_v42 }
 0x8cb   :  { %v2856_v63 = vmul.f32 %v6491_v31, %v6491_v31 }
 0x8cd   :  { %v2884_v4 = vsel %vm44_vm0, %v2856_v63, 0.0 }
 0x8ce   :  { %2885 = vadd.xlane.f32.xlu2 %v2884_v4 }
 0x8da   :  { %v2739_v17 = vpop.f32.mrf.mxu1 }
 0x8db   :  { %v2740_v24 = vadd.f32 %v2739_v17, %v6345_v10 }
 0x8dd   :  { %v6500_v54 = vadd.f32 %v4300_v45, %v2740_v24 }
 0x8df   :  { %v2800_v58 = vsel %vm44_vm0, %v6500_v54, 0.0 }
 0x8e0   :  { %2801 = vadd.xlane.f32.xlu0 %v2800_v58 }
 0x8e2   :  { %v2741_v60 = vpop.f32.mrf.mxu1 }
 0x8e3   :  { %v2742_v9 = vadd.f32 %v2741_v60, %v6345_v10 }
 0x8e5   :  { %v6508_v59 = vadd.f32 %v4301_v36, %v2742_v9 }
 0x8e7   :  { %v2803_v38 = vsel %vm44_vm0, %v6508_v59, 0.0 }
 0x8e8   :  { %2804 = vadd.xlane.f32.xlu1 %v2803_v38 }
 0x8ea   :  { %v2744_v61 = vpop.f32.mrf.mxu1 }
 0x8eb   :  { %v2745_v53 = vadd.f32 %v2744_v61, %v6345_v10 }
 0x8ed   :  { %v6516_v34 = vadd.f32 %v4302_v32, %v2745_v53 }
 0x8ef   :  { %v2806_v18 = vsel %vm44_vm0, %v6516_v34, 0.0 }
 0x8f0   :  { %2807 = vadd.xlane.f32.xlu1 %v2806_v18 }
 0x8f2   :  { %v2746_v8 = vpop.f32.mrf.mxu1 }
 0x8f3   :  { %v2747_v29 = vadd.f32 %v2746_v8, %v6345_v10 }
 0x8f5   :  { %v6524_v41 = vadd.f32 %v4303_v26, %v2747_v29 }
 0x8f7   :  { %v2809_v14 = vsel %vm44_vm0, %v6524_v41, 0.0 }
 0x8f8   :  { %2810 = vadd.xlane.f32.xlu2 %v2809_v14 }
 0x8fa   :  { %v2749_v30 = vpop.f32.mrf.mxu1 }
 0x8fb   :  { %v2750_v51 = vadd.f32 %v2749_v30, %v6345_v10 }
 0x8fd   :  { %v6532_v49 = vadd.f32 %v4304_v37, %v2750_v51 }
 0x8ff   :  { %v2812_v35 = vsel %vm44_vm0, %v6532_v49, 0.0 }
 0x900   :  { %2813 = vadd.xlane.f32.xlu2 %v2812_v35  ;;  %v6563_v35 = vperm.slane %v6342_v33, 2 }
 0x902   :  { %v2751_v36 = vpop.f32.mrf.mxu1 }
 0x903   :  { %v2752_v18 = vadd.f32 %v2751_v36, %v6345_v10  ;;  %v4305_v10 = vld [vmem:[%s6848_s0 + $0x78] sm:$0xff] }
 0x911   :  { %v2868_v43 = vpop.xlane.xlu2 %2867 }
 0x912   :  { %v2914_v27 = vmul.f32 %v2868_v43, %v7011_v6 }
 0x914   :  { %v2930_v19 = vadd.f32 1e-05, %v2914_v27  ;;  %v6568_v27 = vadd.f32 %v4305_v10, %v2752_v18 }
 0x916   :  { %4225 = vrsqrt.f32 %v2930_v19  ;;  %vm2952_vm11 = vweird.f32 %v2930_v19 }
 0x919   :  { %v2793_v0 = vpop.xlane.xlu2 %2792  ;;  %v2871_v22 = vpop.xlane.xlu0 %2870 }
 0x91a   :  { %v2825_v1 = vmul.f32 %v2793_v0, %v7011_v6  ;;  %v2915_v3 = vmul.f32 %v2871_v22, %v7011_v6 }
 0x91c   :  { %v4226_v44 = vpop.eup %4225  ;;  %v6546_v21 = vsub.f32 %v6435_v55, %v2825_v1  ;;  %v2931_v28 = vadd.f32 1e-05, %v2915_v3 }
 0x91d   :  { %v2947_v7 = vmul.f32 %v4226_v44, %v2930_v19  ;;  %vm2953_vm10 = vweird.f32 %v4226_v44 }
 0x91e   :  { %4227 = vrsqrt.f32 %v2931_v28  ;;  %v2857_v62 = vmul.f32 %v6546_v21, %v6546_v21  ;;  %vm2954_vm12 = vmor %vm2952_vm11, %vm2953_vm10  ;;  %vm2962_vm14 = vweird.f32 %v2931_v28 }
 0x91f   :  { %v2948_v39 = vmul.f32 %v4226_v44, %v2947_v7 }
 0x920   :  { %v2887_v16 = vsel %vm44_vm0, %v2857_v62, 0.0 }
 0x921   :  { %v2949_v42 = vmul.f32 0.5, %v2948_v39  ;;  %v2796_v63 = vpop.xlane.xlu2 %2795  ;;  %2888 = vadd.xlane.f32.xlu0 %v2887_v16  ;;  %v2874_v4 = vpop.xlane.xlu0 %2873  ;;  %v2815_v16 = vsel %vm44_vm0, %v6568_v27, 0.0 }
 0x922   :  { %v2826_v17 = vmul.f32 %v2796_v63, %v7011_v6  ;;  %v2916_v24 = vmul.f32 %v2874_v4, %v7011_v6 }
 0x923   :  { %v2950_v45 = vsub.f32 1.5, %v2949_v42 }
 0x924   :  { %v4228_v58 = vpop.eup %4227  ;;  %v6554_v60 = vsub.f32 %v6450_v47, %v2826_v17  ;;  %v2932_v9 = vadd.f32 1e-05, %v2916_v24 }
 0x925   :  { %v2951_v38 = vmul.f32 %v4226_v44, %v2950_v45  ;;  %v2957_v61 = vmul.f32 %v4228_v58, %v2931_v28  ;;  %vm2963_vm13 = vweird.f32 %v4228_v58 }
 0x926   :  { %4229 = vrsqrt.f32 %v2932_v9  ;;  %v2858_v53 = vmul.f32 %v6554_v60, %v6554_v60  ;;  %vm2964_vm15 = vmor %vm2962_vm14, %vm2963_vm13  ;;  %vm2972_vm2 = vweird.f32 %v2932_v9 }
 0x927   :  { %v2958_v32 = vmul.f32 %v4228_v58, %v2957_v61  ;;  %v2955_v29 = vsel %vm2954_vm12, %v4226_v44, %v2951_v38  ;;  %v6577_v44 = vperm.slane %v6342_v33, 3 }
 0x928   :  { %v2890_v8 = vsel %vm44_vm0, %v2858_v53, 0.0  ;;  %v3106_v19 = vmul.f32 %v2955_v29, %v6425_v13 }
 0x929   :  { %v2959_v26 = vmul.f32 0.5, %v2958_v32  ;;  %v2877_v14 = vpop.xlane.xlu1 %2876  ;;  %2891 = vadd.xlane.f32.xlu0 %v2890_v8  ;;  %v2799_v30 = vpop.xlane.xlu0 %2798 }
 0x92a   :  { %v2917_v51 = vmul.f32 %v2877_v14, %v7011_v6  ;;  %v2827_v37 = vmul.f32 %v2799_v30, %v7011_v6  ;;  %v3123_v39 = vmul.f32 %v6563_v35, %v3106_v19 }
 0x92b   :  { %v2960_v43 = vsub.f32 1.5, %v2959_v26 }
 0x92c   :  { %v4230_v52 = vpop.eup %4229  ;;  %v2933_v40 = vadd.f32 1e-05, %v2917_v51  ;;  %v6572_v0 = vsub.f32 %v6465_v15, %v2827_v37 }
 0x92d   :  { %v2961_v22 = vmul.f32 %v4228_v58, %v2960_v43  ;;  %v2967_v1 = vmul.f32 %v4230_v52, %v2932_v9  ;;  %vm2973_vm1 = vweird.f32 %v4230_v52 }
 0x92e   :  { %4231 = vrsqrt.f32 %v2933_v40  ;;  %v2859_v3 = vmul.f32 %v6572_v0, %v6572_v0  ;;  %vm2974_vm3 = vmor %vm2972_vm2, %vm2973_vm1  ;;  %vm2982_vm5 = vweird.f32 %v2933_v40 }
 0x92f   :  { %v2965_v7 = vsel %vm2964_vm15, %v4228_v58, %v2961_v22  ;;  %v2968_v62 = vmul.f32 %v4230_v52, %v2967_v1  ;;  %v3140_v58 = vadd.f32 %v6577_v44, %v3123_v39 }
 0x930   :  { %v3107_v13 = vmul.f32 %v2965_v7, %v6438_v57  ;;  %v2893_v28 = vsel %vm44_vm0, %v2859_v3, 0.0 }
 0x931   :  { %v2969_v42 = vmul.f32 0.5, %v2968_v62  ;;  %2816 = vadd.xlane.f32.xlu0 %v2815_v16  ;;  %v2880_v63 = vpop.xlane.xlu1 %2879  ;;  %2894 = vadd.xlane.f32.xlu1 %v2893_v28 }
 0x932   :  { %v3124_v4 = vmul.f32 %v6563_v35, %v3107_v13  ;;  %v2918_v17 = vmul.f32 %v2880_v63, %v7011_v6 }
 0x933   :  { %v2970_v24 = vsub.f32 1.5, %v2969_v42 }
 0x934   :  { %v4232_v45 = vpop.eup %4231  ;;  %v3141_v36 = vadd.f32 %v6577_v44, %v3124_v4  ;;  %v2934_v57 = vadd.f32 1e-05, %v2918_v17 }
 0x935   :  { %v2971_v38 = vmul.f32 %v4230_v52, %v2970_v24  ;;  %v2977_v61 = vmul.f32 %v4232_v45, %v2933_v40  ;;  %vm2983_vm4 = vweird.f32 %v4232_v45 }
 0x936   :  { %v3156_v53 = vpack.c.bf16 %v3141_v36, %v3140_v58  ;;  %4233 = vrsqrt.f32 %v2934_v57  ;;  %vm2984_vm6 = vmor %vm2982_vm5, %vm2983_vm4  ;;  %vm2992_vm8 = vweird.f32 %v2934_v57 }
 0x937   :  { %v2978_v32 = vmul.f32 %v4232_v45, %v2977_v61  ;;  %v2975_v18 = vsel %vm2974_vm3, %v4230_v52, %v2971_v38 }
 0x938   :  { %3708 = vmatmul.msk.bf16.vlgmr.msra.gmra.mxu3 %vm44_vm0, %v3156_v53  ;;  %v3108_v51 = vmul.f32 %v2975_v18, %v6453_v12 }
 0x939   :  { %v2979_v8 = vmul.f32 0.5, %v2978_v32  ;;  %v2883_v29 = vpop.xlane.xlu2 %2882 }
 0x93a   :  { %v2919_v26 = vmul.f32 %v2883_v29, %v7011_v6  ;;  %v3125_v52 = vmul.f32 %v6563_v35, %v3108_v51 }
 0x93b   :  { %v2980_v14 = vsub.f32 1.5, %v2979_v8 }
 0x93c   :  { %v4234_v30 = vpop.eup %4233  ;;  %v2935_v37 = vadd.f32 1e-05, %v2919_v26  ;;  %v3142_v39 = vadd.f32 %v6577_v44, %v3125_v52 }
 0x93d   :  { %v2981_v43 = vmul.f32 %v4232_v45, %v2980_v14  ;;  %v2987_v10 = vmul.f32 %v4234_v30, %v2934_v57  ;;  %vm2993_vm7 = vweird.f32 %v4234_v30 }
 0x93e   :  { %4235 = vrsqrt.f32 %v2935_v37  ;;  %vm2994_vm9 = vmor %vm2992_vm8, %vm2993_vm7  ;;  %vm3002_vm11 = vweird.f32 %v2935_v37 }
 0x93f   :  { %v2985_v9 = vsel %vm2984_vm6, %v4232_v45, %v2981_v43  ;;  %v2988_v19 = vmul.f32 %v4234_v30, %v2987_v10 }
 0x940   :  { %v3109_v22 = vmul.f32 %v2985_v9, %v6468_v2 }
 0x941   :  { %v2989_v1 = vmul.f32 0.5, %v2988_v19  ;;  %v2886_v51 = vpop.xlane.xlu2 %2885 }
 0x942   :  { %v3126_v3 = vmul.f32 %v6563_v35, %v3109_v22 }
 0x943   :  { %v2990_v7 = vsub.f32 1.5, %v2989_v1 }
 0x944   :  { %v4236_v62 = vpop.eup %4235  ;;  %v3143_v12 = vadd.f32 %v6577_v44, %v3126_v3 }
 0x945   :  { %v2991_v13 = vmul.f32 %v4234_v30, %v2990_v7  ;;  %v2997_v40 = vmul.f32 %v4236_v62, %v2935_v37  ;;  %vm3003_vm10 = vweird.f32 %v4236_v62 }
 0x946   :  { %v3157_v16 = vpack.c.bf16 %v3143_v12, %v3142_v39  ;;  %vm3004_vm12 = vmor %vm3002_vm11, %vm3003_vm10 }
 0x947   :  { %v2998_v28 = vmul.f32 %v4236_v62, %v2997_v40  ;;  %v2995_v2 = vsel %vm2994_vm9, %v4234_v30, %v2991_v13 }
 0x948   :  { %3709 = vmatmul.msk.bf16.gmra.mxu3 %vm44_vm0, %v3157_v16  ;;  %v3110_v4 = vmul.f32 %v2995_v2, %v6477_v20  ;;  %v2920_v16 = vmul.f32 %v2886_v51, %v7011_v6 }
 0x949   :  { %v2999_v42 = vmul.f32 0.5, %v2998_v28 }
 0x94a   :  { %v3127_v58 = vmul.f32 %v6563_v35, %v3110_v4  ;;  %v2936_v28 = vadd.f32 1e-05, %v2920_v16 }
 0x94b   :  { %v3000_v63 = vsub.f32 1.5, %v2999_v42 }
 0x94c   :  { %v3144_v38 = vadd.f32 %v6577_v44, %v3127_v58  ;;  %4237 = vrsqrt.f32 %v2936_v28  ;;  %vm3012_vm14 = vweird.f32 %v2936_v28 }
 0x94d   :  { %v3001_v17 = vmul.f32 %v4236_v62, %v3000_v63 }
 0x94f   :  { %v3005_v24 = vsel %vm3004_vm12, %v4236_v62, %v3001_v17 }
 0x950   :  { %v3111_v45 = vmul.f32 %v3005_v24, %v6484_v23 }
 0x952   :  { %v3128_v36 = vmul.f32 %v6563_v35, %v3111_v45  ;;  %v4238_v2 = vpop.eup %4237 }
 0x953   :  { %v2802_v57 = vpop.xlane.xlu0 %2801  ;;  %v3007_v42 = vmul.f32 %v4238_v2, %v2936_v28  ;;  %vm3013_vm13 = vweird.f32 %v4238_v2  ;;  %v3758_v28 = vld [vmem:[%s6854_s5 + $0x20] sm:$0xff] }
 0x954   :  { %v3145_v61 = vadd.f32 %v6577_v44, %v3128_v36  ;;  %v2828_v53 = vmul.f32 %v2802_v57, %v7011_v6  ;;  %vm3014_vm15 = vmor %vm3012_vm14, %vm3013_vm13 }
 0x955   :  { %v3008_v63 = vmul.f32 %v4238_v2, %v3007_v42 }
 0x956   :  { %v3158_v32 = vpack.c.bf16 %v3145_v61, %v3144_v38  ;;  %v6605_v20 = vsub.f32 %v6500_v54, %v2828_v53  ;;  %v3761_v38 = vld [vmem:[%s6854_s5 + $0x38] sm:$0xff] }
 0x957   :  { %v3009_v45 = vmul.f32 0.5, %v3008_v63  ;;  %3471 = vmatpush.bf16.msrb.mxu0 %v3761_v38 }
 0x958   :  { %3710 = vmatmul.msk.bf16.gmra.mxu3 %vm44_vm0, %v3158_v32  ;;  %v2860_v23 = vmul.f32 %v6605_v20, %v6605_v20 }
 0x959   :  { %v3010_v58 = vsub.f32 1.5, %v3009_v45 }
 0x95a   :  { %v2896_v18 = vsel %vm44_vm0, %v2860_v23, 0.0 }
 0x95b   :  { %v2805_v8 = vpop.xlane.xlu1 %2804  ;;  %2897 = vadd.xlane.f32.xlu1 %v2896_v18  ;;  %v3011_v32 = vmul.f32 %v4238_v2, %v3010_v58 }
 0x95c   :  { %v2829_v29 = vmul.f32 %v2805_v8, %v7011_v6  ;;  %v3760_v8 = vld [vmem:[%s6854_s5 + $0x30] sm:$0xff] }
 0x95d   :  { %3472 = vmatpush.bf16.msrb.mxu0 %v3760_v8 }
 0x95e   :  { %v6613_v26 = vsub.f32 %v6508_v59, %v2829_v29  ;;  %v3015_v29 = vsel %vm3014_vm15, %v4238_v2, %v3011_v32  ;;  %v3756_v32 = vld [vmem:[%s6854_s5 + $0x10] sm:$0xff] }
 0x960   :  { %v2861_v14 = vmul.f32 %v6613_v26, %v6613_v26 }
 0x962   :  { %v2899_v30 = vsel %vm44_vm0, %v2861_v14, 0.0 }
 0x963   :  { %2900 = vadd.xlane.f32.xlu2 %v2899_v30  ;;  %v2808_v37 = vpop.xlane.xlu1 %2807 }
 0x964   :  { %v2830_v43 = vmul.f32 %v2808_v37, %v7011_v6 }
 0x966   :  { %v6620_v10 = vsub.f32 %v6516_v34, %v2830_v43 }
 0x968   :  { %v2862_v9 = vmul.f32 %v6620_v10, %v6620_v10 }
 0x96a   :  { %v2902_v19 = vsel %vm44_vm0, %v2862_v9, 0.0 }
 0x96b   :  { %v2811_v22 = vpop.xlane.xlu2 %2810  ;;  %2903 = vadd.xlane.f32.xlu0 %v2902_v19  ;;  %v3759_v19 = vld [vmem:[%s6854_s5 + $0x28] sm:$0xff] }
 0x96c   :  { %v2831_v52 = vmul.f32 %v2811_v22, %v7011_v6  ;;  %3473 = vmatpush.bf16.msrb.mxu0 %v3759_v19 }
 0x96e   :  { %v6627_v1 = vsub.f32 %v6524_v41, %v2831_v52  ;;  %v3112_v52 = vmul.f32 %v3015_v29, %v6491_v31  ;;  %v3755_v29 = vld [vmem:[%s6854_s5 + $0x8] sm:$0xff] }
 0x970   :  { %v2863_v3 = vmul.f32 %v6627_v1, %v6627_v1  ;;  %v3129_v42 = vmul.f32 %v6563_v35, %v3112_v52  ;;  %3474 = vmatpush.bf16.msrb.mxu0 %v3758_v28 }
 0x972   :  { %v2905_v7 = vsel %vm44_vm0, %v2863_v3, 0.0  ;;  %v3146_v58 = vadd.f32 %v6577_v44, %v3129_v42 }
 0x973   :  { %v2814_v62 = vpop.xlane.xlu2 %2813  ;;  %2906 = vadd.xlane.f32.xlu1 %v2905_v7 }
 0x974   :  { %v2832_v39 = vmul.f32 %v2814_v62, %v7011_v6 }
 0x976   :  { %v6634_v12 = vsub.f32 %v6532_v49, %v2832_v39 }
 0x978   :  { %v2864_v13 = vmul.f32 %v6634_v12, %v6634_v12 }
 0x97a   :  { %v2908_v40 = vsel %vm44_vm0, %v2864_v13, 0.0 }
 0x97b   :  { %2909 = vadd.xlane.f32.xlu2 %v2908_v40 }
 0x994   :  { %v2889_v4 = vpop.xlane.xlu0 %2888 }
 0x995   :  { %v2921_v17 = vmul.f32 %v2889_v4, %v7011_v6 }
 0x997   :  { %v2937_v24 = vadd.f32 1e-05, %v2921_v17 }
 0x999   :  { %4239 = vrsqrt.f32 %v2937_v24  ;;  %vm3022_vm2 = vweird.f32 %v2937_v24 }
 0x99c   :  { %v2892_v36 = vpop.xlane.xlu0 %2891 }
 0x99d   :  { %v2922_v57 = vmul.f32 %v2892_v36, %v7011_v6 }
 0x99f   :  { %v4240_v61 = vpop.eup %4239  ;;  %v2938_v53 = vadd.f32 1e-05, %v2922_v57 }
 0x9a0   :  { %v3017_v23 = vmul.f32 %v4240_v61, %v2937_v24  ;;  %vm3023_vm1 = vweird.f32 %v4240_v61  ;;  %v3757_v24 = vld [vmem:[%s6854_s5 + $0x18] sm:$0xff] }
 0x9a1   :  { %4241 = vrsqrt.f32 %v2938_v53  ;;  %vm3024_vm3 = vmor %vm3022_vm2, %vm3023_vm1  ;;  %3475 = vmatpush.bf16.msrb.mxu0 %v3757_v24  ;;  %vm3032_vm5 = vweird.f32 %v2938_v53 }
 0x9a2   :  { %v3018_v18 = vmul.f32 %v4240_v61, %v3017_v23 }
 0x9a4   :  { %v3019_v14 = vmul.f32 0.5, %v3018_v18  ;;  %v2895_v30 = vpop.xlane.xlu1 %2894  ;;  %v2817_v51 = vpop.xlane.xlu0 %2816 }
 0x9a5   :  { %v2923_v37 = vmul.f32 %v2895_v30, %v7011_v6  ;;  %v2833_v43 = vmul.f32 %v2817_v51, %v7011_v6  ;;  %3476 = vmatpush.bf16.msrb.mxu0 %v3756_v32  ;;  %v6680_v30 = vperm.slane %v6342_v33, 6 }
 0x9a6   :  { %v3020_v9 = vsub.f32 1.5, %v3019_v14 }
 0x9a7   :  { %v4242_v22 = vpop.eup %4241  ;;  %v2939_v3 = vadd.f32 1e-05, %v2923_v37  ;;  %v6655_v7 = vsub.f32 %v6568_v27, %v2833_v43  ;;  %v3754_v37 = vld [vmem:[%s6854_s5] sm:$0xff] }
 0x9a8   :  { %v3021_v62 = vmul.f32 %v4240_v61, %v3020_v9  ;;  %v3027_v39 = vmul.f32 %v4242_v22, %v2938_v53  ;;  %vm3033_vm4 = vweird.f32 %v4242_v22 }
 0x9a9   :  { %4243 = vrsqrt.f32 %v2939_v3  ;;  %v2865_v13 = vmul.f32 %v6655_v7, %v6655_v7  ;;  %vm3034_vm6 = vmor %vm3032_vm5, %vm3033_vm4  ;;  %vm3042_vm8 = vweird.f32 %v2939_v3  ;;  %3477 = vmatpush.bf16.msrb.mxu0 %v3755_v29 }
 0x9aa   :  { %v3025_v40 = vsel %vm3024_vm3, %v4240_v61, %v3021_v62  ;;  %v3028_v16 = vmul.f32 %v4242_v22, %v3027_v39 }
 0x9ab   :  { %v3113_v31 = vmul.f32 %v3025_v40, %v6546_v21  ;;  %v2911_v2 = vsel %vm44_vm0, %v2865_v13, 0.0 }
 0x9ac   :  { %v3029_v63 = vmul.f32 0.5, %v3028_v16  ;;  %2912 = vadd.xlane.f32.xlu0 %v2911_v2 }
 0x9ad   :  { %v3130_v4 = vmul.f32 %v6563_v35, %v3113_v31  ;;  %3478 = vmatpush.bf16.msrb.mxu0 %v3754_v37 }
 0x9ae   :  { %v3030_v17 = vsub.f32 1.5, %v3029_v63 }
 0x9af   :  { %v4244_v45 = vpop.eup %4243  ;;  %v3147_v36 = vadd.f32 %v6577_v44, %v3130_v4 }
 0x9b0   :  { %v3031_v21 = vmul.f32 %v4242_v22, %v3030_v17  ;;  %v3037_v57 = vmul.f32 %v4244_v45, %v2939_v3  ;;  %vm3043_vm7 = vweird.f32 %v4244_v45 }
 0x9b1   :  { %v3159_v38 = vpack.c.bf16 %v3147_v36, %v3146_v58  ;;  %vm3044_vm9 = vmor %vm3042_vm8, %vm3043_vm7 }
 0x9b2   :  { %v3038_v61 = vmul.f32 %v4244_v45, %v3037_v57  ;;  %v3035_v23 = vsel %vm3034_vm6, %v4242_v22, %v3031_v21 }
 0x9b3   :  { %3711 = vmatmul.msk.bf16.gmra.mxu3 %vm44_vm0, %v3159_v38  ;;  %v3114_v14 = vmul.f32 %v3035_v23, %v6554_v60 }
 0x9b4   :  { %v3039_v18 = vmul.f32 0.5, %v3038_v61 }
 0x9b5   :  { %v3131_v19 = vmul.f32 %v6563_v35, %v3114_v14 }
 0x9b6   :  { %v3040_v8 = vsub.f32 1.5, %v3039_v18 }
 0x9b7   :  { %v3148_v33 = vadd.f32 %v6577_v44, %v3131_v19 }
 0x9b8   :  { %v3041_v53 = vmul.f32 %v4244_v45, %v3040_v8 }
 0x9ba   :  { %v3045_v51 = vsel %vm3044_vm9, %v4244_v45, %v3041_v53 }
 0x9bb   :  { %v3115_v43 = vmul.f32 %v3045_v51, %v6572_v0  ;;  %v3214_v9 = vpop.f32.mrf.mxu3 }
 0x9bc   :  { %v3215_v22 = vadd.f32 %v3214_v9, %v6680_v30 }
 0x9bd   :  { %v3132_v60 = vmul.f32 %v6563_v35, %v3115_v43 }
 0x9be   :  { %v3270_v52 = vmul.f32 0.044715, %v3215_v22  ;;  %v3254_v53 = vmul.f32 0.5, %v3215_v22 }
 0x9bf   :  { %v3149_v3 = vadd.f32 %v6577_v44, %v3132_v60 }
 0x9c0   :  { %v3286_v62 = vmul.f32 %v3270_v52, %v3215_v22 }
 0x9c1   :  { %v3160_v39 = vpack.c.bf16 %v3149_v3, %v3148_v33 }
 0x9c2   :  { %v3302_v13 = vmul.f32 %v3286_v62, %v3215_v22 }
 0x9c3   :  { %v3216_v40 = vpop.f32.mrf.mxu3  ;;  %3712 = vmatmul.msk.bf16.gmra.mxu3 %vm44_vm0, %v3160_v39 }
 0x9c4   :  { %v3318_v0 = vadd.f32 %v3302_v13, %v3215_v22  ;;  %v3217_v16 = vadd.f32 %v3216_v40, %v6680_v30 }
 0x9c6   :  { %v3271_v28 = vmul.f32 0.044715, %v3217_v16  ;;  %v3334_v31 = vmul.f32 0.7978846, %v3318_v0  ;;  %v3255_v51 = vmul.f32 0.5, %v3217_v16 }
 0x9c8   :  { %v3287_v2 = vmul.f32 %v3271_v28, %v3217_v16  ;;  %4245 = vtanh.f32 %v3334_v31 }
 0x9ca   :  { %v3303_v42 = vmul.f32 %v3287_v2, %v3217_v16 }
 0x9cb   :  { %v3219_v63 = vpop.f32.mrf.mxu3 }
 0x9cc   :  { %v3319_v4 = vadd.f32 %v3303_v42, %v3217_v16  ;;  %v3220_v17 = vadd.f32 %v3219_v63, %v6680_v30 }
 0x9ce   :  { %v3335_v24 = vmul.f32 0.7978846, %v3319_v4  ;;  %v3272_v45 = vmul.f32 0.044715, %v3220_v17  ;;  %v2898_v58 = vpop.xlane.xlu1 %2897  ;;  %v4246_v57 = vpop.eup %4245 }
 0x9cf   :  { %v2924_v21 = vmul.f32 %v2898_v58, %v7011_v6  ;;  %v3366_v8 = vadd.f32 1.0, %v4246_v57 }
 0x9d0   :  { %4247 = vtanh.f32 %v3335_v24  ;;  %v3288_v36 = vmul.f32 %v3272_v45, %v3220_v17 }
 0x9d1   :  { %v2940_v38 = vadd.f32 1e-05, %v2924_v21  ;;  %v3382_v52 = vmul.f32 %v3366_v8, %v3254_v53 }
 0x9d2   :  { %v3304_v61 = vmul.f32 %v3288_v36, %v3220_v17 }
 0x9d3   :  { %v3221_v32 = vpop.f32.mrf.mxu3  ;;  %4249 = vrsqrt.f32 %v2940_v38  ;;  %vm3052_vm11 = vweird.f32 %v2940_v38 }
 0x9d4   :  { %v3222_v23 = vadd.f32 %v3221_v32, %v6680_v30  ;;  %v3320_v18 = vadd.f32 %v3304_v61, %v3220_v17 }
 0x9d6   :  { %v4248_v29 = vpop.eup %4247  ;;  %v3273_v14 = vmul.f32 0.044715, %v3222_v23  ;;  %v2901_v43 = vpop.xlane.xlu2 %2900  ;;  %v3336_v9 = vmul.f32 0.7978846, %v3320_v18 }
 0x9d7   :  { %v3367_v37 = vadd.f32 1.0, %v4248_v29  ;;  %v2925_v60 = vmul.f32 %v2901_v43, %v7011_v6 }
 0x9d8   :  { %v3289_v19 = vmul.f32 %v3273_v14, %v3222_v23  ;;  %4251 = vtanh.f32 %v3336_v9  ;;  %v3256_v9 = vmul.f32 0.5, %v3220_v17 }
 0x9d9   :  { %v3383_v33 = vmul.f32 %v3367_v37, %v3255_v51  ;;  %v4250_v3 = vpop.eup %4249  ;;  %v2941_v62 = vadd.f32 1e-05, %v2925_v60 }
 0x9da   :  { %v3305_v39 = vmul.f32 %v3289_v19, %v3222_v23  ;;  %v3047_v13 = vmul.f32 %v4250_v3, %v2940_v38  ;;  %vm3053_vm10 = vweird.f32 %v4250_v3  ;;  %v3257_v19 = vmul.f32 0.5, %v3222_v23 }
 0x9db   :  { %v3224_v40 = vpop.f32.mrf.mxu3  ;;  %v3398_v0 = vpack.c.bf16 %v3383_v33, %v3382_v52  ;;  %4253 = vrsqrt.f32 %v2941_v62  ;;  %vm6706_vm12 = vmor %vm3052_vm11, %vm3053_vm10  ;;  %vm3062_vm14 = vweird.f32 %v2941_v62 }
 0x9dc   :  { %v6698_v28 = vadd.f32 %v3224_v40, %v6680_v30  ;;  %v3321_v22 = vadd.f32 %v3305_v39, %v3222_v23  ;;  %v3048_v16 = vmul.f32 %v4250_v3, %v3047_v13 }
 0x9dd   :  { %3479 = vmatmul.bf16.vlgmr.msrb.gmra.mxu0 %v3398_v0 }
 0x9de   :  { %v3274_v31 = vmul.f32 0.044715, %v6698_v28  ;;  %v3337_v2 = vmul.f32 0.7978846, %v3321_v22  ;;  %v3049_v42 = vmul.f32 0.5, %v3048_v16  ;;  %v2904_v63 = vpop.xlane.xlu0 %2903  ;;  %v4252_v45 = vpop.eup %4251 }
 0x9df   :  { %v2926_v24 = vmul.f32 %v2904_v63, %v7011_v6  ;;  %v3368_v53 = vadd.f32 1.0, %v4252_v45 }
 0x9e0   :  { %v3290_v4 = vmul.f32 %v3274_v31, %v6698_v28  ;;  %4255 = vtanh.f32 %v3337_v2  ;;  %v3050_v58 = vsub.f32 1.5, %v3049_v42 }
 0x9e1   :  { %v4254_v36 = vpop.eup %4253  ;;  %v2942_v21 = vadd.f32 1e-05, %v2926_v24  ;;  %v3384_v22 = vmul.f32 %v3368_v53, %v3256_v9 }
 0x9e2   :  { %v3306_v57 = vmul.f32 %v3290_v4, %v6698_v28  ;;  %v3051_v61 = vmul.f32 %v4250_v3, %v3050_v58  ;;  %v3057_v32 = vmul.f32 %v4254_v36, %v2941_v62  ;;  %vm3063_vm13 = vweird.f32 %v4254_v36 }
 0x9e3   :  { %v3226_v18 = vpop.f32.mrf.mxu3  ;;  %4257 = vrsqrt.f32 %v2942_v21  ;;  %vm3064_vm15 = vmor %vm3062_vm14, %vm3063_vm13  ;;  %vm3072_vm2 = vweird.f32 %v2942_v21 }
 0x9e4   :  { %v3227_v8 = vadd.f32 %v3226_v18, %v6680_v30  ;;  %v3322_v29 = vadd.f32 %v3306_v57, %v6698_v28  ;;  %v3058_v14 = vmul.f32 %v4254_v36, %v3057_v32  ;;  %v3055_v60 = vsel %vm6706_vm12, %v4250_v3, %v3051_v61 }
 0x9e5   :  { %v3116_v2 = vmul.f32 %v3055_v60, %v6605_v20 }
 0x9e6   :  { %v4256_v51 = vpop.eup %4255  ;;  %v3275_v43 = vmul.f32 0.044715, %v3227_v8  ;;  %v3059_v52 = vmul.f32 0.5, %v3058_v14  ;;  %v2907_v33 = vpop.xlane.xlu1 %2906  ;;  %v3338_v13 = vmul.f32 0.7978846, %v3322_v29 }
 0x9e7   :  { %v3369_v39 = vadd.f32 1.0, %v4256_v51  ;;  %v2927_v38 = vmul.f32 %v2907_v33, %v7011_v6  ;;  %v3133_v57 = vmul.f32 %v6563_v35, %v3116_v2  ;;  %v3259_v33 = vmul.f32 0.5, %v3227_v8 }
 0x9e8   :  { %v3291_v40 = vmul.f32 %v3275_v43, %v3227_v8  ;;  %v3060_v0 = vsub.f32 1.5, %v3059_v52  ;;  %4259 = vtanh.f32 %v3338_v13 }
 0x9e9   :  { %v3385_v16 = vmul.f32 %v3369_v39, %v3257_v19  ;;  %v4258_v31 = vpop.eup %4257  ;;  %v2943_v17 = vadd.f32 1e-05, %v2927_v38  ;;  %v3150_v14 = vadd.f32 %v6577_v44, %v3133_v57  ;;  %v3258_v19 = vmul.f32 0.5, %v6698_v28 }
 0x9ea   :  { %v3307_v23 = vmul.f32 %v3291_v40, %v3227_v8  ;;  %v3061_v42 = vmul.f32 %v4254_v36, %v3060_v0  ;;  %v3067_v63 = vmul.f32 %v4258_v31, %v2942_v21  ;;  %vm3073_vm1 = vweird.f32 %v4258_v31 }
 0x9eb   :  { %v3399_v3 = vpack.c.bf16 %v3385_v16, %v3384_v22  ;;  %4261 = vrsqrt.f32 %v2943_v17  ;;  %vm3074_vm3 = vmor %vm3072_vm2, %vm3073_vm1  ;;  %vm3082_vm5 = vweird.f32 %v2943_v17 }
 0x9ec   :  { %v3323_v4 = vadd.f32 %v3307_v23, %v3227_v8  ;;  %v3065_v24 = vsel %vm3064_vm15, %v4254_v36, %v3061_v42  ;;  %v3068_v45 = vmul.f32 %v4258_v31, %v3067_v63 }
 0x9ed   :  { %3484 = vmatmul.bf16.gmra.mxu0 %v3399_v3  ;;  %v3117_v58 = vmul.f32 %v3065_v24, %v6613_v26 }
 0x9ee   :  { %v3339_v61 = vmul.f32 0.7978846, %v3323_v4  ;;  %v3069_v32 = vmul.f32 0.5, %v3068_v45  ;;  %v4260_v62 = vpop.eup %4259 }
 0x9ef   :  { %v3134_v20 = vmul.f32 %v6563_v35, %v3117_v58  ;;  %v3370_v43 = vadd.f32 1.0, %v4260_v62 }
 0x9f0   :  { %4263 = vtanh.f32 %v3339_v61  ;;  %v3070_v18 = vsub.f32 1.5, %v3069_v32 }
 0x9f1   :  { %v4262_v29 = vpop.eup %4261  ;;  %v3151_v53 = vadd.f32 %v6577_v44, %v3134_v20  ;;  %v3386_v40 = vmul.f32 %v3370_v43, %v3258_v19 }
 0x9f2   :  { %v3071_v51 = vmul.f32 %v4258_v31, %v3070_v18  ;;  %v3077_v36 = vmul.f32 %v4262_v29, %v2943_v17  ;;  %vm3083_vm4 = vweird.f32 %v4262_v29 }
 0x9f3   :  { %v3161_v37 = vpack.c.bf16 %v3151_v53, %v3150_v14  ;;  %vm3084_vm6 = vmor %vm3082_vm5, %vm3083_vm4 }
 0x9f4   :  { %v3078_v26 = vmul.f32 %v4262_v29, %v3077_v36  ;;  %v3075_v60 = vsel %vm3074_vm3, %v4258_v31, %v3071_v51 }
 0x9f5   :  { %3713 = vmatmul.msk.bf16.gmra.mxu3 %vm44_vm0, %v3161_v37  ;;  %v3118_v0 = vmul.f32 %v3075_v60, %v6620_v10  ;;  %v2910_v10 = vpop.xlane.xlu2 %2909 }
 0x9f6   :  { %v4264_v9 = vpop.eup %4263  ;;  %v3079_v52 = vmul.f32 0.5, %v3078_v26  ;;  %v2928_v17 = vmul.f32 %v2910_v10, %v7011_v6 }
 0x9f7   :  { %v3371_v39 = vadd.f32 1.0, %v4264_v9  ;;  %v3135_v28 = vmul.f32 %v6563_v35, %v3118_v0 }
 0x9f8   :  { %v3080_v13 = vsub.f32 1.5, %v3079_v52  ;;  %v2944_v63 = vadd.f32 1e-05, %v2928_v17 }
 0x9f9   :  { %v3387_v38 = vmul.f32 %v3371_v39, %v3259_v33  ;;  %v3152_v8 = vadd.f32 %v6577_v44, %v3135_v28 }
 0x9fa   :  { %v3081_v22 = vmul.f32 %v4262_v29, %v3080_v13  ;;  %4265 = vrsqrt.f32 %v2944_v63  ;;  %vm3092_vm8 = vweird.f32 %v2944_v63 }
 0x9fb   :  { %v3400_v21 = vpack.c.bf16 %v3387_v38, %v3386_v40 }
 0x9fc   :  { %v3085_v16 = vsel %vm3084_vm6, %v4262_v29, %v3081_v22 }
 0x9fd   :  { %3489 = vmatmul.bf16.gmra.mxu0 %v3400_v21  ;;  %v3119_v2 = vmul.f32 %v3085_v16, %v6627_v1 }
 0x9ff   :  { %v3136_v31 = vmul.f32 %v6563_v35, %v3119_v2 }
 0xa00   :  { %v4266_v3 = vpop.eup %4265 }
 0xa01   :  { %v3153_v23 = vadd.f32 %v6577_v44, %v3136_v31  ;;  %v3087_v4 = vmul.f32 %v4266_v3, %v2944_v63  ;;  %vm3093_vm7 = vweird.f32 %v4266_v3 }
 0xa02   :  { %vm3094_vm9 = vmor %vm3092_vm8, %vm3093_vm7 }
 0xa03   :  { %v3162_v42 = vpack.c.bf16 %v3153_v23, %v3152_v8  ;;  %v3088_v24 = vmul.f32 %v4266_v3, %v3087_v4 }
 0xa05   :  { %3714 = vmatmul.msk.bf16.gmra.mxu3 %vm44_vm0, %v3162_v42  ;;  %v3089_v57 = vmul.f32 0.5, %v3088_v24 }
 0xa07   :  { %v3090_v61 = vsub.f32 1.5, %v3089_v57 }
 0xa09   :  { %v3091_v20 = vmul.f32 %v4266_v3, %v3090_v61 }
 0xa0b   :  { %v3095_v29 = vsel %vm3094_vm9, %v4266_v3, %v3091_v20 }
 0xa0c   :  { %v3120_v51 = vmul.f32 %v3095_v29, %v6634_v12  ;;  %v4306_v29 = vld [vmem:[%s6850_s1] sm:$0xff] }
 0xa0e   :  { %v3137_v43 = vmul.f32 %v6563_v35, %v3120_v51 }
 0xa10   :  { %v3154_v52 = vadd.f32 %v6577_v44, %v3137_v43 }
 0xa1f   :  { %v2913_v1 = vpop.xlane.xlu0 %2912 }
 0xa20   :  { %v2929_v45 = vmul.f32 %v2913_v1, %v7011_v6 }
 0xa22   :  { %v2945_v58 = vadd.f32 1e-05, %v2929_v45 }
 0xa24   :  { %4267 = vrsqrt.f32 %v2945_v58  ;;  %vm3102_vm11 = vweird.f32 %v2945_v58 }
 0xa2a   :  { %v4268_v32 = vpop.eup %4267 }
 0xa2b   :  { %v3097_v62 = vmul.f32 %v4268_v32, %v2945_v58  ;;  %vm3103_vm10 = vweird.f32 %v4268_v32 }
 0xa2c   :  { %vm3104_vm12 = vmor %vm3102_vm11, %vm3103_vm10 }
 0xa2d   :  { %v3098_v18 = vmul.f32 %v4268_v32, %v3097_v62 }
 0xa2f   :  { %v3099_v14 = vmul.f32 0.5, %v3098_v18 }
 0xa31   :  { %v3100_v53 = vsub.f32 1.5, %v3099_v14  ;;  %v6744_v14 = vperm.slane %v4306_v29, 5 }
 0xa33   :  { %v3101_v36 = vmul.f32 %v4268_v32, %v3100_v53 }
 0xa35   :  { %v3105_v6 = vsel %vm3104_vm12, %v4268_v32, %v3101_v36 }
 0xa36   :  { %v3121_v37 = vmul.f32 %v3105_v6, %v6655_v7  ;;  %v3229_v26 = vpop.f32.mrf.mxu3 }
 0xa37   :  { %v3230_v9 = vadd.f32 %v3229_v26, %v6680_v30 }
 0xa38   :  { %v3138_v19 = vmul.f32 %v6563_v35, %v3121_v37 }
 0xa39   :  { %v3276_v60 = vmul.f32 0.044715, %v3230_v9  ;;  %v3260_v1 = vmul.f32 0.5, %v3230_v9 }
 0xa3a   :  { %v3155_v33 = vadd.f32 %v6577_v44, %v3138_v19 }
 0xa3b   :  { %v3292_v39 = vmul.f32 %v3276_v60, %v3230_v9 }
 0xa3c   :  { %v3163_v12 = vpack.c.bf16 %v3155_v33, %v3154_v52 }
 0xa3d   :  { %v3308_v13 = vmul.f32 %v3292_v39, %v3230_v9 }
 0xa3e   :  { %v3231_v40 = vpop.f32.mrf.mxu3  ;;  %3715 = vmatmul.msk.bf16.gmra.mxu3 %vm44_vm0, %v3163_v12 }
 0xa3f   :  { %v3232_v7 = vadd.f32 %v3231_v40, %v6680_v30  ;;  %v3324_v38 = vadd.f32 %v3308_v13, %v3230_v9 }
 0xa41   :  { %v3277_v0 = vmul.f32 0.044715, %v3232_v7  ;;  %v3340_v21 = vmul.f32 0.7978846, %v3324_v38  ;;  %v3261_v45 = vmul.f32 0.5, %v3232_v7 }
 0xa43   :  { %v3293_v22 = vmul.f32 %v3277_v0, %v3232_v7  ;;  %4269 = vtanh.f32 %v3340_v21 }
 0xa45   :  { %v3309_v16 = vmul.f32 %v3293_v22, %v3232_v7 }
 0xa46   :  { %v3234_v2 = vpop.f32.mrf.mxu3 }
 0xa47   :  { %v3235_v35 = vadd.f32 %v3234_v2, %v6680_v30  ;;  %v3325_v28 = vadd.f32 %v3309_v16, %v3232_v7 }
 0xa49   :  { %v3278_v31 = vmul.f32 0.044715, %v3235_v35  ;;  %v3341_v44 = vmul.f32 0.7978846, %v3325_v28  ;;  %v4270_v23 = vpop.eup %4269  ;;  %v3262_v60 = vmul.f32 0.5, %v3235_v35 }
 0xa4a   :  { %v3372_v3 = vadd.f32 1.0, %v4270_v23 }
 0xa4b   :  { %v3294_v8 = vmul.f32 %v3278_v31, %v3235_v35  ;;  %4271 = vtanh.f32 %v3341_v44 }
 0xa4c   :  { %v3388_v32 = vmul.f32 %v3372_v3, %v3260_v1 }
 0xa4d   :  { %v3310_v42 = vmul.f32 %v3294_v8, %v3235_v35 }
 0xa4e   :  { %v3236_v10 = vpop.f32.mrf.mxu3 }
 0xa4f   :  { %v3237_v17 = vadd.f32 %v3236_v10, %v6680_v30  ;;  %v3326_v63 = vadd.f32 %v3310_v42, %v3235_v35 }
 0xa51   :  { %v4272_v4 = vpop.eup %4271  ;;  %v3279_v24 = vmul.f32 0.044715, %v3237_v17  ;;  %v3342_v61 = vmul.f32 0.7978846, %v3326_v63  ;;  %v3263_v52 = vmul.f32 0.5, %v3237_v17 }
 0xa52   :  { %v3373_v58 = vadd.f32 1.0, %v4272_v4 }
 0xa53   :  { %v3295_v57 = vmul.f32 %v3279_v24, %v3237_v17  ;;  %4273 = vtanh.f32 %v3342_v61 }
 0xa54   :  { %v3389_v20 = vmul.f32 %v3373_v58, %v3261_v45 }
 0xa55   :  { %v3311_v62 = vmul.f32 %v3295_v57, %v3237_v17 }
 0xa56   :  { %v3401_v18 = vpack.c.bf16 %v3389_v20, %v3388_v32 }
 0xa57   :  { %v3327_v53 = vadd.f32 %v3311_v62, %v3237_v17 }
 0xa58   :  { %3494 = vmatmul.bf16.gmra.mxu0 %v3401_v18 }
 0xa59   :  { %v3343_v51 = vmul.f32 0.7978846, %v3327_v53  ;;  %v4274_v37 = vpop.eup %4273 }
 0xa5a   :  { %v3480_v36 = vpop.f32.mrf.mxu0  ;;  %v3374_v43 = vadd.f32 1.0, %v4274_v37 }
 0xa5b   :  { %v3481_v6 = vadd.f32 %v3480_v36, %v6744_v14  ;;  %4275 = vtanh.f32 %v3343_v51 }
 0xa5c   :  { %v3390_v12 = vmul.f32 %v3374_v43, %v3262_v60 }
 0xa5d   :  { %v3520_v26 = vadd.f32 %v3481_v6, %v6351_v56 }
 0xa5f   :  { %3536 = vst.msk [vmem:[%s6855_s7] sm:$0xff] %vm44_vm0, %v3520_v26 }
 0xa61   :  { %v4276_v9 = vpop.eup %4275 }
 0xa62   :  { %v3482_v19 = vpop.f32.mrf.mxu0  ;;  %v3375_v33 = vadd.f32 1.0, %v4276_v9 }
 0xa63   :  { %v3483_v39 = vadd.f32 %v3482_v19, %v6744_v14 }
 0xa64   :  { %v3391_v13 = vmul.f32 %v3375_v33, %v3263_v52 }
 0xa65   :  { %v3521_v40 = vadd.f32 %v3483_v39, %v6360_v48 }
 0xa66   :  { %v3402_v7 = vpack.c.bf16 %v3391_v13, %v3390_v12 }
 0xa67   :  { %3537 = vst.msk [vmem:[%s6855_s7 + $0x8] sm:$0xff] %vm44_vm0, %v3521_v40 }
 0xa68   :  { %3499 = vmatmul.bf16.gmra.mxu0 %v3402_v7 }
 0xa6a   :  { %v3485_v56 = vpop.f32.mrf.mxu0 }
 0xa6b   :  { %v3486_v38 = vadd.f32 %v3485_v56, %v6744_v14 }
 0xa6d   :  { %v3522_v0 = vadd.f32 %v3486_v38, %v6368_v5 }
 0xa6f   :  { %3538 = vst.msk [vmem:[%s6855_s7 + $0x10] sm:$0xff] %vm44_vm0, %v3522_v0 }
 0xa72   :  { %v3487_v22 = vpop.f32.mrf.mxu0 }
 0xa73   :  { %v3488_v48 = vadd.f32 %v3487_v22, %v6744_v14 }
 0xa75   :  { %v3523_v21 = vadd.f32 %v3488_v48, %v6377_v46 }
 0xa77   :  { %3539 = vst.msk [vmem:[%s6855_s7 + $0x18] sm:$0xff] %vm44_vm0, %v3523_v21 }
 0xa78   :  { %v3239_v16 = vpop.f32.mrf.mxu3 }
 0xa79   :  { %v3240_v2 = vadd.f32 %v3239_v16, %v6680_v30 }
 0xa7a   :  { %v3490_v35 = vpop.f32.mrf.mxu0 }
 0xa7b   :  { %v3491_v5 = vadd.f32 %v3490_v35, %v6744_v14  ;;  %v3280_v28 = vmul.f32 0.044715, %v3240_v2  ;;  %v3264_v6 = vmul.f32 0.5, %v3240_v2 }
 0xa7d   :  { %v3524_v31 = vadd.f32 %v3491_v5, %v6386_v11  ;;  %v3296_v44 = vmul.f32 %v3280_v28, %v3240_v2 }
 0xa7f   :  { %3540 = vst.msk [vmem:[%s6855_s7 + $0x20] sm:$0xff] %vm44_vm0, %v3524_v31  ;;  %v3312_v46 = vmul.f32 %v3296_v44, %v3240_v2 }
 0xa80   :  { %v3241_v8 = vpop.f32.mrf.mxu3 }
 0xa81   :  { %v3242_v23 = vadd.f32 %v3241_v8, %v6680_v30  ;;  %v3328_v10 = vadd.f32 %v3312_v46, %v3240_v2 }
 0xa82   :  { %v3492_v42 = vpop.f32.mrf.mxu0 }
 0xa83   :  { %v3493_v17 = vadd.f32 %v3492_v42, %v6744_v14  ;;  %v3281_v63 = vmul.f32 0.044715, %v3242_v23  ;;  %v3344_v24 = vmul.f32 0.7978846, %v3328_v10  ;;  %v3265_v37 = vmul.f32 0.5, %v3242_v23 }
 0xa85   :  { %v3525_v3 = vadd.f32 %v3493_v17, %v6395_v50  ;;  %v3297_v4 = vmul.f32 %v3281_v63, %v3242_v23  ;;  %4277 = vtanh.f32 %v3344_v24 }
 0xa87   :  { %3541 = vst.msk [vmem:[%s6855_s7 + $0x28] sm:$0xff] %vm44_vm0, %v3525_v3  ;;  %v3313_v11 = vmul.f32 %v3297_v4, %v3242_v23 }
 0xa88   :  { %v3244_v1 = vpop.f32.mrf.mxu3 }
 0xa89   :  { %v3245_v45 = vadd.f32 %v3244_v1, %v6680_v30  ;;  %v3329_v58 = vadd.f32 %v3313_v11, %v3242_v23 }
 0xa8b   :  { %v3282_v57 = vmul.f32 0.044715, %v3245_v45  ;;  %v3345_v61 = vmul.f32 0.7978846, %v3329_v58  ;;  %v4278_v20 = vpop.eup %4277  ;;  %v3266_v56 = vmul.f32 0.5, %v3245_v45 }
 0xa8c   :  { %v3376_v53 = vadd.f32 1.0, %v4278_v20 }
 0xa8d   :  { %v3298_v32 = vmul.f32 %v3282_v57, %v3245_v45  ;;  %4279 = vtanh.f32 %v3345_v61 }
 0xa8e   :  { %v3392_v19 = vmul.f32 %v3376_v53, %v3264_v6 }
 0xa8f   :  { %v3314_v62 = vmul.f32 %v3298_v32, %v3245_v45 }
 0xa90   :  { %v3246_v50 = vpop.f32.mrf.mxu3 }
 0xa91   :  { %v3247_v18 = vadd.f32 %v3246_v50, %v6680_v30  ;;  %v3330_v29 = vadd.f32 %v3314_v62, %v3245_v45 }
 0xa93   :  { %v4280_v51 = vpop.eup %4279  ;;  %v3283_v36 = vmul.f32 0.044715, %v3247_v18  ;;  %v3346_v9 = vmul.f32 0.7978846, %v3330_v29  ;;  %v3267_v38 = vmul.f32 0.5, %v3247_v18 }
 0xa94   :  { %v3377_v26 = vadd.f32 1.0, %v4280_v51 }
 0xa95   :  { %v3299_v43 = vmul.f32 %v3283_v36, %v3247_v18  ;;  %4281 = vtanh.f32 %v3346_v9 }
 0xa96   :  { %v3393_v60 = vmul.f32 %v3377_v26, %v3265_v37 }
 0xa97   :  { %v3315_v52 = vmul.f32 %v3299_v43, %v3247_v18 }
 0xa98   :  { %v3403_v33 = vpack.c.bf16 %v3393_v60, %v3392_v19 }
 0xa99   :  { %v3331_v39 = vadd.f32 %v3315_v52, %v3247_v18 }
 0xa9a   :  { %3504 = vmatmul.bf16.gmra.mxu0 %v3403_v33 }
 0xa9b   :  { %v3347_v12 = vmul.f32 0.7978846, %v3331_v39  ;;  %v4282_v13 = vpop.eup %4281 }
 0xa9c   :  { %v3378_v40 = vadd.f32 1.0, %v4282_v13 }
 0xa9d   :  { %4283 = vtanh.f32 %v3347_v12 }
 0xa9e   :  { %v3394_v22 = vmul.f32 %v3378_v40, %v3266_v56 }
 0xaa3   :  { %v4284_v7 = vpop.eup %4283 }
 0xaa4   :  { %v3379_v0 = vadd.f32 1.0, %v4284_v7 }
 0xaa6   :  { %v3395_v48 = vmul.f32 %v3379_v0, %v3267_v38 }
 0xaa8   :  { %v3404_v21 = vpack.c.bf16 %v3395_v48, %v3394_v22 }
 0xaaa   :  { %3509 = vmatmul.bf16.gmra.mxu0 %v3404_v21 }
 0xac1   :  { %v3249_v16 = vpop.f32.mrf.mxu3 }
 0xac2   :  { %v3250_v2 = vadd.f32 %v3249_v16, %v6680_v30 }
 0xac4   :  { %v3284_v35 = vmul.f32 0.044715, %v3250_v2  ;;  %v3268_v58 = vmul.f32 0.5, %v3250_v2 }
 0xac6   :  { %v3300_v5 = vmul.f32 %v3284_v35, %v3250_v2 }
 0xac8   :  { %v3316_v28 = vmul.f32 %v3300_v5, %v3250_v2 }
 0xac9   :  { %v3251_v31 = vpop.f32.mrf.mxu3 }
 0xaca   :  { %v3252_v44 = vadd.f32 %v3251_v31, %v6680_v30  ;;  %v3332_v46 = vadd.f32 %v3316_v28, %v3250_v2 }
 0xacc   :  { %v3285_v8 = vmul.f32 0.044715, %v3252_v44  ;;  %v3348_v42 = vmul.f32 0.7978846, %v3332_v46  ;;  %v3269_v57 = vmul.f32 0.5, %v3252_v44 }
 0xace   :  { %v3301_v23 = vmul.f32 %v3285_v8, %v3252_v44  ;;  %4285 = vtanh.f32 %v3348_v42 }
 0xad0   :  { %v3317_v10 = vmul.f32 %v3301_v23, %v3252_v44 }
 0xad2   :  { %v3333_v17 = vadd.f32 %v3317_v10, %v3252_v44 }
 0xad4   :  { %v3349_v63 = vmul.f32 0.7978846, %v3333_v17  ;;  %v4286_v24 = vpop.eup %4285 }
 0xad5   :  { %v3495_v3 = vpop.f32.mrf.mxu0  ;;  %v3380_v30 = vadd.f32 1.0, %v4286_v24 }
 0xad6   :  { %v3496_v4 = vadd.f32 %v3495_v3, %v6744_v14  ;;  %4287 = vtanh.f32 %v3349_v63 }
 0xad7   :  { %v3396_v20 = vmul.f32 %v3380_v30, %v3268_v58 }
 0xad8   :  { %v3526_v11 = vadd.f32 %v3496_v4, %v6405_v25 }
 0xada   :  { %3542 = vst.msk [vmem:[%s6855_s7 + $0x30] sm:$0xff] %vm44_vm0, %v3526_v11 }
 0xadc   :  { %v4288_v1 = vpop.eup %4287 }
 0xadd   :  { %v3497_v45 = vpop.f32.mrf.mxu0  ;;  %v3381_v61 = vadd.f32 1.0, %v4288_v1 }
 0xade   :  { %v3498_v32 = vadd.f32 %v3497_v45, %v6744_v14 }
 0xadf   :  { %v3397_v62 = vmul.f32 %v3381_v61, %v3269_v57 }
 0xae0   :  { %v3527_v50 = vadd.f32 %v3498_v32, %v6435_v55 }
 0xae1   :  { %v3405_v18 = vpack.c.bf16 %v3397_v62, %v3396_v20 }
 0xae2   :  { %3543 = vst.msk [vmem:[%s6855_s7 + $0x38] sm:$0xff] %vm44_vm0, %v3527_v50 }
 0xae3   :  { %3514 = vmatmul.bf16.gmra.mxu0 %v3405_v18 }
 0xae5   :  { %v3500_v25 = vpop.f32.mrf.mxu0 }
 0xae6   :  { %v3501_v29 = vadd.f32 %v3500_v25, %v6744_v14 }
 0xae8   :  { %v3528_v53 = vadd.f32 %v3501_v29, %v6450_v47 }
 0xaea   :  { %3544 = vst.msk [vmem:[%s6855_s7 + $0x40] sm:$0xff] %vm44_vm0, %v3528_v53 }
 0xaed   :  { %v3502_v51 = vpop.f32.mrf.mxu0 }
 0xaee   :  { %v3503_v55 = vadd.f32 %v3502_v51, %v6744_v14 }
 0xaf0   :  { %v3529_v36 = vadd.f32 %v3503_v55, %v6465_v15 }
 0xaf2   :  { %3545 = vst.msk [vmem:[%s6855_s7 + $0x48] sm:$0xff] %vm44_vm0, %v3529_v36 }
 0xb17   :  { %v3505_v6 = vpop.f32.mrf.mxu0 }
 0xb18   :  { %v3506_v37 = vadd.f32 %v3505_v6, %v6744_v14 }
 0xb1a   :  { %v3530_v47 = vadd.f32 %v3506_v37, %v6500_v54 }
 0xb1c   :  { %3546 = vst.msk [vmem:[%s6855_s7 + $0x50] sm:$0xff] %vm44_vm0, %v3530_v47 }
 0xb1f   :  { %v3507_v26 = vpop.f32.mrf.mxu0 }
 0xb20   :  { %v3508_v43 = vadd.f32 %v3507_v26, %v6744_v14 }
 0xb22   :  { %v3531_v15 = vadd.f32 %v3508_v43, %v6508_v59 }
 0xb24   :  { %3547 = vst.msk [vmem:[%s6855_s7 + $0x58] sm:$0xff] %vm44_vm0, %v3531_v15 }
 0xb27   :  { %v3510_v9 = vpop.f32.mrf.mxu0 }
 0xb28   :  { %v3511_v19 = vadd.f32 %v3510_v9, %v6744_v14 }
 0xb2a   :  { %v3532_v54 = vadd.f32 %v3511_v19, %v6516_v34 }
 0xb2c   :  { %3548 = vst.msk [vmem:[%s6855_s7 + $0x60] sm:$0xff] %vm44_vm0, %v3532_v54 }
 0xb2f   :  { %v3512_v60 = vpop.f32.mrf.mxu0 }
 0xb30   :  { %v3513_v52 = vadd.f32 %v3512_v60, %v6744_v14 }
 0xb32   :  { %v3533_v59 = vadd.f32 %v3513_v52, %v6524_v41 }
 0xb34   :  { %3549 = vst.msk [vmem:[%s6855_s7 + $0x68] sm:$0xff] %vm44_vm0, %v3533_v59 }
 0xb60   :  { %v3515_v33 = vpop.f32.mrf.mxu0 }
 0xb61   :  { %v3516_v39 = vadd.f32 %v3515_v33, %v6744_v14 }
 0xb63   :  { %v3534_v34 = vadd.f32 %v3516_v39, %v6532_v49 }
 0xb65   :  { %3550 = vst.msk [vmem:[%s6855_s7 + $0x70] sm:$0xff] %vm44_vm0, %v3534_v34 }
 0xb68   :  { %v3517_v12 = vpop.f32.mrf.mxu0 }
 0xb69   :  { %v3518_v13 = vadd.f32 %v3517_v12, %v6744_v14 }
 0xb6b   :  { %v3535_v41 = vadd.f32 %v3518_v13, %v6568_v27 }
 0xb6d   :  { %3551 = vst.msk [vmem:[%s6855_s7 + $0x78] sm:$0xff] %vm44_vm0, %v3535_v41 }

</bundles_post_ra>
